<compile_context>
chip_gen: v5e
topology: v5e:2x2
jax: 0.10.0
libtpu: 0.0.40
codegen_flags: <defaults>
</compile_context>

<pallas_src>
import functools

import jax
import jax.numpy as jnp
import numpy as np
from jax.experimental import pallas as pl
from jax.experimental.pallas import tpu as pltpu


def _round_up(x, m):
    return (x + m - 1) // m * m


def _pad_axis(x, axis, new_size):
    if x.shape[axis] == new_size:
        return x
    pads = [(0, 0)] * x.ndim
    pads[axis] = (0, new_size - x.shape[axis])
    return jnp.pad(x, pads)


def _pick_row_tile(total, base, target=512):
    """Largest multiple of `base` that divides `total` and is <= target."""
    best = base
    k = 2
    while k * base <= target:
        if total % (k * base) == 0:
            best = k * base
        k += 1
    return best


def _vmem_limit(nbytes):
    """Scoped-VMEM request: 2x the static block estimate, floor 32 MiB, cap 96 MiB."""
    return int(min(max(2 * nbytes + (2 << 20), 32 << 20), 96 << 20))


# --------------------------------------------------------------------------
# Kernel 1: fused input projection + LSTM recurrence over one time chunk
#   grid = (batch_tiles [parallel], time_chunks [arbitrary/sequential])
# --------------------------------------------------------------------------
def _lstm_rec_kernel(x_ref, wih_ref, b_ref, whh_ref, hs_ref,
                     gx_scr, h_scr, c_scr, *, unroll):
    # Reset the recurrent state at the first time chunk of each batch tile
    # (works under megacore sharding: scratch is per-core, condition is per-tile).
    @pl.when(pl.program_id(1) == 0)
    def _():
        h_scr[...] = jnp.zeros_like(h_scr)
        c_scr[...] = jnp.zeros_like(c_scr)

    Tc, Bt, Ep = x_ref.shape
    HP = h_scr.shape[1]              # padded hidden (multiple of 128)

    # Fused input projection for the whole chunk: one lane-dense bf16 GEMM with f32
    # accumulation, kept in VMEM scratch (no f32 gx intermediate in HBM).
    gx = (jnp.dot(x_ref[...].reshape(Tc * Bt, Ep), wih_ref[...],
                  preferred_element_type=jnp.float32)
          + b_ref[...])
    gx_scr[...] = gx.reshape(Tc, Bt, 4 * HP)

    def step(s, carry):
        gates = gx_scr[s] + jnp.dot(
            h_scr[...].astype(jnp.bfloat16), whh_ref[...],
            preferred_element_type=jnp.float32)              # (Bt, 4*HP) f32
        # Lane-aligned gate extraction (each slice is k*128 .. (k+1)*128 lanes).
        i_g = jax.nn.sigmoid(gates[:, 0 * HP:1 * HP])
        f_g = jax.nn.sigmoid(gates[:, 1 * HP:2 * HP])
        g_g = jnp.tanh(gates[:, 2 * HP:3 * HP])
        o_g = jax.nn.sigmoid(gates[:, 3 * HP:4 * HP])
        c_new = f_g * c_scr[...] + i_g * g_g
        h_new = o_g * jnp.tanh(c_new)
        c_scr[...] = c_new
        h_scr[...] = h_new
        hs_ref[s] = h_new.astype(hs_ref.dtype)   # Bt multiple of 16 -> full bf16 tiles
        return carry

    # Full unroll only while vreg pressure is small (HP<=256); else partial unroll.
    jax.lax.fori_loop(0, Tc, step, 0, unroll=unroll)


# --------------------------------------------------------------------------
# Kernel 2: output projection + masked log_softmax (lane-dense Lp output)
# --------------------------------------------------------------------------
def _out_proj_kernel(h_ref, w_ref, b_ref, o_ref, *, valid_l):
    logits = (jnp.dot(h_ref[...], w_ref[...],
                      preferred_element_type=jnp.float32)
              + b_ref[...])                                   # (Rt, Lp) f32
    lane = jax.lax.broadcasted_iota(jnp.int32, logits.shape, 1)
    valid = lane < valid_l
    masked = jnp.where(valid, logits, jnp.float32(-1e30))
    m = jnp.max(masked, axis=-1, keepdims=True)
    z = masked - m                        # z from masked logits: padded lanes stay finite/huge-negative
    ez = jnp.where(valid, jnp.exp(z), jnp.float32(0.0))
    lse = jnp.log(jnp.sum(ez, axis=-1, keepdims=True))
    o_ref[...] = (z - lse).astype(o_ref.dtype)


# --------------------------------------------------------------------------
# Forward wrapper
# --------------------------------------------------------------------------
def lem_forward(sentence, params):
    """sentence: (B, T) int32 token ids -> (B, T, L) log-softmax scores."""
    emb_tbl = params["embedding"]          # (V, E)
    w_ih_t = params["w_ih_t"]              # (E, 4H)
    w_hh_t = params["w_hh_t"]              # (H, 4H)
    b_gate = params["b_gate"]              # (1, 4H) = b_ih + b_hh
    w_out_t = params["w_out_t"]            # (H, L)
    b_out = params["b_out"]                # (1, L)

    B, T = sentence.shape
    E = emb_tbl.shape[1]
    H = w_hh_t.shape[0]
    L = w_out_t.shape[1]

    # Lane/sublane-friendly padded sizes.
    Bp = _round_up(max(B, 16), 16)       # full (16,128) bf16 tiles per step store
    if Bp > 128:                         # cap batch tile -> leading parallel axis
        Bp = _round_up(Bp, 128)          # (lets v7x megacore shard the recurrence)
        Bt = 128
    else:
        Bt = Bp
    Ep = _round_up(E, 128)
    HP = _round_up(H, 128)               # each gate occupies full 128-lane groups
    Lp = _round_up(L, 128)               # lane-dense, unmasked output stores

    # Time chunk / unroll tuned to padded hidden size (vreg-pressure cap).
    Tc_target = 16 if HP <= 256 else 32
    Tc = min(Tc_target, T)
    Tp = _round_up(T, Tc)
    unroll = True if HP <= 256 else 4

    R = Tp * Bp                          # flattened (time, batch) rows
    Rt = _pick_row_tile(R, 16, target=512)   # GEMM row tile, decoupled from Tc/Bt

    # --- weight padding: keep torch gate order (i,f,g,o); padded H columns/rows
    # are zero so padded hidden units stay exactly 0 through the recurrence.
    def gate_pad(w):                     # (..., 4H) -> (..., 4HP)
        lead = w.shape[:-1]
        w = w.reshape(lead + (4, H))
        w = _pad_axis(w, -1, HP)
        return w.reshape(lead + (4 * HP,))

    wih_p = _pad_axis(gate_pad(w_ih_t), 0, Ep).astype(jnp.bfloat16)   # (Ep, 4HP)
    whh_p = _pad_axis(gate_pad(w_hh_t), 0, HP).astype(jnp.bfloat16)   # (HP, 4HP)
    bg_p = gate_pad(b_gate)                                           # (1, 4HP) f32
    wout_p = _pad_axis(_pad_axis(w_out_t, 1, Lp), 0, HP).astype(jnp.bfloat16)  # (HP, Lp)
    bo_p = _pad_axis(b_out, 1, Lp)                                    # (1, Lp) f32

    # --- XLA glue: bf16 embedding gather, time-major via transposed indices, padding.
    # TODO(synk): embedding gather stays in XLA (per-token HBM gather has no clean
    # rectangular BlockSpec at this scale).
    emb_bf = emb_tbl.astype(jnp.bfloat16)
    x = jnp.take(emb_bf, sentence.T, axis=0)                 # (T, B, E) bf16
    x = _pad_axis(_pad_axis(_pad_axis(x, 0, Tp), 1, Bp), 2, Ep)   # (Tp, Bp, Ep)

    # --- stage 1: fused input-projection + recurrence, one grid step per
    # (batch tile, Tc timesteps); batch axis parallel (megacore), time sequential.
    n_bt = Bp // Bt
    n_tc = Tp // Tc
    rec_vmem = (2 * (Tc * Bt * Ep * 2          # x block (bf16, double-buffered)
                     + Ep * 4 * HP * 2         # w_ih
                     + 4 * HP * 4              # bias
                     + HP * 4 * HP * 2         # w_hh
                     + Tc * Bt * HP * 2)       # hs out block
                + Tc * Bt * 4 * HP * 4         # gx scratch
                + 2 * Bt * HP * 4)             # h/c scratch
    hs = pl.pallas_call(
        functools.partial(_lstm_rec_kernel, unroll=unroll),
        out_shape=jax.ShapeDtypeStruct((Tp, Bp, HP), jnp.bfloat16),
        grid_spec=pltpu.PrefetchScalarGridSpec(
            num_scalar_prefetch=0,
            grid=(n_bt, n_tc),
            in_specs=[
                pl.BlockSpec((Tc, Bt, Ep), lambda b, t: (t, b, 0)),
                pl.BlockSpec((Ep, 4 * HP), lambda b, t: (0, 0)),   # constant: DMA once
                pl.BlockSpec((1, 4 * HP), lambda b, t: (0, 0)),
                pl.BlockSpec((HP, 4 * HP), lambda b, t: (0, 0)),
            ],
            out_specs=pl.BlockSpec((Tc, Bt, HP), lambda b, t: (t, b, 0)),
            scratch_shapes=[
                pltpu.VMEM((Tc, Bt, 4 * HP), jnp.float32),   # gx chunk (fused in-proj)
                pltpu.VMEM((Bt, HP), jnp.float32),           # h state
                pltpu.VMEM((Bt, HP), jnp.float32),           # c state
            ],
        ),
        compiler_params=pltpu.CompilerParams(
            dimension_semantics=("parallel", "arbitrary"),
            vmem_limit_bytes=_vmem_limit(rec_vmem)),
    )(x, wih_p, bg_p, whh_p)

    # --- stage 2: output projection + log_softmax, large decoupled row tile.
    hs_flat = hs.reshape(R, HP)                              # layout-preserving
    out_vmem = 2 * (Rt * HP * 2 + HP * Lp * 2 + Lp * 4 + Rt * Lp * 4)
    out_flat = pl.pallas_call(
        functools.partial(_out_proj_kernel, valid_l=L),
        out_shape=jax.ShapeDtypeStruct((R, Lp), jnp.float32),
        grid_spec=pltpu.PrefetchScalarGridSpec(
            num_scalar_prefetch=0,
            grid=(R // Rt,),
            in_specs=[
                pl.BlockSpec((Rt, HP), lambda r: (r, 0)),
                pl.BlockSpec((HP, Lp), lambda r: (0, 0)),
                pl.BlockSpec((1, Lp), lambda r: (0, 0)),
            ],
            out_specs=pl.BlockSpec((Rt, Lp), lambda r: (r, 0)),
        ),
        compiler_params=pltpu.CompilerParams(
            dimension_semantics=("parallel",),
            vmem_limit_bytes=_vmem_limit(out_vmem)),
    )(hs_flat, wout_p, bo_p)

    out = out_flat.reshape(Tp, Bp, Lp)[:T, :B, :L]           # drop padding
    return jnp.transpose(out, (1, 0, 2))                     # (B, T, L) batch_first


# --------------------------------------------------------------------------
# Parameter init (torch-equivalent layout, f32)
# --------------------------------------------------------------------------
def init_params(key, vocab_size, embedding_dim, hidden_dim, lemmas_size):
    ks = jax.random.split(key, 7)
    s = 1.0 / np.sqrt(hidden_dim)
    emb = jax.random.normal(ks[0], (vocab_size, embedding_dim), jnp.float32)
    w_ih = jax.random.uniform(ks[1], (4 * hidden_dim, embedding_dim), jnp.float32, -s, s)
    w_hh = jax.random.uniform(ks[2], (4 * hidden_dim, hidden_dim), jnp.float32, -s, s)
    b_ih = jax.random.uniform(ks[3], (4 * hidden_dim,), jnp.float32, -s, s)
    b_hh = jax.random.uniform(ks[4], (4 * hidden_dim,), jnp.float32, -s, s)
    w_out = jax.random.uniform(ks[5], (lemmas_size, hidden_dim), jnp.float32, -s, s)
    b_out = jax.random.uniform(ks[6], (lemmas_size,), jnp.float32, -s, s)
    return {
        "embedding": emb,
        "w_ih_t": w_ih.T,                      # (E, 4H)
        "w_hh_t": w_hh.T,                      # (H, 4H)
        "b_gate": (b_ih + b_hh)[None, :],      # (1, 4H)
        "w_out_t": w_out.T,                    # (H, L)
        "b_out": b_out[None, :],               # (1, L)
    }


# --------------------------------------------------------------------------
# References
# --------------------------------------------------------------------------
def reference_forward_matched(sentence, params):
    """Pure-JAX reference mirroring the kernel numerics (bf16 matmuls, f32 accum)."""
    bf16 = jnp.bfloat16
    emb = jnp.take(params["embedding"], sentence, axis=0)     # (B, T, E)
    B, T, E = emb.shape
    H = params["w_hh_t"].shape[0]
    wih = params["w_ih_t"].astype(bf16)
    whh = params["w_hh_t"].astype(bf16)
    wout = params["w_out_t"].astype(bf16)

    gx = (jnp.dot(emb.astype(bf16), wih, preferred_element_type=jnp.float32)
          + params["b_gate"])                                 # (B, T, 4H) f32

    def step(carry, g_t):
        h, c = carry
        gates = g_t + jnp.dot(h.astype(bf16), whh, preferred_element_type=jnp.float32)
        i = jax.nn.sigmoid(gates[:, 0 * H:1 * H])
        f = jax.nn.sigmoid(gates[:, 1 * H:2 * H])
        g = jnp.tanh(gates[:, 2 * H:3 * H])
        o = jax.nn.sigmoid(gates[:, 3 * H:4 * H])
        c = f * c + i * g
        h = o * jnp.tanh(c)
        return (h, c), h.astype(bf16)

    h0 = jnp.zeros((B, H), jnp.float32)
    (_, _), hs = jax.lax.scan(step, (h0, h0), jnp.transpose(gx, (1, 0, 2)))
    hs = jnp.transpose(hs, (1, 0, 2))                         # (B, T, H) bf16
    logits = jnp.dot(hs, wout, preferred_element_type=jnp.float32) + params["b_out"]
    return jax.nn.log_softmax(logits, axis=2)


def reference_forward_f32(sentence, params):
    """Full-f32 reference mirroring torch semantics (gate order i,f,g,o)."""
    emb = jnp.take(params["embedding"], sentence, axis=0)     # (B, T, E)
    B, T, E = emb.shape
    H = params["w_hh_t"].shape[0]

    def step(carry, x_t):
        h, c = carry
        gates = x_t @ params["w_ih_t"] + h @ params["w_hh_t"] + params["b_gate"]
        i = jax.nn.sigmoid(gates[:, 0 * H:1 * H])
        f = jax.nn.sigmoid(gates[:, 1 * H:2 * H])
        g = jnp.tanh(gates[:, 2 * H:3 * H])
        o = jax.nn.sigmoid(gates[:, 3 * H:4 * H])
        c = f * c + i * g
        h = o * jnp.tanh(c)
        return (h, c), h

    h0 = jnp.zeros((B, H), jnp.float32)
    (_, _), hs = jax.lax.scan(step, (h0, h0), jnp.transpose(emb, (1, 0, 2)))
    hs = jnp.transpose(hs, (1, 0, 2))                         # (B, T, H)
    logits = hs @ params["w_out_t"] + params["b_out"]
    return jax.nn.log_softmax(logits, axis=2)


if __name__ == "__main__":
    vocab_size, embedding_dim, hidden_dim, lemmas_size = 50, 16, 32, 40
    B, T = 2, 8

    key = jax.random.PRNGKey(0)
    kp, kx = jax.random.split(key)
    params = init_params(kp, vocab_size, embedding_dim, hidden_dim, lemmas_size)
    sentence = jax.random.randint(kx, (B, T), 0, vocab_size, dtype=jnp.int32)

    out = jax.jit(lem_forward)(sentence, params)
    out = jax.block_until_ready(out)
    assert out.shape == (B, T, lemmas_size)

    # Tight check against a reference with identical (bf16-matmul) numerics.
    ref_m = jax.block_until_ready(reference_forward_matched(sentence, params))
    assert np.allclose(np.asarray(out), np.asarray(ref_m), atol=2e-3, rtol=2e-3)

    # Loose check against the full-f32 torch-equivalent semantics.
    ref_f = jax.block_until_ready(reference_forward_f32(sentence, params))
    assert np.allclose(np.asarray(out), np.asarray(ref_f), atol=5e-2, rtol=5e-2)

    print("KERNEL_OK")
</pallas_src>

<mosaic_0001>
module attributes {stable_mosaic.version = 11 : i64} {
  func.func @_out_proj_kernel(%arg0: i32, %arg1: memref<128x128xbf16, #tpu.memory_space<vmem>>, %arg2: memref<128x128xbf16, #tpu.memory_space<vmem>>, %arg3: memref<1x128xf32, #tpu.memory_space<vmem>>, %arg4: memref<128x128xf32, #tpu.memory_space<vmem>>) attributes {dimension_semantics = [#tpu.dimension_semantics<parallel>], iteration_bounds = array<i64: 1>, scalar_prefetch = 0 : i64, scratch_operands = 0 : i64, tpu.core_type = #tpu.core_type<tc>, window_params = [{transform_indices = @transform_0, window_bounds = array<i64: 128, 128>}, {pipeline_mode = #tpu.pipeline_mode<synchronous>, transform_indices = @transform_1, window_bounds = array<i64: 128, 128>}, {pipeline_mode = #tpu.pipeline_mode<synchronous>, transform_indices = @transform_2, window_bounds = array<i64: 1, 128>}, {transform_indices = @transform_3, window_bounds = array<i64: 128, 128>}]} {
    %c0 = arith.constant 0 : index
    %c0_0 = arith.constant 0 : index
    %0 = vector.load %arg1[%c0, %c0_0] : memref<128x128xbf16, #tpu.memory_space<vmem>>, vector<128x128xbf16>
    %c0_1 = arith.constant 0 : index
    %c0_2 = arith.constant 0 : index
    %1 = vector.load %arg2[%c0_1, %c0_2] : memref<128x128xbf16, #tpu.memory_space<vmem>>, vector<128x128xbf16>
    %cst = arith.constant dense<0.000000e+00> : vector<128x128xf32>
    %2 = tpu.matmul %0, %1, %cst {dimension_numbers = #tpu.dot_dimension_numbers<[1], [0], [0], [1], [0, 0, 1, 1], [], []>} : vector<128x128xbf16>, vector<128x128xbf16>, vector<128x128xf32> -> vector<128x128xf32>
    %c0_3 = arith.constant 0 : index
    %c0_4 = arith.constant 0 : index
    %3 = vector.load %arg3[%c0_3, %c0_4] : memref<1x128xf32, #tpu.memory_space<vmem>>, vector<1x128xf32>
    %4 = vector.broadcast %3 : vector<1x128xf32> to vector<128x128xf32>
    %5 = arith.addf %2, %4 : vector<128x128xf32>
    %6 = tpu.iota {dimensions = array<i32: 1>} : vector<128x128xi32>
    %c40_i32 = arith.constant 40 : i32
    %7 = vector.broadcast %c40_i32 : i32 to vector<128x128xi32>
    %8 = arith.cmpi slt, %6, %7 : vector<128x128xi32>
    %cst_5 = arith.constant -1.000000e+30 : f32
    %9 = vector.broadcast %cst_5 : f32 to vector<128x128xf32>
    %10 = arith.select %8, %5, %9 : vector<128x128xi1>, vector<128x128xf32>
    %cst_6 = arith.constant dense<0xFF800000> : vector<128xf32>
    %11 = vector.multi_reduction <maximumf>, %10, %cst_6 [1] : vector<128x128xf32> to vector<128xf32>
    %12 = vector.shape_cast %11 : vector<128xf32> to vector<128x1xf32>
    %13 = vector.broadcast %12 : vector<128x1xf32> to vector<128x128xf32>
    %14 = arith.subf %10, %13 : vector<128x128xf32>
    %15 = math.exp %14 : vector<128x128xf32>
    %cst_7 = arith.constant 0.000000e+00 : f32
    %16 = vector.broadcast %cst_7 : f32 to vector<128x128xf32>
    %17 = arith.select %8, %15, %16 : vector<128x128xi1>, vector<128x128xf32>
    %cst_8 = arith.constant dense<0.000000e+00> : vector<128xf32>
    %18 = vector.multi_reduction <add>, %17, %cst_8 [1] : vector<128x128xf32> to vector<128xf32>
    %19 = vector.shape_cast %18 : vector<128xf32> to vector<128x1xf32>
    %20 = math.log %19 : vector<128x1xf32>
    %21 = vector.broadcast %20 : vector<128x1xf32> to vector<128x128xf32>
    %22 = arith.subf %14, %21 : vector<128x128xf32>
    %c0_9 = arith.constant 0 : index
    %c0_10 = arith.constant 0 : index
    %23 = vector.load %arg4[%c0_9, %c0_10] : memref<128x128xf32, #tpu.memory_space<vmem>>, vector<128x128xf32>
    tpu.vector_store %arg4[%c0_9, %c0_10], %22 {strides = array<i32>} : memref<128x128xf32, #tpu.memory_space<vmem>>, vector<128x128xf32>,
    return
  }
  func.func @transform_0(%arg0: i32) -> (i32, i32) {
    %c0_i32 = arith.constant 0 : i32
    %c0_i32_0 = arith.constant 0 : i32
    return %arg0, %c0_i32 : i32, i32
  }
  func.func @transform_1(%arg0: i32) -> (i32, i32) {
    %c0_i32 = arith.constant 0 : i32
    %c0_i32_0 = arith.constant 0 : i32
    %c0_i32_1 = arith.constant 0 : i32
    return %c0_i32, %c0_i32_0 : i32, i32
  }
  func.func @transform_2(%arg0: i32) -> (i32, i32) {
    %c0_i32 = arith.constant 0 : i32
    %c0_i32_0 = arith.constant 0 : i32
    %c0_i32_1 = arith.constant 0 : i32
    return %c0_i32, %c0_i32_0 : i32, i32
  }
  func.func @transform_3(%arg0: i32) -> (i32, i32) {
    %c0_i32 = arith.constant 0 : i32
    %c0_i32_0 = arith.constant 0 : i32
    return %arg0, %c0_i32 : i32, i32
  }
}

module attributes {stable_mosaic.version = 11 : i64} {
  func.func @_lstm_rec_kernel(%arg0: i32, %arg1: i32, %arg2: memref<8x16x128xbf16, #tpu.memory_space<vmem>>, %arg3: memref<128x512xbf16, #tpu.memory_space<vmem>>, %arg4: memref<1x512xf32, #tpu.memory_space<vmem>>, %arg5: memref<128x512xbf16, #tpu.memory_space<vmem>>, %arg6: memref<8x16x128xbf16, #tpu.memory_space<vmem>>, %arg7: memref<8x16x512xf32, #tpu.memory_space<vmem>>, %arg8: memref<16x128xf32, #tpu.memory_space<vmem>>, %arg9: memref<16x128xf32, #tpu.memory_space<vmem>>) attributes {dimension_semantics = [#tpu.dimension_semantics<parallel>, #tpu.dimension_semantics<arbitrary>], iteration_bounds = array<i64: 1, 1>, scalar_prefetch = 0 : i64, scratch_operands = 3 : i64, tpu.core_type = #tpu.core_type<tc>, window_params = [{transform_indices = @transform_0, window_bounds = array<i64: 8, 16, 128>}, {pipeline_mode = #tpu.pipeline_mode<synchronous>, transform_indices = @transform_1, window_bounds = array<i64: 128, 512>}, {pipeline_mode = #tpu.pipeline_mode<synchronous>, transform_indices = @transform_2, window_bounds = array<i64: 1, 512>}, {pipeline_mode = #tpu.pipeline_mode<synchronous>, transform_indices = @transform_3, window_bounds = array<i64: 128, 512>}, {transform_indices = @transform_4, window_bounds = array<i64: 8, 16, 128>}]} {
    %c0_i32 = arith.constant 0 : i32
    %0 = arith.cmpi eq, %arg1, %c0_i32 : i32
    %1 = arith.extui %0 : i1 to i32
    %c0_i32_0 = arith.constant 0 : i32
    %2 = arith.cmpi ne, %1, %c0_i32_0 : i32
    scf.if %2 {
      %cst_155 = arith.constant 0.000000e+00 : f32
      %340 = vector.broadcast %cst_155 : f32 to vector<16x128xf32>
      %c0_156 = arith.constant 0 : index
      %c0_157 = arith.constant 0 : index
      %341 = vector.load %arg8[%c0_156, %c0_157] : memref<16x128xf32, #tpu.memory_space<vmem>>, vector<16x128xf32>
      tpu.vector_store %arg8[%c0_156, %c0_157], %340 {strides = array<i32>} : memref<16x128xf32, #tpu.memory_space<vmem>>, vector<16x128xf32>,
      %cst_158 = arith.constant 0.000000e+00 : f32
      %342 = vector.broadcast %cst_158 : f32 to vector<16x128xf32>
      %c0_159 = arith.constant 0 : index
      %c0_160 = arith.constant 0 : index
      %343 = vector.load %arg9[%c0_159, %c0_160] : memref<16x128xf32, #tpu.memory_space<vmem>>, vector<16x128xf32>
      tpu.vector_store %arg9[%c0_159, %c0_160], %342 {strides = array<i32>} : memref<16x128xf32, #tpu.memory_space<vmem>>, vector<16x128xf32>,
    } else {
    }
    %c0 = arith.constant 0 : index
    %c0_1 = arith.constant 0 : index
    %c0_2 = arith.constant 0 : index
    %3 = vector.load %arg2[%c0, %c0_1, %c0_2] : memref<8x16x128xbf16, #tpu.memory_space<vmem>>, vector<8x16x128xbf16>
    %4 = vector.shape_cast %3 : vector<8x16x128xbf16> to vector<128x128xbf16>
    %c0_3 = arith.constant 0 : index
    %c0_4 = arith.constant 0 : index
    %5 = vector.load %arg3[%c0_3, %c0_4] : memref<128x512xbf16, #tpu.memory_space<vmem>>, vector<128x512xbf16>
    %cst = arith.constant dense<0.000000e+00> : vector<128x512xf32>
    %6 = tpu.matmul %4, %5, %cst {dimension_numbers = #tpu.dot_dimension_numbers<[1], [0], [0], [1], [0, 0, 1, 1], [], []>} : vector<128x128xbf16>, vector<128x512xbf16>, vector<128x512xf32> -> vector<128x512xf32>
    %c0_5 = arith.constant 0 : index
    %c0_6 = arith.constant 0 : index
    %7 = vector.load %arg4[%c0_5, %c0_6] : memref<1x512xf32, #tpu.memory_space<vmem>>, vector<1x512xf32>
    %8 = vector.broadcast %7 : vector<1x512xf32> to vector<128x512xf32>
    %9 = arith.addf %6, %8 : vector<128x512xf32>
    %10 = vector.shape_cast %9 : vector<128x512xf32> to vector<8x16x512xf32>
    %c0_7 = arith.constant 0 : index
    %c0_8 = arith.constant 0 : index
    %c0_9 = arith.constant 0 : index
    %11 = vector.load %arg7[%c0_7, %c0_8, %c0_9] : memref<8x16x512xf32, #tpu.memory_space<vmem>>, vector<8x16x512xf32>
    tpu.vector_store %arg7[%c0_7, %c0_8, %c0_9], %10 {strides = array<i32>} : memref<8x16x512xf32, #tpu.memory_space<vmem>>, vector<8x16x512xf32>,
    %c0_i32_10 = arith.constant 0 : i32
    %12 = arith.index_cast %c0_i32_10 : i32 to index
    %c0_11 = arith.constant 0 : index
    %c0_12 = arith.constant 0 : index
    %13 = vector.load %arg7[%12, %c0_11, %c0_12] : memref<8x16x512xf32, #tpu.memory_space<vmem>>, vector<1x16x512xf32>
    %14 = vector.shape_cast %13 : vector<1x16x512xf32> to vector<16x512xf32>
    %c0_13 = arith.constant 0 : index
    %c0_14 = arith.constant 0 : index
    %15 = vector.load %arg8[%c0_13, %c0_14] : memref<16x128xf32, #tpu.memory_space<vmem>>, vector<16x128xf32>
    %16 = arith.truncf %15 : vector<16x128xf32> to vector<16x128xbf16>
    %c0_15 = arith.constant 0 : index
    %c0_16 = arith.constant 0 : index
    %17 = vector.load %arg5[%c0_15, %c0_16] : memref<128x512xbf16, #tpu.memory_space<vmem>>, vector<128x512xbf16>
    %cst_17 = arith.constant dense<0.000000e+00> : vector<16x512xf32>
    %18 = tpu.matmul %16, %17, %cst_17 {dimension_numbers = #tpu.dot_dimension_numbers<[1], [0], [0], [1], [0, 0, 1, 1], [], []>} : vector<16x128xbf16>, vector<128x512xbf16>, vector<16x512xf32> -> vector<16x512xf32>
    %19 = arith.addf %14, %18 : vector<16x512xf32>
    %20 = vector.extract_strided_slice %19 {offsets = [0, 0], sizes = [16, 128], strides = [1, 1]} : vector<16x512xf32> to vector<16x128xf32>
    %21 = arith.negf %20 : vector<16x128xf32>
    %22 = math.exp %21 : vector<16x128xf32>
    %cst_18 = arith.constant 1.000000e+00 : f32
    %23 = vector.broadcast %cst_18 : f32 to vector<16x128xf32>
    %24 = arith.addf %23, %22 : vector<16x128xf32>
    %25 = arith.divf %23, %24 : vector<16x128xf32>
    %26 = vector.extract_strided_slice %19 {offsets = [0, 128], sizes = [16, 128], strides = [1, 1]} : vector<16x512xf32> to vector<16x128xf32>
    %27 = arith.negf %26 : vector<16x128xf32>
    %28 = math.exp %27 : vector<16x128xf32>
    %cst_19 = arith.constant 1.000000e+00 : f32
    %29 = vector.broadcast %cst_19 : f32 to vector<16x128xf32>
    %30 = arith.addf %29, %28 : vector<16x128xf32>
    %31 = arith.divf %29, %30 : vector<16x128xf32>
    %32 = vector.extract_strided_slice %19 {offsets = [0, 256], sizes = [16, 128], strides = [1, 1]} : vector<16x512xf32> to vector<16x128xf32>
    %33 = math.tanh %32 : vector<16x128xf32>
    %34 = vector.extract_strided_slice %19 {offsets = [0, 384], sizes = [16, 128], strides = [1, 1]} : vector<16x512xf32> to vector<16x128xf32>
    %35 = arith.negf %34 : vector<16x128xf32>
    %36 = math.exp %35 : vector<16x128xf32>
    %cst_20 = arith.constant 1.000000e+00 : f32
    %37 = vector.broadcast %cst_20 : f32 to vector<16x128xf32>
    %38 = arith.addf %37, %36 : vector<16x128xf32>
    %39 = arith.divf %37, %38 : vector<16x128xf32>
    %c0_21 = arith.constant 0 : index
    %c0_22 = arith.constant 0 : index
    %40 = vector.load %arg9[%c0_21, %c0_22] : memref<16x128xf32, #tpu.memory_space<vmem>>, vector<16x128xf32>
    %41 = arith.mulf %31, %40 : vector<16x128xf32>
    %42 = arith.mulf %25, %33 : vector<16x128xf32>
    %43 = arith.addf %41, %42 : vector<16x128xf32>
    %44 = math.tanh %43 : vector<16x128xf32>
    %45 = arith.mulf %39, %44 : vector<16x128xf32>
    %c0_23 = arith.constant 0 : index
    %c0_24 = arith.constant 0 : index
    %46 = vector.load %arg9[%c0_23, %c0_24] : memref<16x128xf32, #tpu.memory_space<vmem>>, vector<16x128xf32>
    tpu.vector_store %arg9[%c0_23, %c0_24], %43 {strides = array<i32>} : memref<16x128xf32, #tpu.memory_space<vmem>>, vector<16x128xf32>,
    %c0_25 = arith.constant 0 : index
    %c0_26 = arith.constant 0 : index
    %47 = vector.load %arg8[%c0_25, %c0_26] : memref<16x128xf32, #tpu.memory_space<vmem>>, vector<16x128xf32>
    tpu.vector_store %arg8[%c0_25, %c0_26], %45 {strides = array<i32>} : memref<16x128xf32, #tpu.memory_space<vmem>>, vector<16x128xf32>,
    %48 = arith.truncf %45 : vector<16x128xf32> to vector<16x128xbf16>
    %49 = arith.index_cast %c0_i32_10 : i32 to index
    %c0_27 = arith.constant 0 : index
    %c0_28 = arith.constant 0 : index
    %50 = vector.load %arg6[%49, %c0_27, %c0_28] : memref<8x16x128xbf16, #tpu.memory_space<vmem>>, vector<1x16x128xbf16>
    %51 = vector.shape_cast %50 : vector<1x16x128xbf16> to vector<16x128xbf16>
    %52 = vector.shape_cast %48 : vector<16x128xbf16> to vector<1x16x128xbf16>
    tpu.vector_store %arg6[%49, %c0_27, %c0_28], %52 {strides = array<i32>} : memref<8x16x128xbf16, #tpu.memory_space<vmem>>, vector<1x16x128xbf16>,
    %c1_i32 = arith.constant 1 : i32
    %53 = arith.index_cast %c1_i32 : i32 to index
    %c0_29 = arith.constant 0 : index
    %c0_30 = arith.constant 0 : index
    %54 = vector.load %arg7[%53, %c0_29, %c0_30] : memref<8x16x512xf32, #tpu.memory_space<vmem>>, vector<1x16x512xf32>
    %55 = vector.shape_cast %54 : vector<1x16x512xf32> to vector<16x512xf32>
    %c0_31 = arith.constant 0 : index
    %c0_32 = arith.constant 0 : index
    %56 = vector.load %arg8[%c0_31, %c0_32] : memref<16x128xf32, #tpu.memory_space<vmem>>, vector<16x128xf32>
    %57 = arith.truncf %56 : vector<16x128xf32> to vector<16x128xbf16>
    %c0_33 = arith.constant 0 : index
    %c0_34 = arith.constant 0 : index
    %58 = vector.load %arg5[%c0_33, %c0_34] : memref<128x512xbf16, #tpu.memory_space<vmem>>, vector<128x512xbf16>
    %cst_35 = arith.constant dense<0.000000e+00> : vector<16x512xf32>
    %59 = tpu.matmul %57, %58, %cst_35 {dimension_numbers = #tpu.dot_dimension_numbers<[1], [0], [0], [1], [0, 0, 1, 1], [], []>} : vector<16x128xbf16>, vector<128x512xbf16>, vector<16x512xf32> -> vector<16x512xf32>
    %60 = arith.addf %55, %59 : vector<16x512xf32>
    %61 = vector.extract_strided_slice %60 {offsets = [0, 0], sizes = [16, 128], strides = [1, 1]} : vector<16x512xf32> to vector<16x128xf32>
    %62 = arith.negf %61 : vector<16x128xf32>
    %63 = math.exp %62 : vector<16x128xf32>
    %cst_36 = arith.constant 1.000000e+00 : f32
    %64 = vector.broadcast %cst_36 : f32 to vector<16x128xf32>
    %65 = arith.addf %64, %63 : vector<16x128xf32>
    %66 = arith.divf %64, %65 : vector<16x128xf32>
    %67 = vector.extract_strided_slice %60 {offsets = [0, 128], sizes = [16, 128], strides = [1, 1]} : vector<16x512xf32> to vector<16x128xf32>
    %68 = arith.negf %67 : vector<16x128xf32>
    %69 = math.exp %68 : vector<16x128xf32>
    %cst_37 = arith.constant 1.000000e+00 : f32
    %70 = vector.broadcast %cst_37 : f32 to vector<16x128xf32>
    %71 = arith.addf %70, %69 : vector<16x128xf32>
    %72 = arith.divf %70, %71 : vector<16x128xf32>
    %73 = vector.extract_strided_slice %60 {offsets = [0, 256], sizes = [16, 128], strides = [1, 1]} : vector<16x512xf32> to vector<16x128xf32>
    %74 = math.tanh %73 : vector<16x128xf32>
    %75 = vector.extract_strided_slice %60 {offsets = [0, 384], sizes = [16, 128], strides = [1, 1]} : vector<16x512xf32> to vector<16x128xf32>
    %76 = arith.negf %75 : vector<16x128xf32>
    %77 = math.exp %76 : vector<16x128xf32>
    %cst_38 = arith.constant 1.000000e+00 : f32
    %78 = vector.broadcast %cst_38 : f32 to vector<16x128xf32>
    %79 = arith.addf %78, %77 : vector<16x128xf32>
    %80 = arith.divf %78, %79 : vector<16x128xf32>
    %c0_39 = arith.constant 0 : index
    %c0_40 = arith.constant 0 : index
    %81 = vector.load %arg9[%c0_39, %c0_40] : memref<16x128xf32, #tpu.memory_space<vmem>>, vector<16x128xf32>
    %82 = arith.mulf %72, %81 : vector<16x128xf32>
    %83 = arith.mulf %66, %74 : vector<16x128xf32>
    %84 = arith.addf %82, %83 : vector<16x128xf32>
    %85 = math.tanh %84 : vector<16x128xf32>
    %86 = arith.mulf %80, %85 : vector<16x128xf32>
    %c0_41 = arith.constant 0 : index
    %c0_42 = arith.constant 0 : index
    %87 = vector.load %arg9[%c0_41, %c0_42] : memref<16x128xf32, #tpu.memory_space<vmem>>, vector<16x128xf32>
    tpu.vector_store %arg9[%c0_41, %c0_42], %84 {strides = array<i32>} : memref<16x128xf32, #tpu.memory_space<vmem>>, vector<16x128xf32>,
    %c0_43 = arith.constant 0 : index
    %c0_44 = arith.constant 0 : index
    %88 = vector.load %arg8[%c0_43, %c0_44] : memref<16x128xf32, #tpu.memory_space<vmem>>, vector<16x128xf32>
    tpu.vector_store %arg8[%c0_43, %c0_44], %86 {strides = array<i32>} : memref<16x128xf32, #tpu.memory_space<vmem>>, vector<16x128xf32>,
    %89 = arith.truncf %86 : vector<16x128xf32> to vector<16x128xbf16>
    %90 = arith.index_cast %c1_i32 : i32 to index
    %c0_45 = arith.constant 0 : index
    %c0_46 = arith.constant 0 : index
    %91 = vector.load %arg6[%90, %c0_45, %c0_46] : memref<8x16x128xbf16, #tpu.memory_space<vmem>>, vector<1x16x128xbf16>
    %92 = vector.shape_cast %91 : vector<1x16x128xbf16> to vector<16x128xbf16>
    %93 = vector.shape_cast %89 : vector<16x128xbf16> to vector<1x16x128xbf16>
    tpu.vector_store %arg6[%90, %c0_45, %c0_46], %93 {strides = array<i32>} : memref<8x16x128xbf16, #tpu.memory_space<vmem>>, vector<1x16x128xbf16>,
    %c2_i32 = arith.constant 2 : i32
    %94 = arith.index_cast %c2_i32 : i32 to index
    %c0_47 = arith.constant 0 : index
    %c0_48 = arith.constant 0 : index
    %95 = vector.load %arg7[%94, %c0_47, %c0_48] : memref<8x16x512xf32, #tpu.memory_space<vmem>>, vector<1x16x512xf32>
    %96 = vector.shape_cast %95 : vector<1x16x512xf32> to vector<16x512xf32>
    %c0_49 = arith.constant 0 : index
    %c0_50 = arith.constant 0 : index
    %97 = vector.load %arg8[%c0_49, %c0_50] : memref<16x128xf32, #tpu.memory_space<vmem>>, vector<16x128xf32>
    %98 = arith.truncf %97 : vector<16x128xf32> to vector<16x128xbf16>
    %c0_51 = arith.constant 0 : index
    %c0_52 = arith.constant 0 : index
    %99 = vector.load %arg5[%c0_51, %c0_52] : memref<128x512xbf16, #tpu.memory_space<vmem>>, vector<128x512xbf16>
    %cst_53 = arith.constant dense<0.000000e+00> : vector<16x512xf32>
    %100 = tpu.matmul %98, %99, %cst_53 {dimension_numbers = #tpu.dot_dimension_numbers<[1], [0], [0], [1], [0, 0, 1, 1], [], []>} : vector<16x128xbf16>, vector<128x512xbf16>, vector<16x512xf32> -> vector<16x512xf32>
    %101 = arith.addf %96, %100 : vector<16x512xf32>
    %102 = vector.extract_strided_slice %101 {offsets = [0, 0], sizes = [16, 128], strides = [1, 1]} : vector<16x512xf32> to vector<16x128xf32>
    %103 = arith.negf %102 : vector<16x128xf32>
    %104 = math.exp %103 : vector<16x128xf32>
    %cst_54 = arith.constant 1.000000e+00 : f32
    %105 = vector.broadcast %cst_54 : f32 to vector<16x128xf32>
    %106 = arith.addf %105, %104 : vector<16x128xf32>
    %107 = arith.divf %105, %106 : vector<16x128xf32>
    %108 = vector.extract_strided_slice %101 {offsets = [0, 128], sizes = [16, 128], strides = [1, 1]} : vector<16x512xf32> to vector<16x128xf32>
    %109 = arith.negf %108 : vector<16x128xf32>
    %110 = math.exp %109 : vector<16x128xf32>
    %cst_55 = arith.constant 1.000000e+00 : f32
    %111 = vector.broadcast %cst_55 : f32 to vector<16x128xf32>
    %112 = arith.addf %111, %110 : vector<16x128xf32>
    %113 = arith.divf %111, %112 : vector<16x128xf32>
    %114 = vector.extract_strided_slice %101 {offsets = [0, 256], sizes = [16, 128], strides = [1, 1]} : vector<16x512xf32> to vector<16x128xf32>
    %115 = math.tanh %114 : vector<16x128xf32>
    %116 = vector.extract_strided_slice %101 {offsets = [0, 384], sizes = [16, 128], strides = [1, 1]} : vector<16x512xf32> to vector<16x128xf32>
    %117 = arith.negf %116 : vector<16x128xf32>
    %118 = math.exp %117 : vector<16x128xf32>
    %cst_56 = arith.constant 1.000000e+00 : f32
    %119 = vector.broadcast %cst_56 : f32 to vector<16x128xf32>
    %120 = arith.addf %119, %118 : vector<16x128xf32>
    %121 = arith.divf %119, %120 : vector<16x128xf32>
    %c0_57 = arith.constant 0 : index
    %c0_58 = arith.constant 0 : index
    %122 = vector.load %arg9[%c0_57, %c0_58] : memref<16x128xf32, #tpu.memory_space<vmem>>, vector<16x128xf32>
    %123 = arith.mulf %113, %122 : vector<16x128xf32>
    %124 = arith.mulf %107, %115 : vector<16x128xf32>
    %125 = arith.addf %123, %124 : vector<16x128xf32>
    %126 = math.tanh %125 : vector<16x128xf32>
    %127 = arith.mulf %121, %126 : vector<16x128xf32>
    %c0_59 = arith.constant 0 : index
    %c0_60 = arith.constant 0 : index
    %128 = vector.load %arg9[%c0_59, %c0_60] : memref<16x128xf32, #tpu.memory_space<vmem>>, vector<16x128xf32>
    tpu.vector_store %arg9[%c0_59, %c0_60], %125 {strides = array<i32>} : memref<16x128xf32, #tpu.memory_space<vmem>>, vector<16x128xf32>,
    %c0_61 = arith.constant 0 : index
    %c0_62 = arith.constant 0 : index
    %129 = vector.load %arg8[%c0_61, %c0_62] : memref<16x128xf32, #tpu.memory_space<vmem>>, vector<16x128xf32>
    tpu.vector_store %arg8[%c0_61, %c0_62], %127 {strides = array<i32>} : memref<16x128xf32, #tpu.memory_space<vmem>>, vector<16x128xf32>,
    %130 = arith.truncf %127 : vector<16x128xf32> to vector<16x128xbf16>
    %131 = arith.index_cast %c2_i32 : i32 to index
    %c0_63 = arith.constant 0 : index
    %c0_64 = arith.constant 0 : index
    %132 = vector.load %arg6[%131, %c0_63, %c0_64] : memref<8x16x128xbf16, #tpu.memory_space<vmem>>, vector<1x16x128xbf16>
    %133 = vector.shape_cast %132 : vector<1x16x128xbf16> to vector<16x128xbf16>
    %134 = vector.shape_cast %130 : vector<16x128xbf16> to vector<1x16x128xbf16>
    tpu.vector_store %arg6[%131, %c0_63, %c0_64], %134 {strides = array<i32>} : memref<8x16x128xbf16, #tpu.memory_space<vmem>>, vector<1x16x128xbf16>,
    %c3_i32 = arith.constant 3 : i32
    %135 = arith.index_cast %c3_i32 : i32 to index
    %c0_65 = arith.constant 0 : index
    %c0_66 = arith.constant 0 : index
    %136 = vector.load %arg7[%135, %c0_65, %c0_66] : memref<8x16x512xf32, #tpu.memory_space<vmem>>, vector<1x16x512xf32>
    %137 = vector.shape_cast %136 : vector<1x16x512xf32> to vector<16x512xf32>
    %c0_67 = arith.constant 0 : index
    %c0_68 = arith.constant 0 : index
    %138 = vector.load %arg8[%c0_67, %c0_68] : memref<16x128xf32, #tpu.memory_space<vmem>>, vector<16x128xf32>
    %139 = arith.truncf %138 : vector<16x128xf32> to vector<16x128xbf16>
    %c0_69 = arith.constant 0 : index
    %c0_70 = arith.constant 0 : index
    %140 = vector.load %arg5[%c0_69, %c0_70] : memref<128x512xbf16, #tpu.memory_space<vmem>>, vector<128x512xbf16>
    %cst_71 = arith.constant dense<0.000000e+00> : vector<16x512xf32>
    %141 = tpu.matmul %139, %140, %cst_71 {dimension_numbers = #tpu.dot_dimension_numbers<[1], [0], [0], [1], [0, 0, 1, 1], [], []>} : vector<16x128xbf16>, vector<128x512xbf16>, vector<16x512xf32> -> vector<16x512xf32>
    %142 = arith.addf %137, %141 : vector<16x512xf32>
    %143 = vector.extract_strided_slice %142 {offsets = [0, 0], sizes = [16, 128], strides = [1, 1]} : vector<16x512xf32> to vector<16x128xf32>
    %144 = arith.negf %143 : vector<16x128xf32>
    %145 = math.exp %144 : vector<16x128xf32>
    %cst_72 = arith.constant 1.000000e+00 : f32
    %146 = vector.broadcast %cst_72 : f32 to vector<16x128xf32>
    %147 = arith.addf %146, %145 : vector<16x128xf32>
    %148 = arith.divf %146, %147 : vector<16x128xf32>
    %149 = vector.extract_strided_slice %142 {offsets = [0, 128], sizes = [16, 128], strides = [1, 1]} : vector<16x512xf32> to vector<16x128xf32>
    %150 = arith.negf %149 : vector<16x128xf32>
    %151 = math.exp %150 : vector<16x128xf32>
    %cst_73 = arith.constant 1.000000e+00 : f32
    %152 = vector.broadcast %cst_73 : f32 to vector<16x128xf32>
    %153 = arith.addf %152, %151 : vector<16x128xf32>
    %154 = arith.divf %152, %153 : vector<16x128xf32>
    %155 = vector.extract_strided_slice %142 {offsets = [0, 256], sizes = [16, 128], strides = [1, 1]} : vector<16x512xf32> to vector<16x128xf32>
    %156 = math.tanh %155 : vector<16x128xf32>
    %157 = vector.extract_strided_slice %142 {offsets = [0, 384], sizes = [16, 128], strides = [1, 1]} : vector<16x512xf32> to vector<16x128xf32>
    %158 = arith.negf %157 : vector<16x128xf32>
    %159 = math.exp %158 : vector<16x128xf32>
    %cst_74 = arith.constant 1.000000e+00 : f32
    %160 = vector.broadcast %cst_74 : f32 to vector<16x128xf32>
    %161 = arith.addf %160, %159 : vector<16x128xf32>
    %162 = arith.divf %160, %161 : vector<16x128xf32>
    %c0_75 = arith.constant 0 : index
    %c0_76 = arith.constant 0 : index
    %163 = vector.load %arg9[%c0_75, %c0_76] : memref<16x128xf32, #tpu.memory_space<vmem>>, vector<16x128xf32>
    %164 = arith.mulf %154, %163 : vector<16x128xf32>
    %165 = arith.mulf %148, %156 : vector<16x128xf32>
    %166 = arith.addf %164, %165 : vector<16x128xf32>
    %167 = math.tanh %166 : vector<16x128xf32>
    %168 = arith.mulf %162, %167 : vector<16x128xf32>
    %c0_77 = arith.constant 0 : index
    %c0_78 = arith.constant 0 : index
    %169 = vector.load %arg9[%c0_77, %c0_78] : memref<16x128xf32, #tpu.memory_space<vmem>>, vector<16x128xf32>
    tpu.vector_store %arg9[%c0_77, %c0_78], %166 {strides = array<i32>} : memref<16x128xf32, #tpu.memory_space<vmem>>, vector<16x128xf32>,
    %c0_79 = arith.constant 0 : index
    %c0_80 = arith.constant 0 : index
    %170 = vector.load %arg8[%c0_79, %c0_80] : memref<16x128xf32, #tpu.memory_space<vmem>>, vector<16x128xf32>
    tpu.vector_store %arg8[%c0_79, %c0_80], %168 {strides = array<i32>} : memref<16x128xf32, #tpu.memory_space<vmem>>, vector<16x128xf32>,
    %171 = arith.truncf %168 : vector<16x128xf32> to vector<16x128xbf16>
    %172 = arith.index_cast %c3_i32 : i32 to index
    %c0_81 = arith.constant 0 : index
    %c0_82 = arith.constant 0 : index
    %173 = vector.load %arg6[%172, %c0_81, %c0_82] : memref<8x16x128xbf16, #tpu.memory_space<vmem>>, vector<1x16x128xbf16>
    %174 = vector.shape_cast %173 : vector<1x16x128xbf16> to vector<16x128xbf16>
    %175 = vector.shape_cast %171 : vector<16x128xbf16> to vector<1x16x128xbf16>
    tpu.vector_store %arg6[%172, %c0_81, %c0_82], %175 {strides = array<i32>} : memref<8x16x128xbf16, #tpu.memory_space<vmem>>, vector<1x16x128xbf16>,
    %c4_i32 = arith.constant 4 : i32
    %176 = arith.index_cast %c4_i32 : i32 to index
    %c0_83 = arith.constant 0 : index
    %c0_84 = arith.constant 0 : index
    %177 = vector.load %arg7[%176, %c0_83, %c0_84] : memref<8x16x512xf32, #tpu.memory_space<vmem>>, vector<1x16x512xf32>
    %178 = vector.shape_cast %177 : vector<1x16x512xf32> to vector<16x512xf32>
    %c0_85 = arith.constant 0 : index
    %c0_86 = arith.constant 0 : index
    %179 = vector.load %arg8[%c0_85, %c0_86] : memref<16x128xf32, #tpu.memory_space<vmem>>, vector<16x128xf32>
    %180 = arith.truncf %179 : vector<16x128xf32> to vector<16x128xbf16>
    %c0_87 = arith.constant 0 : index
    %c0_88 = arith.constant 0 : index
    %181 = vector.load %arg5[%c0_87, %c0_88] : memref<128x512xbf16, #tpu.memory_space<vmem>>, vector<128x512xbf16>
    %cst_89 = arith.constant dense<0.000000e+00> : vector<16x512xf32>
    %182 = tpu.matmul %180, %181, %cst_89 {dimension_numbers = #tpu.dot_dimension_numbers<[1], [0], [0], [1], [0, 0, 1, 1], [], []>} : vector<16x128xbf16>, vector<128x512xbf16>, vector<16x512xf32> -> vector<16x512xf32>
    %183 = arith.addf %178, %182 : vector<16x512xf32>
    %184 = vector.extract_strided_slice %183 {offsets = [0, 0], sizes = [16, 128], strides = [1, 1]} : vector<16x512xf32> to vector<16x128xf32>
    %185 = arith.negf %184 : vector<16x128xf32>
    %186 = math.exp %185 : vector<16x128xf32>
    %cst_90 = arith.constant 1.000000e+00 : f32
    %187 = vector.broadcast %cst_90 : f32 to vector<16x128xf32>
    %188 = arith.addf %187, %186 : vector<16x128xf32>
    %189 = arith.divf %187, %188 : vector<16x128xf32>
    %190 = vector.extract_strided_slice %183 {offsets = [0, 128], sizes = [16, 128], strides = [1, 1]} : vector<16x512xf32> to vector<16x128xf32>
    %191 = arith.negf %190 : vector<16x128xf32>
    %192 = math.exp %191 : vector<16x128xf32>
    %cst_91 = arith.constant 1.000000e+00 : f32
    %193 = vector.broadcast %cst_91 : f32 to vector<16x128xf32>
    %194 = arith.addf %193, %192 : vector<16x128xf32>
    %195 = arith.divf %193, %194 : vector<16x128xf32>
    %196 = vector.extract_strided_slice %183 {offsets = [0, 256], sizes = [16, 128], strides = [1, 1]} : vector<16x512xf32> to vector<16x128xf32>
    %197 = math.tanh %196 : vector<16x128xf32>
    %198 = vector.extract_strided_slice %183 {offsets = [0, 384], sizes = [16, 128], strides = [1, 1]} : vector<16x512xf32> to vector<16x128xf32>
    %199 = arith.negf %198 : vector<16x128xf32>
    %200 = math.exp %199 : vector<16x128xf32>
    %cst_92 = arith.constant 1.000000e+00 : f32
    %201 = vector.broadcast %cst_92 : f32 to vector<16x128xf32>
    %202 = arith.addf %201, %200 : vector<16x128xf32>
    %203 = arith.divf %201, %202 : vector<16x128xf32>
    %c0_93 = arith.constant 0 : index
    %c0_94 = arith.constant 0 : index
    %204 = vector.load %arg9[%c0_93, %c0_94] : memref<16x128xf32, #tpu.memory_space<vmem>>, vector<16x128xf32>
    %205 = arith.mulf %195, %204 : vector<16x128xf32>
    %206 = arith.mulf %189, %197 : vector<16x128xf32>
    %207 = arith.addf %205, %206 : vector<16x128xf32>
    %208 = math.tanh %207 : vector<16x128xf32>
    %209 = arith.mulf %203, %208 : vector<16x128xf32>
    %c0_95 = arith.constant 0 : index
    %c0_96 = arith.constant 0 : index
    %210 = vector.load %arg9[%c0_95, %c0_96] : memref<16x128xf32, #tpu.memory_space<vmem>>, vector<16x128xf32>
    tpu.vector_store %arg9[%c0_95, %c0_96], %207 {strides = array<i32>} : memref<16x128xf32, #tpu.memory_space<vmem>>, vector<16x128xf32>,
    %c0_97 = arith.constant 0 : index
    %c0_98 = arith.constant 0 : index
    %211 = vector.load %arg8[%c0_97, %c0_98] : memref<16x128xf32, #tpu.memory_space<vmem>>, vector<16x128xf32>
    tpu.vector_store %arg8[%c0_97, %c0_98], %209 {strides = array<i32>} : memref<16x128xf32, #tpu.memory_space<vmem>>, vector<16x128xf32>,
    %212 = arith.truncf %209 : vector<16x128xf32> to vector<16x128xbf16>
    %213 = arith.index_cast %c4_i32 : i32 to index
    %c0_99 = arith.constant 0 : index
    %c0_100 = arith.constant 0 : index
    %214 = vector.load %arg6[%213, %c0_99, %c0_100] : memref<8x16x128xbf16, #tpu.memory_space<vmem>>, vector<1x16x128xbf16>
    %215 = vector.shape_cast %214 : vector<1x16x128xbf16> to vector<16x128xbf16>
    %216 = vector.shape_cast %212 : vector<16x128xbf16> to vector<1x16x128xbf16>
    tpu.vector_store %arg6[%213, %c0_99, %c0_100], %216 {strides = array<i32>} : memref<8x16x128xbf16, #tpu.memory_space<vmem>>, vector<1x16x128xbf16>,
    %c5_i32 = arith.constant 5 : i32
    %217 = arith.index_cast %c5_i32 : i32 to index
    %c0_101 = arith.constant 0 : index
    %c0_102 = arith.constant 0 : index
    %218 = vector.load %arg7[%217, %c0_101, %c0_102] : memref<8x16x512xf32, #tpu.memory_space<vmem>>, vector<1x16x512xf32>
    %219 = vector.shape_cast %218 : vector<1x16x512xf32> to vector<16x512xf32>
    %c0_103 = arith.constant 0 : index
    %c0_104 = arith.constant 0 : index
    %220 = vector.load %arg8[%c0_103, %c0_104] : memref<16x128xf32, #tpu.memory_space<vmem>>, vector<16x128xf32>
    %221 = arith.truncf %220 : vector<16x128xf32> to vector<16x128xbf16>
    %c0_105 = arith.constant 0 : index
    %c0_106 = arith.constant 0 : index
    %222 = vector.load %arg5[%c0_105, %c0_106] : memref<128x512xbf16, #tpu.memory_space<vmem>>, vector<128x512xbf16>
    %cst_107 = arith.constant dense<0.000000e+00> : vector<16x512xf32>
    %223 = tpu.matmul %221, %222, %cst_107 {dimension_numbers = #tpu.dot_dimension_numbers<[1], [0], [0], [1], [0, 0, 1, 1], [], []>} : vector<16x128xbf16>, vector<128x512xbf16>, vector<16x512xf32> -> vector<16x512xf32>
    %224 = arith.addf %219, %223 : vector<16x512xf32>
    %225 = vector.extract_strided_slice %224 {offsets = [0, 0], sizes = [16, 128], strides = [1, 1]} : vector<16x512xf32> to vector<16x128xf32>
    %226 = arith.negf %225 : vector<16x128xf32>
    %227 = math.exp %226 : vector<16x128xf32>
    %cst_108 = arith.constant 1.000000e+00 : f32
    %228 = vector.broadcast %cst_108 : f32 to vector<16x128xf32>
    %229 = arith.addf %228, %227 : vector<16x128xf32>
    %230 = arith.divf %228, %229 : vector<16x128xf32>
    %231 = vector.extract_strided_slice %224 {offsets = [0, 128], sizes = [16, 128], strides = [1, 1]} : vector<16x512xf32> to vector<16x128xf32>
    %232 = arith.negf %231 : vector<16x128xf32>
    %233 = math.exp %232 : vector<16x128xf32>
    %cst_109 = arith.constant 1.000000e+00 : f32
    %234 = vector.broadcast %cst_109 : f32 to vector<16x128xf32>
    %235 = arith.addf %234, %233 : vector<16x128xf32>
    %236 = arith.divf %234, %235 : vector<16x128xf32>
    %237 = vector.extract_strided_slice %224 {offsets = [0, 256], sizes = [16, 128], strides = [1, 1]} : vector<16x512xf32> to vector<16x128xf32>
    %238 = math.tanh %237 : vector<16x128xf32>
    %239 = vector.extract_strided_slice %224 {offsets = [0, 384], sizes = [16, 128], strides = [1, 1]} : vector<16x512xf32> to vector<16x128xf32>
    %240 = arith.negf %239 : vector<16x128xf32>
    %241 = math.exp %240 : vector<16x128xf32>
    %cst_110 = arith.constant 1.000000e+00 : f32
    %242 = vector.broadcast %cst_110 : f32 to vector<16x128xf32>
    %243 = arith.addf %242, %241 : vector<16x128xf32>
    %244 = arith.divf %242, %243 : vector<16x128xf32>
    %c0_111 = arith.constant 0 : index
    %c0_112 = arith.constant 0 : index
    %245 = vector.load %arg9[%c0_111, %c0_112] : memref<16x128xf32, #tpu.memory_space<vmem>>, vector<16x128xf32>
    %246 = arith.mulf %236, %245 : vector<16x128xf32>
    %247 = arith.mulf %230, %238 : vector<16x128xf32>
    %248 = arith.addf %246, %247 : vector<16x128xf32>
    %249 = math.tanh %248 : vector<16x128xf32>
    %250 = arith.mulf %244, %249 : vector<16x128xf32>
    %c0_113 = arith.constant 0 : index
    %c0_114 = arith.constant 0 : index
    %251 = vector.load %arg9[%c0_113, %c0_114] : memref<16x128xf32, #tpu.memory_space<vmem>>, vector<16x128xf32>
    tpu.vector_store %arg9[%c0_113, %c0_114], %248 {strides = array<i32>} : memref<16x128xf32, #tpu.memory_space<vmem>>, vector<16x128xf32>,
    %c0_115 = arith.constant 0 : index
    %c0_116 = arith.constant 0 : index
    %252 = vector.load %arg8[%c0_115, %c0_116] : memref<16x128xf32, #tpu.memory_space<vmem>>, vector<16x128xf32>
    tpu.vector_store %arg8[%c0_115, %c0_116], %250 {strides = array<i32>} : memref<16x128xf32, #tpu.memory_space<vmem>>, vector<16x128xf32>,
    %253 = arith.truncf %250 : vector<16x128xf32> to vector<16x128xbf16>
    %254 = arith.index_cast %c5_i32 : i32 to index
    %c0_117 = arith.constant 0 : index
    %c0_118 = arith.constant 0 : index
    %255 = vector.load %arg6[%254, %c0_117, %c0_118] : memref<8x16x128xbf16, #tpu.memory_space<vmem>>, vector<1x16x128xbf16>
    %256 = vector.shape_cast %255 : vector<1x16x128xbf16> to vector<16x128xbf16>
    %257 = vector.shape_cast %253 : vector<16x128xbf16> to vector<1x16x128xbf16>
    tpu.vector_store %arg6[%254, %c0_117, %c0_118], %257 {strides = array<i32>} : memref<8x16x128xbf16, #tpu.memory_space<vmem>>, vector<1x16x128xbf16>,
    %c6_i32 = arith.constant 6 : i32
    %258 = arith.index_cast %c6_i32 : i32 to index
    %c0_119 = arith.constant 0 : index
    %c0_120 = arith.constant 0 : index
    %259 = vector.load %arg7[%258, %c0_119, %c0_120] : memref<8x16x512xf32, #tpu.memory_space<vmem>>, vector<1x16x512xf32>
    %260 = vector.shape_cast %259 : vector<1x16x512xf32> to vector<16x512xf32>
    %c0_121 = arith.constant 0 : index
    %c0_122 = arith.constant 0 : index
    %261 = vector.load %arg8[%c0_121, %c0_122] : memref<16x128xf32, #tpu.memory_space<vmem>>, vector<16x128xf32>
    %262 = arith.truncf %261 : vector<16x128xf32> to vector<16x128xbf16>
    %c0_123 = arith.constant 0 : index
    %c0_124 = arith.constant 0 : index
    %263 = vector.load %arg5[%c0_123, %c0_124] : memref<128x512xbf16, #tpu.memory_space<vmem>>, vector<128x512xbf16>
    %cst_125 = arith.constant dense<0.000000e+00> : vector<16x512xf32>
    %264 = tpu.matmul %262, %263, %cst_125 {dimension_numbers = #tpu.dot_dimension_numbers<[1], [0], [0], [1], [0, 0, 1, 1], [], []>} : vector<16x128xbf16>, vector<128x512xbf16>, vector<16x512xf32> -> vector<16x512xf32>
    %265 = arith.addf %260, %264 : vector<16x512xf32>
    %266 = vector.extract_strided_slice %265 {offsets = [0, 0], sizes = [16, 128], strides = [1, 1]} : vector<16x512xf32> to vector<16x128xf32>
    %267 = arith.negf %266 : vector<16x128xf32>
    %268 = math.exp %267 : vector<16x128xf32>
    %cst_126 = arith.constant 1.000000e+00 : f32
    %269 = vector.broadcast %cst_126 : f32 to vector<16x128xf32>
    %270 = arith.addf %269, %268 : vector<16x128xf32>
    %271 = arith.divf %269, %270 : vector<16x128xf32>
    %272 = vector.extract_strided_slice %265 {offsets = [0, 128], sizes = [16, 128], strides = [1, 1]} : vector<16x512xf32> to vector<16x128xf32>
    %273 = arith.negf %272 : vector<16x128xf32>
    %274 = math.exp %273 : vector<16x128xf32>
    %cst_127 = arith.constant 1.000000e+00 : f32
    %275 = vector.broadcast %cst_127 : f32 to vector<16x128xf32>
    %276 = arith.addf %275, %274 : vector<16x128xf32>
    %277 = arith.divf %275, %276 : vector<16x128xf32>
    %278 = vector.extract_strided_slice %265 {offsets = [0, 256], sizes = [16, 128], strides = [1, 1]} : vector<16x512xf32> to vector<16x128xf32>
    %279 = math.tanh %278 : vector<16x128xf32>
    %280 = vector.extract_strided_slice %265 {offsets = [0, 384], sizes = [16, 128], strides = [1, 1]} : vector<16x512xf32> to vector<16x128xf32>
    %281 = arith.negf %280 : vector<16x128xf32>
    %282 = math.exp %281 : vector<16x128xf32>
    %cst_128 = arith.constant 1.000000e+00 : f32
    %283 = vector.broadcast %cst_128 : f32 to vector<16x128xf32>
    %284 = arith.addf %283, %282 : vector<16x128xf32>
    %285 = arith.divf %283, %284 : vector<16x128xf32>
    %c0_129 = arith.constant 0 : index
    %c0_130 = arith.constant 0 : index
    %286 = vector.load %arg9[%c0_129, %c0_130] : memref<16x128xf32, #tpu.memory_space<vmem>>, vector<16x128xf32>
    %287 = arith.mulf %277, %286 : vector<16x128xf32>
    %288 = arith.mulf %271, %279 : vector<16x128xf32>
    %289 = arith.addf %287, %288 : vector<16x128xf32>
    %290 = math.tanh %289 : vector<16x128xf32>
    %291 = arith.mulf %285, %290 : vector<16x128xf32>
    %c0_131 = arith.constant 0 : index
    %c0_132 = arith.constant 0 : index
    %292 = vector.load %arg9[%c0_131, %c0_132] : memref<16x128xf32, #tpu.memory_space<vmem>>, vector<16x128xf32>
    tpu.vector_store %arg9[%c0_131, %c0_132], %289 {strides = array<i32>} : memref<16x128xf32, #tpu.memory_space<vmem>>, vector<16x128xf32>,
    %c0_133 = arith.constant 0 : index
    %c0_134 = arith.constant 0 : index
    %293 = vector.load %arg8[%c0_133, %c0_134] : memref<16x128xf32, #tpu.memory_space<vmem>>, vector<16x128xf32>
    tpu.vector_store %arg8[%c0_133, %c0_134], %291 {strides = array<i32>} : memref<16x128xf32, #tpu.memory_space<vmem>>, vector<16x128xf32>,
    %294 = arith.truncf %291 : vector<16x128xf32> to vector<16x128xbf16>
    %295 = arith.index_cast %c6_i32 : i32 to index
    %c0_135 = arith.constant 0 : index
    %c0_136 = arith.constant 0 : index
    %296 = vector.load %arg6[%295, %c0_135, %c0_136] : memref<8x16x128xbf16, #tpu.memory_space<vmem>>, vector<1x16x128xbf16>
    %297 = vector.shape_cast %296 : vector<1x16x128xbf16> to vector<16x128xbf16>
    %298 = vector.shape_cast %294 : vector<16x128xbf16> to vector<1x16x128xbf16>
    tpu.vector_store %arg6[%295, %c0_135, %c0_136], %298 {strides = array<i32>} : memref<8x16x128xbf16, #tpu.memory_space<vmem>>, vector<1x16x128xbf16>,
    %c7_i32 = arith.constant 7 : i32
    %299 = arith.index_cast %c7_i32 : i32 to index
    %c0_137 = arith.constant 0 : index
    %c0_138 = arith.constant 0 : index
    %300 = vector.load %arg7[%299, %c0_137, %c0_138] : memref<8x16x512xf32, #tpu.memory_space<vmem>>, vector<1x16x512xf32>
    %301 = vector.shape_cast %300 : vector<1x16x512xf32> to vector<16x512xf32>
    %c0_139 = arith.constant 0 : index
    %c0_140 = arith.constant 0 : index
    %302 = vector.load %arg8[%c0_139, %c0_140] : memref<16x128xf32, #tpu.memory_space<vmem>>, vector<16x128xf32>
    %303 = arith.truncf %302 : vector<16x128xf32> to vector<16x128xbf16>
    %c0_141 = arith.constant 0 : index
    %c0_142 = arith.constant 0 : index
    %304 = vector.load %arg5[%c0_141, %c0_142] : memref<128x512xbf16, #tpu.memory_space<vmem>>, vector<128x512xbf16>
    %cst_143 = arith.constant dense<0.000000e+00> : vector<16x512xf32>
    %305 = tpu.matmul %303, %304, %cst_143 {dimension_numbers = #tpu.dot_dimension_numbers<[1], [0], [0], [1], [0, 0, 1, 1], [], []>} : vector<16x128xbf16>, vector<128x512xbf16>, vector<16x512xf32> -> vector<16x512xf32>
    %306 = arith.addf %301, %305 : vector<16x512xf32>
    %307 = vector.extract_strided_slice %306 {offsets = [0, 0], sizes = [16, 128], strides = [1, 1]} : vector<16x512xf32> to vector<16x128xf32>
    %308 = arith.negf %307 : vector<16x128xf32>
    %309 = math.exp %308 : vector<16x128xf32>
    %cst_144 = arith.constant 1.000000e+00 : f32
    %310 = vector.broadcast %cst_144 : f32 to vector<16x128xf32>
    %311 = arith.addf %310, %309 : vector<16x128xf32>
    %312 = arith.divf %310, %311 : vector<16x128xf32>
    %313 = vector.extract_strided_slice %306 {offsets = [0, 128], sizes = [16, 128], strides = [1, 1]} : vector<16x512xf32> to vector<16x128xf32>
    %314 = arith.negf %313 : vector<16x128xf32>
    %315 = math.exp %314 : vector<16x128xf32>
    %cst_145 = arith.constant 1.000000e+00 : f32
    %316 = vector.broadcast %cst_145 : f32 to vector<16x128xf32>
    %317 = arith.addf %316, %315 : vector<16x128xf32>
    %318 = arith.divf %316, %317 : vector<16x128xf32>
    %319 = vector.extract_strided_slice %306 {offsets = [0, 256], sizes = [16, 128], strides = [1, 1]} : vector<16x512xf32> to vector<16x128xf32>
    %320 = math.tanh %319 : vector<16x128xf32>
    %321 = vector.extract_strided_slice %306 {offsets = [0, 384], sizes = [16, 128], strides = [1, 1]} : vector<16x512xf32> to vector<16x128xf32>
    %322 = arith.negf %321 : vector<16x128xf32>
    %323 = math.exp %322 : vector<16x128xf32>
    %cst_146 = arith.constant 1.000000e+00 : f32
    %324 = vector.broadcast %cst_146 : f32 to vector<16x128xf32>
    %325 = arith.addf %324, %323 : vector<16x128xf32>
    %326 = arith.divf %324, %325 : vector<16x128xf32>
    %c0_147 = arith.constant 0 : index
    %c0_148 = arith.constant 0 : index
    %327 = vector.load %arg9[%c0_147, %c0_148] : memref<16x128xf32, #tpu.memory_space<vmem>>, vector<16x128xf32>
    %328 = arith.mulf %318, %327 : vector<16x128xf32>
    %329 = arith.mulf %312, %320 : vector<16x128xf32>
    %330 = arith.addf %328, %329 : vector<16x128xf32>
    %331 = math.tanh %330 : vector<16x128xf32>
    %332 = arith.mulf %326, %331 : vector<16x128xf32>
    %c0_149 = arith.constant 0 : index
    %c0_150 = arith.constant 0 : index
    %333 = vector.load %arg9[%c0_149, %c0_150] : memref<16x128xf32, #tpu.memory_space<vmem>>, vector<16x128xf32>
    tpu.vector_store %arg9[%c0_149, %c0_150], %330 {strides = array<i32>} : memref<16x128xf32, #tpu.memory_space<vmem>>, vector<16x128xf32>,
    %c0_151 = arith.constant 0 : index
    %c0_152 = arith.constant 0 : index
    %334 = vector.load %arg8[%c0_151, %c0_152] : memref<16x128xf32, #tpu.memory_space<vmem>>, vector<16x128xf32>
    tpu.vector_store %arg8[%c0_151, %c0_152], %332 {strides = array<i32>} : memref<16x128xf32, #tpu.memory_space<vmem>>, vector<16x128xf32>,
    %335 = arith.truncf %332 : vector<16x128xf32> to vector<16x128xbf16>
    %336 = arith.index_cast %c7_i32 : i32 to index
    %c0_153 = arith.constant 0 : index
    %c0_154 = arith.constant 0 : index
    %337 = vector.load %arg6[%336, %c0_153, %c0_154] : memref<8x16x128xbf16, #tpu.memory_space<vmem>>, vector<1x16x128xbf16>
    %338 = vector.shape_cast %337 : vector<1x16x128xbf16> to vector<16x128xbf16>
    %339 = vector.shape_cast %335 : vector<16x128xbf16> to vector<1x16x128xbf16>
    tpu.vector_store %arg6[%336, %c0_153, %c0_154], %339 {strides = array<i32>} : memref<8x16x128xbf16, #tpu.memory_space<vmem>>, vector<1x16x128xbf16>,
    %c8_i32 = arith.constant 8 : i32
    return
  }
  func.func @transform_0(%arg0: i32, %arg1: i32) -> (i32, i32, i32) {
    %c0_i32 = arith.constant 0 : i32
    %c0_i32_0 = arith.constant 0 : i32
    return %arg1, %arg0, %c0_i32 : i32, i32, i32
  }
  func.func @transform_1(%arg0: i32, %arg1: i32) -> (i32, i32) {
    %c0_i32 = arith.constant 0 : i32
    %c0_i32_0 = arith.constant 0 : i32
    %c0_i32_1 = arith.constant 0 : i32
    return %c0_i32, %c0_i32_0 : i32, i32
  }
  func.func @transform_2(%arg0: i32, %arg1: i32) -> (i32, i32) {
    %c0_i32 = arith.constant 0 : i32
    %c0_i32_0 = arith.constant 0 : i32
    %c0_i32_1 = arith.constant 0 : i32
    return %c0_i32, %c0_i32_0 : i32, i32
  }
  func.func @transform_3(%arg0: i32, %arg1: i32) -> (i32, i32) {
    %c0_i32 = arith.constant 0 : i32
    %c0_i32_0 = arith.constant 0 : i32
    %c0_i32_1 = arith.constant 0 : i32
    return %c0_i32, %c0_i32_0 : i32, i32
  }
  func.func @transform_4(%arg0: i32, %arg1: i32) -> (i32, i32, i32) {
    %c0_i32 = arith.constant 0 : i32
    %c0_i32_0 = arith.constant 0 : i32
    return %arg1, %arg0, %c0_i32 : i32, i32, i32
  }
}

</mosaic_0001>

<bundles_post_ra>
// kernel: lem_forward.3
= control target key start
LH: loop header
LB: loop body
LE: loop exit
PB: predicated region body
PF: predicated region fallthrough
CT: control target
= control target key end

     0   :  { %v195_v16 = vlaneseq  ;;  %s891_s1 = inlined_call_operand.vmem [shape: bf16[128,128], index: 1, kind: input, shape index: {}]   ;;  %s892_s2 = inlined_call_operand.vmem [shape: f32[1,128], index: 2, kind: input, shape index: {}]   ;;  %s893_s0 = inlined_call_operand.vmem [shape: bf16[128,128], index: 0, kind: input, shape index: {}]   ;;  %s894_s3 = inlined_call_operand.vmem [shape: f32[128,128], index: 3, kind: output, shape index: {}]  }
   0x1   :  { %v489_v0 = vld [vmem:[%s891_s1 + $0x38] sm:$0xff]  ;;  %v488_v1 = vld [vmem:[%s891_s1 + $0x30] sm:$0xff]  ;;  %v487_v2 = vld [vmem:[%s891_s1 + $0x28] sm:$0xff] }
   0x2   :  { %146 = vmatpush.bf16.msra.mxu0 %v489_v0  ;;  %490 = vmatpush.bf16.msra.mxu1 %v489_v0  ;;  %v486_v3 = vld [vmem:[%s891_s1 + $0x20] sm:$0xff]  ;;  %v485_v4 = vld [vmem:[%s891_s1 + $0x18] sm:$0xff]  ;;  %v484_v5 = vld [vmem:[%s891_s1 + $0x10] sm:$0xff]  ;;  %v647_v17 = vand.u32 127, %v195_v16 }
   0x3   :  { %491 = vmatpush.bf16.msra.mxu2 %v489_v0  ;;  %492 = vmatpush.bf16.msra.mxu3 %v489_v0  ;;  %v483_v6 = vld [vmem:[%s891_s1 + $0x8] sm:$0xff]  ;;  %v482_v7 = vld [vmem:[%s891_s1] sm:$0xff]  ;;  %v476_v9 = vld [vmem:[%s893_s0 + $0x10] sm:$0xff] }
   0x4   :  { %v474_v8 = vld [vmem:[%s893_s0] sm:$0xff]  ;;  %v480_v11 = vld [vmem:[%s893_s0 + $0x30] sm:$0xff]  ;;  %v475_v12 = vld [vmem:[%s893_s0 + $0x8] sm:$0xff]  ;;  %vm197_vm0 = vcmp.lt.s32.totalorder %v647_v17, 40 }
   0x5   :  { %v478_v10 = vld [vmem:[%s893_s0 + $0x20] sm:$0xff]  ;;  %v477_v13 = vld [vmem:[%s893_s0 + $0x18] sm:$0xff]  ;;  %v479_v14 = vld [vmem:[%s893_s0 + $0x28] sm:$0xff] }
   0x6   :  { %147 = vmatpush.bf16.msra.mxu0 %v488_v1  ;;  %493 = vmatpush.bf16.msra.mxu1 %v488_v1  ;;  %v481_v15 = vld [vmem:[%s893_s0 + $0x38] sm:$0xff]  ;;  %v652_v18 = vld [vmem:[%s892_s2] ss:$0 sm:$0xff] }
   0x7   :  { %494 = vmatpush.bf16.msra.mxu2 %v488_v1  ;;  %495 = vmatpush.bf16.msra.mxu3 %v488_v1 }
   0xa   :  { %148 = vmatpush.bf16.msra.mxu0 %v487_v2  ;;  %496 = vmatpush.bf16.msra.mxu1 %v487_v2 }
   0xb   :  { %497 = vmatpush.bf16.msra.mxu2 %v487_v2  ;;  %498 = vmatpush.bf16.msra.mxu3 %v487_v2 }
   0xe   :  { %149 = vmatpush.bf16.msra.mxu0 %v486_v3  ;;  %499 = vmatpush.bf16.msra.mxu1 %v486_v3 }
   0xf   :  { %500 = vmatpush.bf16.msra.mxu2 %v486_v3  ;;  %501 = vmatpush.bf16.msra.mxu3 %v486_v3 }
  0x12   :  { %150 = vmatpush.bf16.msra.mxu0 %v485_v4  ;;  %502 = vmatpush.bf16.msra.mxu1 %v485_v4 }
  0x13   :  { %503 = vmatpush.bf16.msra.mxu2 %v485_v4  ;;  %504 = vmatpush.bf16.msra.mxu3 %v485_v4 }
  0x16   :  { %151 = vmatpush.bf16.msra.mxu0 %v484_v5  ;;  %505 = vmatpush.bf16.msra.mxu1 %v484_v5 }
  0x17   :  { %506 = vmatpush.bf16.msra.mxu2 %v484_v5  ;;  %507 = vmatpush.bf16.msra.mxu3 %v484_v5 }
  0x1a   :  { %152 = vmatpush.bf16.msra.mxu0 %v483_v6  ;;  %508 = vmatpush.bf16.msra.mxu1 %v483_v6 }
  0x1b   :  { %509 = vmatpush.bf16.msra.mxu2 %v483_v6  ;;  %510 = vmatpush.bf16.msra.mxu3 %v483_v6 }
  0x1e   :  { %153 = vmatpush.bf16.msra.mxu0 %v482_v7  ;;  %511 = vmatpush.bf16.msra.mxu1 %v482_v7 }
  0x1f   :  { %512 = vmatpush.bf16.msra.mxu2 %v482_v7  ;;  %513 = vmatpush.bf16.msra.mxu3 %v482_v7 }
  0x21   :  { %154 = vmatmul.bf16.vlgmr.msra.gmra.mxu0 %v474_v8  ;;  %164 = vmatmul.bf16.vlgmr.msra.gmra.mxu1 %v476_v9 }
  0x22   :  { %174 = vmatmul.bf16.vlgmr.msra.gmra.mxu2 %v478_v10  ;;  %184 = vmatmul.bf16.vlgmr.msra.gmra.mxu3 %v480_v11 }
  0x31   :  { %159 = vmatmul.bf16.gmra.mxu0 %v475_v12  ;;  %169 = vmatmul.bf16.gmra.mxu1 %v477_v13 }
  0x32   :  { %179 = vmatmul.bf16.gmra.mxu2 %v479_v14  ;;  %189 = vmatmul.bf16.gmra.mxu3 %v481_v15 }
  0x9e   :  { %v155_v19 = vpop.f32.mrf.mxu0  ;;  %v165_v20 = vpop.f32.mrf.mxu1 }
  0x9f   :  { %v156_v21 = vadd.f32 %v652_v18, %v155_v19  ;;  %v166_v22 = vadd.f32 %v652_v18, %v165_v20 }
  0xa1   :  { %v202_v23 = vsel %vm197_vm0, %v166_v22, -1e+30  ;;  %v198_v24 = vsel %vm197_vm0, %v156_v21, -1e+30 }
  0xa2   :  { %222 = vmax.xlane.f32.xlu2 %v202_v23  ;;  %214 = vmax.xlane.f32.xlu0 %v198_v24 }
  0xa5   :  { %v175_v25 = vpop.f32.mrf.mxu2  ;;  %v185_v26 = vpop.f32.mrf.mxu3 }
  0xa6   :  { %v176_v27 = vadd.f32 %v652_v18, %v175_v25  ;;  %v186_v28 = vadd.f32 %v652_v18, %v185_v26  ;;  %v157_v29 = vpop.f32.mrf.mxu0  ;;  %v167_v32 = vpop.f32.mrf.mxu1 }
  0xa7   :  { %v168_v33 = vadd.f32 %v652_v18, %v167_v32  ;;  %v158_v35 = vadd.f32 %v652_v18, %v157_v29 }
  0xa8   :  { %v206_v30 = vsel %vm197_vm0, %v176_v27, -1e+30  ;;  %v210_v31 = vsel %vm197_vm0, %v186_v28, -1e+30 }
  0xa9   :  { %v672_v39 = vsel %vm197_vm0, %v168_v33, -1e+30  ;;  %v199_v41 = vsel %vm197_vm0, %v158_v35, -1e+30 }
  0xaa   :  { %230 = vmax.xlane.f32.xlu2 %v206_v30  ;;  %238 = vmax.xlane.f32.xlu0 %v210_v31 }
  0xad   :  { %v177_v34 = vpop.f32.mrf.mxu2  ;;  %v187_v37 = vpop.f32.mrf.mxu3 }
  0xae   :  { %v160_v36 = vpop.f32.mrf.mxu0  ;;  %v178_v43 = vadd.f32 %v652_v18, %v177_v34  ;;  %v170_v46 = vpop.f32.mrf.mxu1  ;;  %v188_v1 = vadd.f32 %v652_v18, %v187_v37 }
  0xaf   :  { %v161_v38 = vadd.f32 %v652_v18, %v160_v36  ;;  %v171_v50 = vadd.f32 %v652_v18, %v170_v46 }
  0xb0   :  { %v691_v49 = vsel %vm197_vm0, %v178_v43, -1e+30  ;;  %v733_v2 = vsel %vm197_vm0, %v188_v1, -1e+30 }
  0xb1   :  { %v676_v40 = vsel %vm197_vm0, %v161_v38, -1e+30  ;;  %v703_v55 = vsel %vm197_vm0, %v171_v50, -1e+30 }
  0xb2   :  { %224 = vmax.xlane.f32.xlu2 %v672_v39  ;;  %218 = vmax.xlane.f32.xlu1 %v676_v40 }
  0xb3   :  { %216 = vmax.xlane.f32.xlu0 %v199_v41 }
  0xb5   :  { %v180_v42 = vpop.f32.mrf.mxu2  ;;  %v190_v45 = vpop.f32.mrf.mxu3 }
  0xb6   :  { %v181_v44 = vadd.f32 %v652_v18, %v180_v42  ;;  %v162_v48 = vpop.f32.mrf.mxu0  ;;  %v172_v58 = vpop.f32.mrf.mxu1  ;;  %v191_v59 = vadd.f32 %v652_v18, %v190_v45 }
  0xb7   :  { %v163_v51 = vadd.f32 %v652_v18, %v162_v48  ;;  %v173_v61 = vadd.f32 %v652_v18, %v172_v58 }
  0xb8   :  { %v686_v47 = vsel %vm197_vm0, %v181_v44, -1e+30  ;;  %v717_v62 = vsel %vm197_vm0, %v191_v59, -1e+30 }
  0xb9   :  { %v708_v56 = vsel %vm197_vm0, %v163_v51, -1e+30  ;;  %v726_v0 = vsel %vm197_vm0, %v173_v61, -1e+30 }
  0xba   :  { %234 = vmax.xlane.f32.xlu1 %v686_v47 }
  0xbb   :  { %232 = vmax.xlane.f32.xlu0 %v691_v49 }
  0xbd   :  { %v182_v52 = vpop.f32.mrf.mxu2  ;;  %v192_v57 = vpop.f32.mrf.mxu3 }
  0xbe   :  { %v183_v53 = vadd.f32 %v652_v18, %v182_v52  ;;  %v193_v60 = vadd.f32 %v652_v18, %v192_v57 }
  0xc0   :  { %v699_v54 = vsel %vm197_vm0, %v183_v53, -1e+30  ;;  %v721_v63 = vsel %vm197_vm0, %v193_v60, -1e+30 }
  0xc1   :  { %236 = vmax.xlane.f32.xlu2 %v699_v54 }
  0xc2   :  { %220 = vmax.xlane.f32.xlu1 %v708_v56 }
  0xc3   :  { %226 = vmax.xlane.f32.xlu0 %v703_v55 }
  0xc9   :  { %242 = vmax.xlane.f32.xlu2 %v717_v62 }
  0xca   :  { %228 = vmax.xlane.f32.xlu1 %v726_v0 }
  0xcb   :  { %244 = vmax.xlane.f32.xlu0 %v721_v63 }
  0xd2   :  { %240 = vmax.xlane.f32.xlu1 %v733_v2 }
 0x115   :  { %v223_v3 = vpop.xlane.xlu2 %222  ;;  %v215_v4 = vpop.xlane.xlu0 %214 }
 0x116   :  { %v736_v5 = vsub.f32 %v202_v23, %v223_v3  ;;  %v738_v6 = vsub.f32 %v198_v24, %v215_v4 }
 0x118   :  { %v270_v7 = vmul.f32 1.442695, %v736_v5  ;;  %v262_v8 = vmul.f32 1.442695, %v738_v6 }
 0x11a   :  { %515 = vpow2.f32 %v270_v7 }
 0x11b   :  { %517 = vpow2.f32 %v262_v8 }
 0x11d   :  { %v231_v9 = vpop.xlane.xlu2 %230  ;;  %v239_v10 = vpop.xlane.xlu0 %238 }
 0x11e   :  { %v742_v11 = vsub.f32 %v206_v30, %v231_v9  ;;  %v744_v12 = vsub.f32 %v210_v31, %v239_v10 }
 0x120   :  { %v516_v13 = vpop.eup %515  ;;  %v278_v14 = vmul.f32 1.442695, %v742_v11  ;;  %v286_v15 = vmul.f32 1.442695, %v744_v12 }
 0x121   :  { %v518_v16 = vpop.eup %517  ;;  %v298_v18 = vsel %vm197_vm0, %v516_v13, 0.0 }
 0x122   :  { %519 = vpow2.f32 %v278_v14  ;;  %318 = vadd.xlane.f32.xlu2 %v298_v18  ;;  %v294_v19 = vsel %vm197_vm0, %v518_v16, 0.0 }
 0x123   :  { %521 = vpow2.f32 %v286_v15  ;;  %310 = vadd.xlane.f32.xlu1 %v294_v19 }
 0x125   :  { %v225_v20 = vpop.xlane.xlu2 %224  ;;  %v219_v21 = vpop.xlane.xlu1 %218 }
 0x126   :  { %v753_v22 = vsub.f32 %v672_v39, %v225_v20  ;;  %v217_v23 = vpop.xlane.xlu0 %216  ;;  %v759_v27 = vsub.f32 %v676_v40, %v219_v21 }
 0x127   :  { %v755_v24 = vsub.f32 %v199_v41, %v217_v23 }
 0x128   :  { %v520_v25 = vpop.eup %519  ;;  %v272_v26 = vmul.f32 1.442695, %v753_v22  ;;  %v266_v32 = vmul.f32 1.442695, %v759_v27 }
 0x129   :  { %v522_v28 = vpop.eup %521  ;;  %v264_v29 = vmul.f32 1.442695, %v755_v24  ;;  %v302_v30 = vsel %vm197_vm0, %v520_v25, 0.0 }
 0x12a   :  { %523 = vpow2.f32 %v272_v26  ;;  %326 = vadd.xlane.f32.xlu0 %v302_v30  ;;  %v306_v31 = vsel %vm197_vm0, %v522_v28, 0.0 }
 0x12b   :  { %334 = vadd.xlane.f32.xlu1 %v306_v31  ;;  %525 = vpow2.f32 %v264_v29 }
 0x12c   :  { %527 = vpow2.f32 %v266_v32 }
 0x12d   :  { %v235_v33 = vpop.xlane.xlu1 %234 }
 0x12e   :  { %v768_v34 = vsub.f32 %v686_v47, %v235_v33  ;;  %v233_v35 = vpop.xlane.xlu0 %232 }
 0x12f   :  { %v771_v36 = vsub.f32 %v691_v49, %v233_v35 }
 0x130   :  { %v524_v37 = vpop.eup %523  ;;  %v282_v38 = vmul.f32 1.442695, %v768_v34 }
 0x131   :  { %v280_v39 = vmul.f32 1.442695, %v771_v36  ;;  %v299_v40 = vsel %vm197_vm0, %v524_v37, 0.0  ;;  %v526_v41 = vpop.eup %525 }
 0x132   :  { %529 = vpow2.f32 %v282_v38  ;;  %320 = vadd.xlane.f32.xlu0 %v299_v40  ;;  %v295_v42 = vsel %vm197_vm0, %v526_v41, 0.0  ;;  %v528_v46 = vpop.eup %527 }
 0x133   :  { %531 = vpow2.f32 %v280_v39  ;;  %312 = vadd.xlane.f32.xlu2 %v295_v42 }
 0x134   :  { %v237_v43 = vpop.xlane.xlu2 %236 }
 0x135   :  { %v780_v44 = vsub.f32 %v699_v54, %v237_v43  ;;  %v221_v45 = vpop.xlane.xlu1 %220  ;;  %v296_v54 = vsel %vm197_vm0, %v528_v46, 0.0 }
 0x136   :  { %v227_v47 = vpop.xlane.xlu0 %226  ;;  %v787_v51 = vsub.f32 %v708_v56, %v221_v45 }
 0x137   :  { %v284_v48 = vmul.f32 1.442695, %v780_v44  ;;  %v784_v49 = vsub.f32 %v703_v55, %v227_v47 }
 0x138   :  { %v530_v50 = vpop.eup %529  ;;  %v268_v55 = vmul.f32 1.442695, %v787_v51 }
 0x139   :  { %v532_v52 = vpop.eup %531  ;;  %533 = vpow2.f32 %v284_v48  ;;  %v274_v53 = vmul.f32 1.442695, %v784_v49  ;;  %v304_v57 = vsel %vm197_vm0, %v530_v50, 0.0 }
 0x13a   :  { %314 = vadd.xlane.f32.xlu0 %v296_v54  ;;  %v303_v58 = vsel %vm197_vm0, %v532_v52, 0.0 }
 0x13b   :  { %535 = vpow2.f32 %v274_v53  ;;  %328 = vadd.xlane.f32.xlu1 %v303_v58  ;;  %330 = vadd.xlane.f32.xlu2 %v304_v57 }
 0x13c   :  { %v243_v56 = vpop.xlane.xlu2 %242  ;;  %537 = vpow2.f32 %v268_v55 }
 0x13d   :  { %v798_v59 = vsub.f32 %v717_v62, %v243_v56  ;;  %v229_v60 = vpop.xlane.xlu1 %228 }
 0x13e   :  { %v801_v61 = vsub.f32 %v726_v0, %v229_v60  ;;  %v245_v1 = vpop.xlane.xlu0 %244 }
 0x13f   :  { %v534_v3 = vpop.eup %533  ;;  %v290_v4 = vmul.f32 1.442695, %v798_v59  ;;  %v806_v9 = vsub.f32 %v721_v63, %v245_v1 }
 0x140   :  { %v276_v7 = vmul.f32 1.442695, %v801_v61  ;;  %v305_v62 = vsel %vm197_vm0, %v534_v3, 0.0 }
 0x141   :  { %v536_v8 = vpop.eup %535  ;;  %539 = vpow2.f32 %v290_v4  ;;  %v292_v10 = vmul.f32 1.442695, %v806_v9 }
 0x142   :  { %541 = vpow2.f32 %v276_v7  ;;  %332 = vadd.xlane.f32.xlu0 %v305_v62  ;;  %v300_v0 = vsel %vm197_vm0, %v536_v8, 0.0  ;;  %v538_v14 = vpop.eup %537 }
 0x143   :  { %322 = vadd.xlane.f32.xlu1 %v300_v0  ;;  %543 = vpow2.f32 %v292_v10  ;;  %v297_v21 = vsel %vm197_vm0, %v538_v14, 0.0 }
 0x145   :  { %v241_v13 = vpop.xlane.xlu1 %240 }
 0x146   :  { %v814_v15 = vsub.f32 %v733_v2, %v241_v13 }
 0x147   :  { %v540_v16 = vpop.eup %539 }
 0x148   :  { %v542_v18 = vpop.eup %541  ;;  %v288_v63 = vmul.f32 1.442695, %v814_v15  ;;  %v308_v19 = vsel %vm197_vm0, %v540_v16, 0.0 }
 0x149   :  { %v301_v20 = vsel %vm197_vm0, %v542_v18, 0.0  ;;  %v544_v2 = vpop.eup %543 }
 0x14a   :  { %545 = vpow2.f32 %v288_v63  ;;  %338 = vadd.xlane.f32.xlu0 %v308_v19  ;;  %324 = vadd.xlane.f32.xlu2 %v301_v20  ;;  %v309_v26 = vsel %vm197_vm0, %v544_v2, 0.0 }
 0x14b   :  { %316 = vadd.xlane.f32.xlu1 %v297_v21 }
 0x150   :  { %v546_v23 = vpop.eup %545 }
 0x151   :  { %v307_v25 = vsel %vm197_vm0, %v546_v23, 0.0 }
 0x152   :  { %336 = vadd.xlane.f32.xlu2 %v307_v25 }
 0x153   :  { %340 = vadd.xlane.f32.xlu1 %v309_v26 }
 0x195   :  { %v319_v28 = vpop.xlane.xlu2 %318 }
 0x196   :  { %547 = vlog2.f32 %v319_v28  ;;  %v311_v29 = vpop.xlane.xlu1 %310 }
 0x197   :  { %549 = vlog2.f32 %v311_v29 }
 0x19c   :  { %v548_v30 = vpop.eup %547 }
 0x19d   :  { %v550_v31 = vpop.eup %549  ;;  %v351_v32 = vmul.f32 0.6931472, %v548_v30  ;;  %v327_v33 = vpop.xlane.xlu0 %326 }
 0x19e   :  { %v343_v35 = vmul.f32 0.6931472, %v550_v31  ;;  %v335_v37 = vpop.xlane.xlu1 %334  ;;  %551 = vlog2.f32 %v327_v33 }
 0x19f   :  { %v378_v38 = vsub.f32 %v736_v5, %v351_v32  ;;  %553 = vlog2.f32 %v335_v37 }
 0x1a0   :  { %v374_v39 = vsub.f32 %v738_v6, %v343_v35 }
 0x1a1   :  { %394 = vst [vmem:[%s894_s3 + $0x20] sm:$0xff] %v378_v38 }
 0x1a2   :  { %390 = vst [vmem:[%s894_s3] sm:$0xff] %v374_v39 }
 0x1a4   :  { %v552_v17 = vpop.eup %551 }
 0x1a5   :  { %v554_v40 = vpop.eup %553  ;;  %v359_v41 = vmul.f32 0.6931472, %v552_v17  ;;  %v321_v42 = vpop.xlane.xlu0 %320 }
 0x1a6   :  { %v367_v43 = vmul.f32 0.6931472, %v554_v40  ;;  %555 = vlog2.f32 %v321_v42  ;;  %v313_v5 = vpop.xlane.xlu2 %312 }
 0x1a7   :  { %v382_v45 = vsub.f32 %v742_v11, %v359_v41  ;;  %557 = vlog2.f32 %v313_v5 }
 0x1a8   :  { %v386_v46 = vsub.f32 %v744_v12, %v367_v43 }
 0x1a9   :  { %398 = vst [vmem:[%s894_s3 + $0x40] sm:$0xff] %v382_v45 }
 0x1aa   :  { %402 = vst [vmem:[%s894_s3 + $0x60] sm:$0xff] %v386_v46 }
 0x1ac   :  { %v556_v6 = vpop.eup %555 }
 0x1ad   :  { %v353_v47 = vmul.f32 0.6931472, %v556_v6  ;;  %v315_v48 = vpop.xlane.xlu0 %314  ;;  %v558_v50 = vpop.eup %557 }
 0x1ae   :  { %v329_v52 = vpop.xlane.xlu1 %328  ;;  %559 = vlog2.f32 %v315_v48  ;;  %v345_v53 = vmul.f32 0.6931472, %v558_v50  ;;  %v331_v54 = vpop.xlane.xlu2 %330 }
 0x1af   :  { %v379_v11 = vsub.f32 %v753_v22, %v353_v47  ;;  %561 = vlog2.f32 %v329_v52 }
 0x1b0   :  { %563 = vlog2.f32 %v331_v54  ;;  %v375_v12 = vsub.f32 %v755_v24, %v345_v53 }
 0x1b1   :  { %395 = vst [vmem:[%s894_s3 + $0x28] sm:$0xff] %v379_v11 }
 0x1b2   :  { %391 = vst [vmem:[%s894_s3 + $0x8] sm:$0xff] %v375_v12 }
 0x1b4   :  { %v560_v57 = vpop.eup %559 }
 0x1b5   :  { %v562_v58 = vpop.eup %561  ;;  %v347_v55 = vmul.f32 0.6931472, %v560_v57  ;;  %v333_v56 = vpop.xlane.xlu0 %332 }
 0x1b6   :  { %v564_v60 = vpop.eup %563  ;;  %v361_v1 = vmul.f32 0.6931472, %v562_v58  ;;  %v323_v22 = vpop.xlane.xlu1 %322  ;;  %565 = vlog2.f32 %v333_v56 }
 0x1b7   :  { %v363_v3 = vmul.f32 0.6931472, %v564_v60  ;;  %v376_v4 = vsub.f32 %v759_v27, %v347_v55  ;;  %567 = vlog2.f32 %v323_v22 }
 0x1b8   :  { %v383_v24 = vsub.f32 %v771_v36, %v361_v1 }
 0x1b9   :  { %v384_v7 = vsub.f32 %v768_v34, %v363_v3  ;;  %392 = vst [vmem:[%s894_s3 + $0x10] sm:$0xff] %v376_v4 }
 0x1ba   :  { %399 = vst [vmem:[%s894_s3 + $0x48] sm:$0xff] %v383_v24 }
 0x1bb   :  { %400 = vst [vmem:[%s894_s3 + $0x50] sm:$0xff] %v384_v7 }
 0x1bc   :  { %v566_v8 = vpop.eup %565 }
 0x1bd   :  { %v568_v62 = vpop.eup %567  ;;  %v365_v27 = vmul.f32 0.6931472, %v566_v8  ;;  %v325_v0 = vpop.xlane.xlu2 %324 }
 0x1be   :  { %v339_v10 = vpop.xlane.xlu0 %338  ;;  %v355_v36 = vmul.f32 0.6931472, %v568_v62  ;;  %569 = vlog2.f32 %v325_v0  ;;  %v317_v34 = vpop.xlane.xlu1 %316 }
 0x1bf   :  { %v385_v13 = vsub.f32 %v780_v44, %v365_v27  ;;  %571 = vlog2.f32 %v317_v34 }
 0x1c0   :  { %v380_v14 = vsub.f32 %v784_v49, %v355_v36  ;;  %573 = vlog2.f32 %v339_v10 }
 0x1c1   :  { %401 = vst [vmem:[%s894_s3 + $0x58] sm:$0xff] %v385_v13 }
 0x1c2   :  { %396 = vst [vmem:[%s894_s3 + $0x30] sm:$0xff] %v380_v14 }
 0x1c4   :  { %v570_v16 = vpop.eup %569 }
 0x1c5   :  { %v572_v18 = vpop.eup %571  ;;  %v357_v63 = vmul.f32 0.6931472, %v570_v16  ;;  %v337_v19 = vpop.xlane.xlu2 %336 }
 0x1c6   :  { %v574_v20 = vpop.eup %573  ;;  %v349_v21 = vmul.f32 0.6931472, %v572_v18  ;;  %575 = vlog2.f32 %v337_v19  ;;  %v341_v44 = vpop.xlane.xlu1 %340 }
 0x1c7   :  { %v381_v2 = vsub.f32 %v801_v61, %v357_v63  ;;  %v371_v49 = vmul.f32 0.6931472, %v574_v20  ;;  %577 = vlog2.f32 %v341_v44 }
 0x1c8   :  { %v377_v23 = vsub.f32 %v787_v51, %v349_v21 }
 0x1c9   :  { %397 = vst [vmem:[%s894_s3 + $0x38] sm:$0xff] %v381_v2  ;;  %v388_v25 = vsub.f32 %v798_v59, %v371_v49 }
 0x1ca   :  { %393 = vst [vmem:[%s894_s3 + $0x18] sm:$0xff] %v377_v23 }
 0x1cb   :  { %404 = vst [vmem:[%s894_s3 + $0x70] sm:$0xff] %v388_v25 }
 0x1cc   :  { %v576_v26 = vpop.eup %575 }
 0x1cd   :  { %v578_v61 = vpop.eup %577  ;;  %v369_v28 = vmul.f32 0.6931472, %v576_v26 }
 0x1ce   :  { %v373_v29 = vmul.f32 0.6931472, %v578_v61 }
 0x1cf   :  { %v387_v51 = vsub.f32 %v814_v15, %v369_v28 }
 0x1d0   :  { %v389_v30 = vsub.f32 %v806_v9, %v373_v29 }
 0x1d1   :  { %403 = vst [vmem:[%s894_s3 + $0x68] sm:$0xff] %v387_v51 }
 0x1d2   :  { %405 = vst [vmem:[%s894_s3 + $0x78] sm:$0xff] %v389_v30 }

// kernel: lem_forward.2
= control target key start
LH: loop header
LB: loop body
LE: loop exit
PB: predicated region body
PF: predicated region fallthrough
CT: control target
= control target key end

     0   :  { %s8449_s1 = inlined_call_operand.vmem [shape: bf16[128,512], index: 1, kind: input, shape index: {}]   ;;  %s8450_s3 = inlined_call_operand.vmem [shape: bf16[128,512], index: 3, kind: input, shape index: {}]   ;;  %s8451_s0 = inlined_call_operand.vmem [shape: bf16[8,16,128], index: 0, kind: input, shape index: {}]   ;;  %s8452_s2 = inlined_call_operand.vmem [shape: f32[1,512], index: 2, kind: input, shape index: {}]   ;;  %s8453_s4 = inlined_call_operand.vmem [shape: bf16[8,16,128], index: 4, kind: output, shape index: {}]  }
   0x1   :  { %v3939_v0 = vld [vmem:[%s8449_s1 + $0xe0] sm:$0xf]  ;;  %v5077_v1 = vld [vmem:[%s8449_s1 + $0xec] sm:$0xf0]  ;;  %v5075_v2 = vld [vmem:[%s8449_s1 + $0xe4] sm:$0xf] }
   0x2   :  { %v3940_v3 = vor.u32 %v5077_v1, %v3939_v0  ;;  %v3941_v4 = vld [vmem:[%s8449_s1 + $0xf0] sm:$0xf0]  ;;  %v3947_v5 = vld [vmem:[%s8449_s1 + $0xe8] sm:$0xf]  ;;  %v5078_v6 = vld [vmem:[%s8449_s1 + $0xf4] sm:$0xf0] }
   0x3   :  { %v3944_v7 = vor.u32 %v5075_v2, %v3941_v4  ;;  %v3948_v8 = vor.u32 %v5078_v6, %v3947_v5  ;;  %v5076_v9 = vld [vmem:[%s8449_s1 + $0xec] sm:$0xf]  ;;  %v3949_v10 = vld [vmem:[%s8449_s1 + $0xf8] sm:$0xf0]  ;;  %v3923_v11 = vld [vmem:[%s8449_s1 + $0xc0] sm:$0xf] }
   0x4   :  { %291 = vmatpush.bf16.msra.mxu0 %v3940_v3  ;;  %v3952_v12 = vor.u32 %v5076_v9, %v3949_v10  ;;  %v5073_v13 = vld [vmem:[%s8449_s1 + $0xcc] sm:$0xf0]  ;;  %v5071_v14 = vld [vmem:[%s8449_s1 + $0xc4] sm:$0xf]  ;;  %v3925_v15 = vld [vmem:[%s8449_s1 + $0xd0] sm:$0xf0] }
   0x5   :  { %340 = vmatpush.bf16.msra.mxu1 %v3944_v7  ;;  %389 = vmatpush.bf16.msra.mxu2 %v3948_v8  ;;  %v3924_v16 = vor.u32 %v5073_v13, %v3923_v11  ;;  %v3928_v17 = vor.u32 %v5071_v14, %v3925_v15  ;;  %v3931_v18 = vld [vmem:[%s8449_s1 + $0xc8] sm:$0xf]  ;;  %v5074_v19 = vld [vmem:[%s8449_s1 + $0xd4] sm:$0xf0]  ;;  %v5072_v20 = vld [vmem:[%s8449_s1 + $0xcc] sm:$0xf] }
   0x6   :  { %438 = vmatpush.bf16.msra.mxu3 %v3952_v12  ;;  %v3932_v21 = vor.u32 %v5074_v19, %v3931_v18  ;;  %v3933_v22 = vld [vmem:[%s8449_s1 + $0xd8] sm:$0xf0]  ;;  %v3907_v23 = vld [vmem:[%s8449_s1 + $0xa0] sm:$0xf]  ;;  %v5069_v24 = vld [vmem:[%s8449_s1 + $0xac] sm:$0xf0] }
   0x7   :  { %v3936_v25 = vor.u32 %v5072_v20, %v3933_v22  ;;  %v5067_v26 = vld [vmem:[%s8449_s1 + $0xa4] sm:$0xf]  ;;  %v3909_v27 = vld [vmem:[%s8449_s1 + $0xb0] sm:$0xf0]  ;;  %v3915_v28 = vld [vmem:[%s8449_s1 + $0xa8] sm:$0xf]  ;;  %v3908_v29 = vor.u32 %v5069_v24, %v3907_v23 }
   0x8   :  { %292 = vmatpush.bf16.msra.mxu0 %v3924_v16  ;;  %v5070_v30 = vld [vmem:[%s8449_s1 + $0xb4] sm:$0xf0]  ;;  %v5068_v31 = vld [vmem:[%s8449_s1 + $0xac] sm:$0xf]  ;;  %v3917_v32 = vld [vmem:[%s8449_s1 + $0xb8] sm:$0xf0]  ;;  %v3912_v33 = vor.u32 %v5067_v26, %v3909_v27 }
   0x9   :  { %341 = vmatpush.bf16.msra.mxu1 %v3928_v17  ;;  %390 = vmatpush.bf16.msra.mxu2 %v3932_v21  ;;  %v3916_v34 = vor.u32 %v5070_v30, %v3915_v28  ;;  %v3891_v35 = vld [vmem:[%s8449_s1 + $0x80] sm:$0xf]  ;;  %v5065_v36 = vld [vmem:[%s8449_s1 + $0x8c] sm:$0xf0]  ;;  %v5063_v37 = vld [vmem:[%s8449_s1 + $0x84] sm:$0xf]  ;;  %v3920_v38 = vor.u32 %v5068_v31, %v3917_v32 }
   0xa   :  { %439 = vmatpush.bf16.msra.mxu3 %v3936_v25  ;;  %v3893_v39 = vld [vmem:[%s8449_s1 + $0x90] sm:$0xf0]  ;;  %v3899_v40 = vld [vmem:[%s8449_s1 + $0x88] sm:$0xf]  ;;  %v5066_v41 = vld [vmem:[%s8449_s1 + $0x94] sm:$0xf0]  ;;  %v3892_v44 = vor.u32 %v5065_v36, %v3891_v35 }
   0xb   :  { %v5064_v42 = vld [vmem:[%s8449_s1 + $0x8c] sm:$0xf]  ;;  %v3901_v43 = vld [vmem:[%s8449_s1 + $0x98] sm:$0xf0]  ;;  %v3896_v45 = vor.u32 %v5063_v37, %v3893_v39  ;;  %v3900_v46 = vor.u32 %v5066_v41, %v3899_v40  ;;  %v3875_v47 = vld [vmem:[%s8449_s1 + $0x60] sm:$0xf] }
   0xc   :  { %293 = vmatpush.bf16.msra.mxu0 %v3908_v29  ;;  %v5061_v48 = vld [vmem:[%s8449_s1 + $0x6c] sm:$0xf0]  ;;  %v5059_v49 = vld [vmem:[%s8449_s1 + $0x64] sm:$0xf]  ;;  %v3904_v50 = vor.u32 %v5064_v42, %v3901_v43  ;;  %v3877_v51 = vld [vmem:[%s8449_s1 + $0x70] sm:$0xf0] }
   0xd   :  { %342 = vmatpush.bf16.msra.mxu1 %v3912_v33  ;;  %391 = vmatpush.bf16.msra.mxu2 %v3916_v34  ;;  %v3883_v52 = vld [vmem:[%s8449_s1 + $0x68] sm:$0xf]  ;;  %v5062_v53 = vld [vmem:[%s8449_s1 + $0x74] sm:$0xf0]  ;;  %v5060_v54 = vld [vmem:[%s8449_s1 + $0x6c] sm:$0xf]  ;;  %v3876_v56 = vor.u32 %v5061_v48, %v3875_v47  ;;  %v3880_v57 = vor.u32 %v5059_v49, %v3877_v51 }
   0xe   :  { %440 = vmatpush.bf16.msra.mxu3 %v3920_v38  ;;  %v3885_v55 = vld [vmem:[%s8449_s1 + $0x78] sm:$0xf0]  ;;  %v3884_v58 = vor.u32 %v5062_v53, %v3883_v52  ;;  %v3859_v59 = vld [vmem:[%s8449_s1 + $0x40] sm:$0xf]  ;;  %v5057_v60 = vld [vmem:[%s8449_s1 + $0x4c] sm:$0xf0] }
   0xf   :  { %v5055_v61 = vld [vmem:[%s8449_s1 + $0x44] sm:$0xf]  ;;  %v3888_v62 = vor.u32 %v5060_v54, %v3885_v55  ;;  %v3861_v63 = vld [vmem:[%s8449_s1 + $0x50] sm:$0xf0]  ;;  %v3867_v0 = vld [vmem:[%s8449_s1 + $0x48] sm:$0xf]  ;;  %v3860_v4 = vor.u32 %v5057_v60, %v3859_v59 }
  0x10   :  { %294 = vmatpush.bf16.msra.mxu0 %v3892_v44  ;;  %v5058_v1 = vld [vmem:[%s8449_s1 + $0x54] sm:$0xf0]  ;;  %v5056_v2 = vld [vmem:[%s8449_s1 + $0x4c] sm:$0xf]  ;;  %v3869_v3 = vld [vmem:[%s8449_s1 + $0x58] sm:$0xf0]  ;;  %v3864_v5 = vor.u32 %v5055_v61, %v3861_v63 }
  0x11   :  { %343 = vmatpush.bf16.msra.mxu1 %v3896_v45  ;;  %392 = vmatpush.bf16.msra.mxu2 %v3900_v46  ;;  %v3868_v6 = vor.u32 %v5058_v1, %v3867_v0  ;;  %v3843_v7 = vld [vmem:[%s8449_s1 + $0x20] sm:$0xf]  ;;  %v5053_v8 = vld [vmem:[%s8449_s1 + $0x2c] sm:$0xf0]  ;;  %v5051_v9 = vld [vmem:[%s8449_s1 + $0x24] sm:$0xf]  ;;  %v3872_v10 = vor.u32 %v5056_v2, %v3869_v3 }
  0x12   :  { %441 = vmatpush.bf16.msra.mxu3 %v3904_v50  ;;  %v3845_v11 = vld [vmem:[%s8449_s1 + $0x30] sm:$0xf0]  ;;  %v3851_v12 = vld [vmem:[%s8449_s1 + $0x28] sm:$0xf]  ;;  %v5054_v13 = vld [vmem:[%s8449_s1 + $0x34] sm:$0xf0]  ;;  %v3844_v16 = vor.u32 %v5053_v8, %v3843_v7 }
  0x13   :  { %v5052_v14 = vld [vmem:[%s8449_s1 + $0x2c] sm:$0xf]  ;;  %v3853_v15 = vld [vmem:[%s8449_s1 + $0x38] sm:$0xf0]  ;;  %v3827_v17 = vld [vmem:[%s8449_s1] sm:$0xf]  ;;  %v3848_v18 = vor.u32 %v5051_v9, %v3845_v11  ;;  %v3852_v19 = vor.u32 %v5054_v13, %v3851_v12 }
  0x14   :  { %295 = vmatpush.bf16.msra.mxu0 %v3876_v56  ;;  %v5049_v20 = vld [vmem:[%s8449_s1 + $0xc] sm:$0xf0]  ;;  %v5047_v21 = vld [vmem:[%s8449_s1 + $0x4] sm:$0xf]  ;;  %v3829_v22 = vld [vmem:[%s8449_s1 + $0x10] sm:$0xf0]  ;;  %v3856_v23 = vor.u32 %v5052_v14, %v3853_v15 }
  0x15   :  { %344 = vmatpush.bf16.msra.mxu1 %v3880_v57  ;;  %393 = vmatpush.bf16.msra.mxu2 %v3884_v58  ;;  %v3835_v24 = vld [vmem:[%s8449_s1 + $0x8] sm:$0xf]  ;;  %v5050_v25 = vld [vmem:[%s8449_s1 + $0x14] sm:$0xf0]  ;;  %v5048_v26 = vld [vmem:[%s8449_s1 + $0xc] sm:$0xf]  ;;  %v3828_v30 = vor.u32 %v5049_v20, %v3827_v17  ;;  %v3832_v33 = vor.u32 %v5047_v21, %v3829_v22 }
  0x16   :  { %442 = vmatpush.bf16.msra.mxu3 %v3888_v62  ;;  %v3837_v27 = vld [vmem:[%s8449_s1 + $0x18] sm:$0xf0]  ;;  %v4067_v28 = vld [vmem:[%s8450_s3 + $0xe0] sm:$0xf]  ;;  %v5109_v29 = vld [vmem:[%s8450_s3 + $0xec] sm:$0xf0]  ;;  %v3836_v34 = vor.u32 %v5050_v25, %v3835_v24 }
  0x17   :  { %v5107_v31 = vld [vmem:[%s8450_s3 + $0xe4] sm:$0xf]  ;;  %v4069_v32 = vld [vmem:[%s8450_s3 + $0xf0] sm:$0xf0]  ;;  %v3840_v36 = vor.u32 %v5048_v26, %v3837_v27  ;;  %v4068_v37 = vor.u32 %v5109_v29, %v4067_v28  ;;  %v5108_v38 = vld [vmem:[%s8450_s3 + $0xec] sm:$0xf] }
  0x18   :  { %296 = vmatpush.bf16.msra.mxu0 %v3860_v4  ;;  %v5039_v35 = vld [vmem:[%s8451_s0] sm:$0xff]  ;;  %v4075_v39 = vld [vmem:[%s8450_s3 + $0xe8] sm:$0xf]  ;;  %v5110_v40 = vld [vmem:[%s8450_s3 + $0xf4] sm:$0xf0]  ;;  %v4072_v41 = vor.u32 %v5107_v31, %v4069_v32 }
  0x19   :  { %345 = vmatpush.bf16.msra.mxu1 %v3864_v5  ;;  %394 = vmatpush.bf16.msra.mxu2 %v3868_v6  ;;  %v4077_v42 = vld [vmem:[%s8450_s3 + $0xf8] sm:$0xf0]  ;;  %v4051_v43 = vld [vmem:[%s8450_s3 + $0xc0] sm:$0xf]  ;;  %v5105_v44 = vld [vmem:[%s8450_s3 + $0xcc] sm:$0xf0]  ;;  %v4076_v47 = vor.u32 %v5110_v40, %v4075_v39 }
  0x1a   :  { %443 = vmatpush.bf16.msra.mxu3 %v3872_v10  ;;  %v5103_v45 = vld [vmem:[%s8450_s3 + $0xc4] sm:$0xf]  ;;  %v4053_v46 = vld [vmem:[%s8450_s3 + $0xd0] sm:$0xf0]  ;;  %v4080_v48 = vor.u32 %v5108_v38, %v4077_v42  ;;  %v4052_v49 = vor.u32 %v5105_v44, %v4051_v43  ;;  %v4059_v50 = vld [vmem:[%s8450_s3 + $0xc8] sm:$0xf] }
  0x1b   :  { %v5106_v51 = vld [vmem:[%s8450_s3 + $0xd4] sm:$0xf0]  ;;  %v4056_v52 = vor.u32 %v5103_v45, %v4053_v46  ;;  %v5104_v53 = vld [vmem:[%s8450_s3 + $0xcc] sm:$0xf]  ;;  %v4061_v54 = vld [vmem:[%s8450_s3 + $0xd8] sm:$0xf0] }
  0x1c   :  { %297 = vmatpush.bf16.msra.mxu0 %v3844_v16  ;;  %v4060_v55 = vor.u32 %v5106_v51, %v4059_v50  ;;  %v4035_v56 = vld [vmem:[%s8450_s3 + $0xa0] sm:$0xf]  ;;  %v5101_v57 = vld [vmem:[%s8450_s3 + $0xac] sm:$0xf0]  ;;  %v5099_v58 = vld [vmem:[%s8450_s3 + $0xa4] sm:$0xf]  ;;  %v4064_v59 = vor.u32 %v5104_v53, %v4061_v54 }
  0x1d   :  { %346 = vmatpush.bf16.msra.mxu1 %v3848_v18  ;;  %395 = vmatpush.bf16.msra.mxu2 %v3852_v19  ;;  %v4036_v60 = vor.u32 %v5101_v57, %v4035_v56  ;;  %v4037_v61 = vld [vmem:[%s8450_s3 + $0xb0] sm:$0xf0]  ;;  %v5100_v62 = vld [vmem:[%s8450_s3 + $0xac] sm:$0xf]  ;;  %v4045_v0 = vld [vmem:[%s8450_s3 + $0xb8] sm:$0xf0] }
  0x1e   :  { %444 = vmatpush.bf16.msra.mxu3 %v3856_v23  ;;  %v4040_v63 = vor.u32 %v5099_v58, %v4037_v61  ;;  %v4043_v1 = vld [vmem:[%s8450_s3 + $0xa8] sm:$0xf]  ;;  %v5102_v2 = vld [vmem:[%s8450_s3 + $0xb4] sm:$0xf0]  ;;  %v4048_v4 = vor.u32 %v5100_v62, %v4045_v0  ;;  %v4019_v6 = vld [vmem:[%s8450_s3 + $0x80] sm:$0xf] }
  0x1f   :  { %v4044_v3 = vor.u32 %v5102_v2, %v4043_v1  ;;  %v5040_v5 = vld [vmem:[%s8451_s0 + $0x8] sm:$0xff]  ;;  %v5097_v7 = vld [vmem:[%s8450_s3 + $0x8c] sm:$0xf0]  ;;  %v5095_v8 = vld [vmem:[%s8450_s3 + $0x84] sm:$0xf] }
  0x20   :  { %298 = vmatpush.bf16.msra.mxu0 %v3828_v30  ;;  %v4020_v9 = vor.u32 %v5097_v7, %v4019_v6  ;;  %v4021_v10 = vld [vmem:[%s8450_s3 + $0x90] sm:$0xf0]  ;;  %v5096_v11 = vld [vmem:[%s8450_s3 + $0x8c] sm:$0xf]  ;;  %v4029_v12 = vld [vmem:[%s8450_s3 + $0x98] sm:$0xf0] }
  0x21   :  { %347 = vmatpush.bf16.msra.mxu1 %v3832_v33  ;;  %396 = vmatpush.bf16.msra.mxu2 %v3836_v34  ;;  %v4024_v13 = vor.u32 %v5095_v8, %v4021_v10  ;;  %v4032_v14 = vor.u32 %v5096_v11, %v4029_v12  ;;  %v4027_v15 = vld [vmem:[%s8450_s3 + $0x88] sm:$0xf]  ;;  %v5098_v16 = vld [vmem:[%s8450_s3 + $0x94] sm:$0xf0]  ;;  %v5041_v18 = vld [vmem:[%s8451_s0 + $0x10] sm:$0xff]  ;;  %v5639_v10 = vmov 0.0|0.0  }
  0x22   :  { %445 = vmatpush.bf16.msra.mxu3 %v3840_v36  ;;  %v4028_v17 = vor.u32 %v5098_v16, %v4027_v15  ;;  %v4003_v19 = vld [vmem:[%s8450_s3 + $0x60] sm:$0xf]  ;;  %v5093_v20 = vld [vmem:[%s8450_s3 + $0x6c] sm:$0xf0]  ;;  %v5091_v21 = vld [vmem:[%s8450_s3 + $0x64] sm:$0xf] }
  0x23   :  { %299 = vmatmul.bf16.vlgmr.msra.gmra.mxu0 %v5039_v35  ;;  %v4004_v22 = vor.u32 %v5093_v20, %v4003_v19  ;;  %v4005_v23 = vld [vmem:[%s8450_s3 + $0x70] sm:$0xf0]  ;;  %v5092_v24 = vld [vmem:[%s8450_s3 + $0x6c] sm:$0xf]  ;;  %v4013_v25 = vld [vmem:[%s8450_s3 + $0x78] sm:$0xf0] }
  0x24   :  { %754 = vmatpush.bf16.msrb.mxu0 %v4068_v37  ;;  %348 = vmatmul.bf16.vlgmr.msra.gmra.mxu1 %v5039_v35  ;;  %v4008_v26 = vor.u32 %v5091_v21, %v4005_v23  ;;  %v4016_v27 = vor.u32 %v5092_v24, %v4013_v25  ;;  %v4011_v28 = vld [vmem:[%s8450_s3 + $0x68] sm:$0xf]  ;;  %v5094_v29 = vld [vmem:[%s8450_s3 + $0x74] sm:$0xf0]  ;;  %v3987_v32 = vld [vmem:[%s8450_s3 + $0x40] sm:$0xf] }
  0x25   :  { %768 = vmatpush.bf16.msrb.mxu1 %v4072_v41  ;;  %397 = vmatmul.bf16.vlgmr.msra.gmra.mxu2 %v5039_v35  ;;  %v4012_v30 = vor.u32 %v5094_v29, %v4011_v28  ;;  %v5042_v31 = vld [vmem:[%s8451_s0 + $0x18] sm:$0xff]  ;;  %v5089_v33 = vld [vmem:[%s8450_s3 + $0x4c] sm:$0xf0]  ;;  %v5087_v34 = vld [vmem:[%s8450_s3 + $0x44] sm:$0xf] }
  0x26   :  { %446 = vmatmul.bf16.vlgmr.msra.gmra.mxu3 %v5039_v35  ;;  %782 = vmatpush.bf16.msrb.mxu2 %v4076_v47  ;;  %v3988_v35 = vor.u32 %v5089_v33, %v3987_v32  ;;  %v3989_v36 = vld [vmem:[%s8450_s3 + $0x50] sm:$0xf0]  ;;  %v5088_v37 = vld [vmem:[%s8450_s3 + $0x4c] sm:$0xf]  ;;  %v3997_v38 = vld [vmem:[%s8450_s3 + $0x58] sm:$0xf0] }
  0x27   :  { %796 = vmatpush.bf16.msrb.mxu3 %v4080_v48  ;;  %v3992_v39 = vor.u32 %v5087_v34, %v3989_v36  ;;  %v4000_v40 = vor.u32 %v5088_v37, %v3997_v38  ;;  %v3995_v41 = vld [vmem:[%s8450_s3 + $0x48] sm:$0xf]  ;;  %v5090_v42 = vld [vmem:[%s8450_s3 + $0x54] sm:$0xf0]  ;;  %v5043_v44 = vld [vmem:[%s8451_s0 + $0x20] sm:$0xff] }
  0x28   :  { %755 = vmatpush.bf16.msrb.mxu0 %v4052_v49  ;;  %v3996_v43 = vor.u32 %v5090_v42, %v3995_v41  ;;  %v3971_v45 = vld [vmem:[%s8450_s3 + $0x20] sm:$0xf]  ;;  %v5085_v46 = vld [vmem:[%s8450_s3 + $0x2c] sm:$0xf0]  ;;  %v5083_v47 = vld [vmem:[%s8450_s3 + $0x24] sm:$0xf] }
  0x29   :  { %769 = vmatpush.bf16.msrb.mxu1 %v4056_v52  ;;  %v3972_v48 = vor.u32 %v5085_v46, %v3971_v45  ;;  %v3973_v49 = vld [vmem:[%s8450_s3 + $0x30] sm:$0xf0]  ;;  %v5084_v50 = vld [vmem:[%s8450_s3 + $0x2c] sm:$0xf]  ;;  %v3981_v51 = vld [vmem:[%s8450_s3 + $0x38] sm:$0xf0] }
  0x2a   :  { %783 = vmatpush.bf16.msrb.mxu2 %v4060_v55  ;;  %v3976_v52 = vor.u32 %v5083_v47, %v3973_v49  ;;  %v3984_v53 = vor.u32 %v5084_v50, %v3981_v51  ;;  %v3979_v54 = vld [vmem:[%s8450_s3 + $0x28] sm:$0xf]  ;;  %v5086_v55 = vld [vmem:[%s8450_s3 + $0x34] sm:$0xf0]  ;;  %v3955_v58 = vld [vmem:[%s8450_s3] sm:$0xf] }
  0x2b   :  { %797 = vmatpush.bf16.msrb.mxu3 %v4064_v59  ;;  %v3980_v56 = vor.u32 %v5086_v55, %v3979_v54  ;;  %v5044_v57 = vld [vmem:[%s8451_s0 + $0x28] sm:$0xff]  ;;  %v5081_v59 = vld [vmem:[%s8450_s3 + $0xc] sm:$0xf0]  ;;  %v3957_v62 = vld [vmem:[%s8450_s3 + $0x10] sm:$0xf0] }
  0x2c   :  { %756 = vmatpush.bf16.msrb.mxu0 %v4036_v60  ;;  %v5079_v60 = vld [vmem:[%s8450_s3 + $0x4] sm:$0xf]  ;;  %v3956_v61 = vor.u32 %v5081_v59, %v3955_v58  ;;  %v3965_v0 = vld [vmem:[%s8450_s3 + $0x18] sm:$0xf0] }
  0x2d   :  { %770 = vmatpush.bf16.msrb.mxu1 %v4040_v63  ;;  %v5080_v63 = vld [vmem:[%s8450_s3 + $0xc] sm:$0xf]  ;;  %v3960_v1 = vor.u32 %v5079_v60, %v3957_v62  ;;  %v5046_v7 = vld [vmem:[%s8451_s0 + $0x38] sm:$0xff] }
  0x2e   :  { %784 = vmatpush.bf16.msrb.mxu2 %v4044_v3  ;;  %v3968_v2 = vor.u32 %v5080_v63, %v3965_v0  ;;  %v5045_v3 = vld [vmem:[%s8451_s0 + $0x30] sm:$0xff] }
  0x2f   :  { %798 = vmatpush.bf16.msrb.mxu3 %v4048_v4  ;;  %v3963_v4 = vld [vmem:[%s8450_s3 + $0x8] sm:$0xf] }
  0x30   :  { %757 = vmatpush.bf16.msrb.mxu0 %v4020_v9 }
  0x31   :  { %771 = vmatpush.bf16.msrb.mxu1 %v4024_v13 }
  0x32   :  { %785 = vmatpush.bf16.msrb.mxu2 %v4028_v17 }
  0x33   :  { %304 = vmatmul.bf16.gmra.mxu0 %v5040_v5  ;;  %799 = vmatpush.bf16.msrb.mxu3 %v4032_v14 }
  0x34   :  { %353 = vmatmul.bf16.gmra.mxu1 %v5040_v5  ;;  %758 = vmatpush.bf16.msrb.mxu0 %v4004_v22 }
  0x35   :  { %402 = vmatmul.bf16.gmra.mxu2 %v5040_v5  ;;  %772 = vmatpush.bf16.msrb.mxu1 %v4008_v26 }
  0x36   :  { %451 = vmatmul.bf16.gmra.mxu3 %v5040_v5  ;;  %786 = vmatpush.bf16.msrb.mxu2 %v4012_v30  ;;  %v5082_v5 = vld [vmem:[%s8450_s3 + $0x14] sm:$0xf0] }
  0x37   :  { %800 = vmatpush.bf16.msrb.mxu3 %v4016_v27  ;;  %v3964_v6 = vor.u32 %v5082_v5, %v3963_v4 }
  0x38   :  { %759 = vmatpush.bf16.msrb.mxu0 %v3988_v35 }
  0x39   :  { %773 = vmatpush.bf16.msrb.mxu1 %v3992_v39 }
  0x3a   :  { %787 = vmatpush.bf16.msrb.mxu2 %v3996_v43 }
  0x3b   :  { %801 = vmatpush.bf16.msrb.mxu3 %v4000_v40 }
  0x3c   :  { %760 = vmatpush.bf16.msrb.mxu0 %v3972_v48 }
  0x3d   :  { %774 = vmatpush.bf16.msrb.mxu1 %v3976_v52 }
  0x3e   :  { %788 = vmatpush.bf16.msrb.mxu2 %v3980_v56 }
  0x3f   :  { %802 = vmatpush.bf16.msrb.mxu3 %v3984_v53 }
  0x40   :  { %761 = vmatpush.bf16.msrb.mxu0 %v3956_v61 }
  0x41   :  { %775 = vmatpush.bf16.msrb.mxu1 %v3960_v1 }
  0x42   :  { %789 = vmatpush.bf16.msrb.mxu2 %v3964_v6 }
  0x43   :  { %309 = vmatmul.bf16.gmra.mxu0 %v5041_v18  ;;  %803 = vmatpush.bf16.msrb.mxu3 %v3968_v2 }
  0x44   :  { %358 = vmatmul.bf16.gmra.mxu1 %v5041_v18 }
  0x45   :  { %407 = vmatmul.bf16.gmra.mxu2 %v5041_v18 }
  0x46   :  { %456 = vmatmul.bf16.gmra.mxu3 %v5041_v18 }
  0x53   :  { %314 = vmatmul.bf16.gmra.mxu0 %v5042_v31 }
  0x54   :  { %363 = vmatmul.bf16.gmra.mxu1 %v5042_v31 }
  0x55   :  { %412 = vmatmul.bf16.gmra.mxu2 %v5042_v31 }
  0x56   :  { %461 = vmatmul.bf16.gmra.mxu3 %v5042_v31 }
  0x63   :  { %319 = vmatmul.bf16.gmra.mxu0 %v5043_v44 }
  0x64   :  { %368 = vmatmul.bf16.gmra.mxu1 %v5043_v44 }
  0x65   :  { %417 = vmatmul.bf16.gmra.mxu2 %v5043_v44 }
  0x66   :  { %466 = vmatmul.bf16.gmra.mxu3 %v5043_v44 }
  0x73   :  { %324 = vmatmul.bf16.gmra.mxu0 %v5044_v57 }
  0x74   :  { %373 = vmatmul.bf16.gmra.mxu1 %v5044_v57 }
  0x75   :  { %422 = vmatmul.bf16.gmra.mxu2 %v5044_v57 }
  0x76   :  { %471 = vmatmul.bf16.gmra.mxu3 %v5044_v57 }
  0x83   :  { %329 = vmatmul.bf16.gmra.mxu0 %v5045_v3 }
  0x84   :  { %378 = vmatmul.bf16.gmra.mxu1 %v5045_v3 }
  0x85   :  { %427 = vmatmul.bf16.gmra.mxu2 %v5045_v3 }
  0x86   :  { %476 = vmatmul.bf16.gmra.mxu3 %v5045_v3  ;;  %v6192_v3 = vld [vmem:[%s8452_s2] sm:$0xf] }
  0x87   :  { %v6199_v6 = vperm.slane %v6192_v3, 0 }
  0x93   :  { %334 = vmatmul.bf16.gmra.mxu0 %v5046_v7 }
  0x94   :  { %383 = vmatmul.bf16.gmra.mxu1 %v5046_v7 }
  0x95   :  { %432 = vmatmul.bf16.gmra.mxu2 %v5046_v7 }
  0x96   :  { %481 = vmatmul.bf16.gmra.mxu3 %v5046_v7 }
  0xa0   :  { %v6073_v8 = vpop.f32.mrf.mxu0 }
  0xa1   :  { %v6075_v9 = vpop.f32.mrf.mxu1 }
  0xa3   :  { %762 = vmatmul.bf16.vlgmr.msrb.gmra.mxu0 %v5639_v10 }
  0xa4   :  { %776 = vmatmul.bf16.vlgmr.msrb.gmra.mxu1 %v5639_v10 }
  0xa5   :  { %790 = vmatmul.bf16.vlgmr.msrb.gmra.mxu2 %v5639_v10 }
  0xa6   :  { %804 = vmatmul.bf16.vlgmr.msrb.gmra.mxu3 %v5639_v10  ;;  %v4201_v10 = vld [vmem:[%s8450_s3 + $0xe0] sm:$0xf] }
  0xa8   :  { %v6077_v11 = vpop.f32.mrf.mxu2  ;;  %v6081_v13 = vpop.f32.mrf.mxu0 }
  0xa9   :  { %v6079_v12 = vpop.f32.mrf.mxu3  ;;  %v6083_v14 = vpop.f32.mrf.mxu1 }
  0xb0   :  { %v6085_v15 = vpop.f32.mrf.mxu2  ;;  %v6089_v17 = vpop.f32.mrf.mxu0 }
  0xb1   :  { %v6087_v16 = vpop.f32.mrf.mxu3  ;;  %v6091_v18 = vpop.f32.mrf.mxu1 }
  0xb8   :  { %v6093_v19 = vpop.f32.mrf.mxu2  ;;  %v6097_v21 = vpop.f32.mrf.mxu0 }
  0xb9   :  { %v6095_v20 = vpop.f32.mrf.mxu3  ;;  %v6099_v22 = vpop.f32.mrf.mxu1 }
  0xc0   :  { %v6101_v23 = vpop.f32.mrf.mxu2  ;;  %v6105_v25 = vpop.f32.mrf.mxu0 }
  0xc1   :  { %v6103_v24 = vpop.f32.mrf.mxu3  ;;  %v6107_v26 = vpop.f32.mrf.mxu1 }
  0xc8   :  { %v6109_v27 = vpop.f32.mrf.mxu2  ;;  %v6113_v29 = vpop.f32.mrf.mxu0 }
  0xc9   :  { %v6111_v28 = vpop.f32.mrf.mxu3  ;;  %v6115_v30 = vpop.f32.mrf.mxu1 }
  0xd0   :  { %v6117_v31 = vpop.f32.mrf.mxu2  ;;  %v6121_v33 = vpop.f32.mrf.mxu0 }
  0xd1   :  { %v6119_v32 = vpop.f32.mrf.mxu3  ;;  %v6123_v34 = vpop.f32.mrf.mxu1 }
  0xd8   :  { %v6125_v35 = vpop.f32.mrf.mxu2  ;;  %v6129_v37 = vpop.f32.mrf.mxu0 }
  0xd9   :  { %v6127_v36 = vpop.f32.mrf.mxu3  ;;  %v6131_v38 = vpop.f32.mrf.mxu1 }
  0xe0   :  { %v6133_v39 = vpop.f32.mrf.mxu2  ;;  %v6137_v41 = vpop.f32.mrf.mxu0 }
  0xe1   :  { %v6135_v40 = vpop.f32.mrf.mxu3  ;;  %v6139_v42 = vpop.f32.mrf.mxu1 }
  0xe8   :  { %v6141_v43 = vpop.f32.mrf.mxu2  ;;  %v6145_v45 = vpop.f32.mrf.mxu0 }
  0xe9   :  { %8454 = vst [vmem:[#allocation5_spill] sm:$0xff] %v6141_v43  ;;  %v6143_v44 = vpop.f32.mrf.mxu3  ;;  %v6147_v46 = vpop.f32.mrf.mxu1 }
  0xf0   :  { %v6149_v47 = vpop.f32.mrf.mxu2  ;;  %v6153_v49 = vpop.f32.mrf.mxu0 }
  0xf1   :  { %8455 = vst [vmem:[#allocation6_spill] sm:$0xff] %v6149_v47  ;;  %v6151_v48 = vpop.f32.mrf.mxu3  ;;  %v6155_v50 = vpop.f32.mrf.mxu1 }
  0xf2   :  { %8456 = vst [vmem:[#allocation7_spill] sm:$0xff] %v6151_v48 }
  0xf3   :  { %8457 = vst [vmem:[#allocation8_spill] sm:$0xff] %v6153_v49 }
  0xf4   :  { %8458 = vst [vmem:[#allocation9_spill] sm:$0xff] %v6155_v50 }
  0xf8   :  { %v6157_v51 = vpop.f32.mrf.mxu2  ;;  %v6161_v53 = vpop.f32.mrf.mxu0 }
  0xf9   :  { %8459 = vst [vmem:[#allocation10_spill] sm:$0xff] %v6157_v51  ;;  %v6159_v52 = vpop.f32.mrf.mxu3  ;;  %v6163_v54 = vpop.f32.mrf.mxu1 }
  0xfa   :  { %8460 = vst [vmem:[#allocation11_spill] sm:$0xff] %v6159_v52 }
  0xfb   :  { %8461 = vst [vmem:[#allocation12_spill] sm:$0xff] %v6161_v53 }
  0xfc   :  { %8462 = vst [vmem:[#allocation13_spill] sm:$0xff] %v6163_v54 }
 0x100   :  { %v6165_v55 = vpop.f32.mrf.mxu2  ;;  %v6169_v57 = vpop.f32.mrf.mxu0 }
 0x101   :  { %8463 = vst [vmem:[#allocation14_spill] sm:$0xff] %v6165_v55  ;;  %v6167_v56 = vpop.f32.mrf.mxu3  ;;  %v6171_v58 = vpop.f32.mrf.mxu1 }
 0x102   :  { %8464 = vst [vmem:[#allocation15_spill] sm:$0xff] %v6167_v56 }
 0x103   :  { %8465 = vst [vmem:[#allocation16_spill] sm:$0xff] %v6169_v57  ;;  %v6263_v57 = vperm.slane %v6192_v3, 3 }
 0x104   :  { %8466 = vst [vmem:[#allocation17_spill] sm:$0xff] %v6171_v58  ;;  %v4195_v58 = vld [vmem:[%s8450_s3 + $0xd8] sm:$0xf0] }
 0x108   :  { %v6173_v59 = vpop.f32.mrf.mxu2  ;;  %v6177_v61 = vpop.f32.mrf.mxu0 }
 0x109   :  { %8467 = vst [vmem:[#allocation18_spill] sm:$0xff] %v6173_v59  ;;  %v6175_v60 = vpop.f32.mrf.mxu3  ;;  %v6179_v62 = vpop.f32.mrf.mxu1  ;;  %v6224_v59 = vperm.slane %v6192_v3, 1 }
 0x10a   :  { %8468 = vst [vmem:[#allocation19_spill] sm:$0xff] %v6175_v60  ;;  %v4185_v60 = vld [vmem:[%s8450_s3 + $0xc0] sm:$0xf] }
 0x10b   :  { %8469 = vst [vmem:[#allocation20_spill] sm:$0xff] %v6177_v61 }
 0x10c   :  { %8470 = vst [vmem:[#allocation21_spill] sm:$0xff] %v6179_v62 }
 0x110   :  { %v6183_v0 = vpop.f32.mrf.mxu0  ;;  %v6185_v1 = vpop.f32.mrf.mxu2 }
 0x111   :  { %v6181_v63 = vpop.f32.mrf.mxu3  ;;  %8472 = vst [vmem:[#allocation23_spill] sm:$0xff] %v6183_v0  ;;  %v6187_v2 = vpop.f32.mrf.mxu1  ;;  %v5139_v0 = vld [vmem:[%s8450_s3 + $0xe4] sm:$0xf] }
 0x112   :  { %8471 = vst [vmem:[#allocation22_spill] sm:$0xff] %v6181_v63  ;;  %v5142_v63 = vld [vmem:[%s8450_s3 + $0xf4] sm:$0xf0] }
 0x113   :  { %8473 = vst [vmem:[#allocation24_spill] sm:$0xff] %v6185_v1  ;;  %v4203_v1 = vld [vmem:[%s8450_s3 + $0xf0] sm:$0xf0] }
 0x114   :  { %8474 = vst [vmem:[#allocation25_spill] sm:$0xff] %v6187_v2  ;;  %v5141_v2 = vld [vmem:[%s8450_s3 + $0xec] sm:$0xf0]  ;;  %v4206_v62 = vor.u32 %v5139_v0, %v4203_v1  ;;  %v5135_v0 = vld [vmem:[%s8450_s3 + $0xc4] sm:$0xf]  ;;  %v301_v1 = vadd.f32 %v6073_v8, %v6199_v6 }
 0x116   :  { %1172 = vmatpush.bf16.msra.mxu1 %v4206_v62  ;;  %v4193_v62 = vld [vmem:[%s8450_s3 + $0xc8] sm:$0xf] }
 0x118   :  { %v6196_v5 = vpop.f32.mrf.mxu0 }
 0x119   :  { %v6194_v4 = vpop.f32.mrf.mxu3  ;;  %8476 = vst [vmem:[#allocation27_spill] sm:$0xff] %v6196_v5  ;;  %v6201_v7 = vpop.f32.mrf.mxu1  ;;  %v4202_v5 = vor.u32 %v5141_v2, %v4201_v10  ;;  %v5140_v2 = vld [vmem:[%s8450_s3 + $0xec] sm:$0xf]  ;;  %v4211_v10 = vld [vmem:[%s8450_s3 + $0xf8] sm:$0xf0] }
 0x11a   :  { %8475 = vst [vmem:[#allocation26_spill] sm:$0xff] %v6194_v4  ;;  %v6212_v4 = vpop.f32.mrf.mxu2 }
 0x11b   :  { %8477 = vst [vmem:[#allocation28_spill] sm:$0xff] %v6201_v7  ;;  %v4209_v7 = vld [vmem:[%s8450_s3 + $0xe8] sm:$0xf]  ;;  %1158 = vmatpush.bf16.msra.mxu0 %v4202_v5 }
 0x11c   :  { %8478 = vst [vmem:[#allocation29_spill] sm:$0xff] %v6212_v4  ;;  %v4210_v61 = vor.u32 %v5142_v63, %v4209_v7  ;;  %v4214_v4 = vor.u32 %v5140_v2, %v4211_v10  ;;  %v5137_v63 = vld [vmem:[%s8450_s3 + $0xcc] sm:$0xf0]  ;;  %v5138_v7 = vld [vmem:[%s8450_s3 + $0xd4] sm:$0xf0]  ;;  %v350_v2 = vadd.f32 %v6075_v9, %v6224_v59 }
 0x11d   :  { %v4186_v5 = vor.u32 %v5137_v63, %v4185_v60  ;;  %v4194_v60 = vor.u32 %v5138_v7, %v4193_v62  ;;  %v5136_v63 = vld [vmem:[%s8450_s3 + $0xcc] sm:$0xf]  ;;  %v5131_v62 = vld [vmem:[%s8450_s3 + $0xa4] sm:$0xf] }
 0x11e   :  { %1186 = vmatpush.bf16.msra.mxu2 %v4210_v61  ;;  %1200 = vmatpush.bf16.msra.mxu3 %v4214_v4  ;;  %v4187_v61 = vld [vmem:[%s8450_s3 + $0xd0] sm:$0xf0]  ;;  %v4198_v9 = vor.u32 %v5136_v63, %v4195_v58  ;;  %v4177_v58 = vld [vmem:[%s8450_s3 + $0xa8] sm:$0xf]  ;;  %v4179_v63 = vld [vmem:[%s8450_s3 + $0xb8] sm:$0xf0] }
 0x11f   :  { %v4190_v4 = vor.u32 %v5135_v0, %v4187_v61  ;;  %1159 = vmatpush.bf16.msra.mxu0 %v4186_v5  ;;  %v4169_v0 = vld [vmem:[%s8450_s3 + $0xa0] sm:$0xf]  ;;  %v5133_v61 = vld [vmem:[%s8450_s3 + $0xac] sm:$0xf0] }
 0x120   :  { %v763_v8 = vpop.f32.mrf.mxu0 }
 0x121   :  { %v6254_v10 = vpop.f32.mrf.mxu3  ;;  %v810_v55 = vadd.f32 %v763_v8, %v301_v1  ;;  %v777_v56 = vpop.f32.mrf.mxu1  ;;  %1173 = vmatpush.bf16.msra.mxu1 %v4190_v4  ;;  %v4170_v1 = vor.u32 %v5133_v61, %v4169_v0  ;;  %v5134_v8 = vld [vmem:[%s8450_s3 + $0xb4] sm:$0xf0]  ;;  %v5129_v0 = vld [vmem:[%s8450_s3 + $0x8c] sm:$0xf0]  ;;  %v5127_v61 = vld [vmem:[%s8450_s3 + $0x84] sm:$0xf] }
 0x122   :  { %8479 = vst [vmem:[#allocation30_spill] sm:$0xff] %v6254_v10  ;;  %v811_v51 = vadd.f32 %v777_v56, %v350_v2  ;;  %1187 = vmatpush.bf16.msra.mxu2 %v4194_v60  ;;  %1201 = vmatpush.bf16.msra.mxu3 %v4198_v9  ;;  %v4171_v56 = vld [vmem:[%s8450_s3 + $0xb0] sm:$0xf0]  ;;  %v6286_v4 = vpop.f32.mrf.mxu2  ;;  %v4178_v60 = vor.u32 %v5134_v8, %v4177_v58  ;;  %v4153_v9 = vld [vmem:[%s8450_s3 + $0x80] sm:$0xf] }
 0x123   :  { %v4081_v7 = vmul.f32 -1.442695, %v810_v55  ;;  %v4174_v2 = vor.u32 %v5131_v62, %v4171_v56  ;;  %v5132_v55 = vld [vmem:[%s8450_s3 + $0xac] sm:$0xf]  ;;  %8480 = vst [vmem:[#allocation31_spill] sm:$0xff] %v6286_v4  ;;  %1160 = vmatpush.bf16.msra.mxu0 %v4170_v1  ;;  %v448_v62 = vadd.f32 %v6079_v12, %v6263_v57  ;;  %v4154_v1 = vor.u32 %v5129_v0, %v4153_v9 }
 0x124   :  { %v4083_v5 = vmul.f32 -1.442695, %v811_v51  ;;  %v4182_v51 = vor.u32 %v5132_v55, %v4179_v63  ;;  %v4155_v56 = vld [vmem:[%s8450_s3 + $0x90] sm:$0xf0]  ;;  %v4161_v58 = vld [vmem:[%s8450_s3 + $0x88] sm:$0xf]  ;;  %v352_v12 = vadd.f32 %v6083_v14, %v6224_v59 }
 0x125   :  { %5383 = vpow2.f32 %v4081_v7  ;;  %1174 = vmatpush.bf16.msra.mxu1 %v4174_v2  ;;  %v303_v7 = vadd.f32 %v6081_v13, %v6199_v6  ;;  %v4158_v13 = vor.u32 %v5127_v61, %v4155_v56  ;;  %v4163_v63 = vld [vmem:[%s8450_s3 + $0x98] sm:$0xf0]  ;;  %v4137_v14 = vld [vmem:[%s8450_s3 + $0x60] sm:$0xf]  ;;  %v5123_v61 = vld [vmem:[%s8450_s3 + $0x64] sm:$0xf] }
 0x126   :  { %5385 = vpow2.f32 %v4083_v5  ;;  %1188 = vmatpush.bf16.msra.mxu2 %v4178_v60  ;;  %v5130_v5 = vld [vmem:[%s8450_s3 + $0x94] sm:$0xf0]  ;;  %1202 = vmatpush.bf16.msra.mxu3 %v4182_v51  ;;  %v5128_v60 = vld [vmem:[%s8450_s3 + $0x8c] sm:$0xf]  ;;  %v5125_v51 = vld [vmem:[%s8450_s3 + $0x6c] sm:$0xf0] }
 0x127   :  { %v4162_v55 = vor.u32 %v5130_v5, %v4161_v58  ;;  %1161 = vmatpush.bf16.msra.mxu0 %v4154_v1  ;;  %v4166_v10 = vor.u32 %v5128_v60, %v4163_v63  ;;  %v6334_v58 = vperm.slane %v6192_v3, 2  ;;  %v5126_v3 = vld [vmem:[%s8450_s3 + $0x74] sm:$0xf0]  ;;  %v4147_v63 = vld [vmem:[%s8450_s3 + $0x78] sm:$0xf0] }
 0x128   :  { %v765_v8 = vpop.f32.mrf.mxu0 }
 0x129   :  { %v805_v2 = vpop.f32.mrf.mxu3  ;;  %v814_v0 = vadd.f32 %v765_v8, %v303_v7  ;;  %v779_v4 = vpop.f32.mrf.mxu1  ;;  %1175 = vmatpush.bf16.msra.mxu1 %v4158_v13  ;;  %v4138_v7 = vor.u32 %v5125_v51, %v4137_v14  ;;  %v5121_v14 = vld [vmem:[%s8450_s3 + $0x4c] sm:$0xf0]  ;;  %v5119_v51 = vld [vmem:[%s8450_s3 + $0x44] sm:$0xf] }
 0x12a   :  { %v813_v9 = vadd.f32 %v805_v2, %v448_v62  ;;  %v815_v54 = vadd.f32 %v779_v4, %v352_v12  ;;  %1189 = vmatpush.bf16.msra.mxu2 %v4162_v55  ;;  %v4139_v4 = vld [vmem:[%s8450_s3 + $0x70] sm:$0xf0]  ;;  %1203 = vmatpush.bf16.msra.mxu3 %v4166_v10  ;;  %v4145_v55 = vld [vmem:[%s8450_s3 + $0x68] sm:$0xf]  ;;  %v450_v10 = vadd.f32 %v6087_v16, %v6263_v57  ;;  %v791_v60 = vpop.f32.mrf.mxu2 }
 0x12b   :  { %v5384_v56 = vpop.eup %5383  ;;  %v4082_v12 = vmul.f32 -1.442695, %v814_v0  ;;  %v4142_v2 = vor.u32 %v5123_v61, %v4139_v4  ;;  %1162 = vmatpush.bf16.msra.mxu0 %v4138_v7  ;;  %v399_v0 = vadd.f32 %v6077_v11, %v6334_v58  ;;  %v4129_v11 = vld [vmem:[%s8450_s3 + $0x48] sm:$0xf]  ;;  %v4146_v7 = vor.u32 %v5126_v3, %v4145_v55  ;;  %v4105_v55 = vld [vmem:[%s8450_s3 + $0x20] sm:$0xf] }
 0x12c   :  { %v4085_v62 = vmul.f32 -1.442695, %v813_v9  ;;  %v5386_v1 = vpop.eup %5385  ;;  %v6336_v5 = vadd.f32 1.0, %v5384_v56  ;;  %v4084_v13 = vmul.f32 -1.442695, %v815_v54 }
 0x12d   :  { %v6338_v8 = vadd.f32 1.0, %v5386_v1  ;;  %1176 = vmatpush.bf16.msra.mxu1 %v4142_v2  ;;  %v5124_v54 = vld [vmem:[%s8450_s3 + $0x6c] sm:$0xf]  ;;  %v4121_v9 = vld [vmem:[%s8450_s3 + $0x40] sm:$0xf] }
 0x12e   :  { %5387 = vpow2.f32 %v4085_v62  ;;  %v4123_v56 = vld [vmem:[%s8450_s3 + $0x50] sm:$0xf0]  ;;  %v812_v62 = vadd.f32 %v791_v60, %v399_v0  ;;  %v4150_v4 = vor.u32 %v5124_v54, %v4147_v63  ;;  %v4122_v1 = vor.u32 %v5121_v14, %v4121_v9  ;;  %v5120_v2 = vld [vmem:[%s8450_s3 + $0x4c] sm:$0xf]  ;;  %v5117_v3 = vld [vmem:[%s8450_s3 + $0x2c] sm:$0xf0]  ;;  %1190 = vmatpush.bf16.msra.mxu2 %v4146_v7 }
 0x12f   :  { %5389 = vrcp.f32 %v6336_v5  ;;  %v4126_v53 = vor.u32 %v5119_v51, %v4123_v56  ;;  %v5115_v0 = vld [vmem:[%s8450_s3 + $0x24] sm:$0xf]  ;;  %v4107_v14 = vld [vmem:[%s8450_s3 + $0x30] sm:$0xf0]  ;;  %v4106_v56 = vor.u32 %v5117_v3, %v4105_v55  ;;  %v837_v55 = vand.u32 2147483648, %v6336_v5 }
 0x130   :  { %5391 = vrcp.f32 %v6338_v8  ;;  %1204 = vmatpush.bf16.msra.mxu3 %v4150_v4  ;;  %1163 = vmatpush.bf16.msra.mxu0 %v4122_v1  ;;  %v4110_v7 = vor.u32 %v5115_v0, %v4107_v14  ;;  %v5118_v4 = vld [vmem:[%s8450_s3 + $0x34] sm:$0xf0]  ;;  %v835_v1 = vand.u32 2147483647, %v6336_v5  ;;  %vm831_vm2 = vweird.f32 %v6336_v5 }
 0x131   :  { %5393 = vpow2.f32 %v4082_v12  ;;  %v807_v16 = vpop.f32.mrf.mxu3  ;;  %v5122_v12 = vld [vmem:[%s8450_s3 + $0x54] sm:$0xf0]  ;;  %1177 = vmatpush.bf16.msra.mxu1 %v4126_v53  ;;  %v4115_v53 = vld [vmem:[%s8450_s3 + $0x38] sm:$0xf0]  ;;  %vm869_vm3 = vweird.f32 %v6338_v8 }
 0x132   :  { %5395 = vpow2.f32 %v4084_v13  ;;  %v817_v61 = vadd.f32 %v807_v16, %v450_v10  ;;  %v4131_v13 = vld [vmem:[%s8450_s3 + $0x58] sm:$0xf0]  ;;  %v4130_v63 = vor.u32 %v5122_v12, %v4129_v11  ;;  %v4113_v11 = vld [vmem:[%s8450_s3 + $0x28] sm:$0xf]  ;;  %v5116_v12 = vld [vmem:[%s8450_s3 + $0x2c] sm:$0xf] }
 0x133   :  { %v4134_v9 = vor.u32 %v5120_v2, %v4131_v13  ;;  %v4114_v52 = vor.u32 %v5118_v4, %v4113_v11  ;;  %v4118_v50 = vor.u32 %v5116_v12, %v4115_v53  ;;  %v401_v11 = vadd.f32 %v6085_v15, %v6334_v58 }
 0x134   :  { %v5388_v10 = vpop.eup %5387  ;;  %v4086_v16 = vmul.f32 -1.442695, %v817_v61  ;;  %1191 = vmatpush.bf16.msra.mxu2 %v4130_v63  ;;  %1164 = vmatpush.bf16.msra.mxu0 %v4106_v56  ;;  %v793_v63 = vpop.f32.mrf.mxu2  ;;  %v838_v56 = vor.u32 1.1754944e-38, %v837_v55  ;;  %vm836_vm5 = vcmp.eq.f32.partialorder %v835_v1, 8.507059e+37 }
 0x135   :  { %v6388_v60 = vpop.eup %5389  ;;  %v6390_v54 = vadd.f32 1.0, %v5388_v10  ;;  %1205 = vmatpush.bf16.msra.mxu3 %v4134_v9  ;;  %1178 = vmatpush.bf16.msra.mxu1 %v4110_v7 }
 0x136   :  { %v5392_v51 = vpop.eup %5391  ;;  %v827_v61 = vmul.f32 %v6388_v60, %v6336_v5  ;;  %5397 = vpow2.f32 %v4086_v16  ;;  %vm832_vm0 = vweird.f32 %v6388_v60 }
 0x137   :  { %v5394_v2 = vpop.eup %5393  ;;  %v865_v13 = vmul.f32 %v5392_v51, %v6338_v8  ;;  %5399 = vtanh.f32 %v812_v62  ;;  %v875_v62 = vand.u32 2147483648, %v6338_v8  ;;  %vm870_vm1 = vweird.f32 %v5392_v51  ;;  %vm833_vm4 = vmor %vm831_vm2, %vm832_vm0 }
 0x138   :  { %v5396_v10 = vpop.eup %5395  ;;  %v828_v16 = vsub.f32 1.0, %v827_v61  ;;  %5401 = vrcp.f32 %v6390_v54  ;;  %v6416_v3 = vadd.f32 1.0, %v5394_v2  ;;  %v873_v2 = vand.u32 2147483647, %v6338_v8  ;;  %1192 = vmatpush.bf16.msra.mxu2 %v4114_v52  ;;  %vm871_vm6 = vmor %vm869_vm3, %vm870_vm1  ;;  %v5113_v52 = vld [vmem:[%s8450_s3 + $0xc] sm:$0xf0] }
 0x139   :  { %v866_v0 = vsub.f32 1.0, %v865_v13  ;;  %v6418_v14 = vadd.f32 1.0, %v5396_v10  ;;  %1206 = vmatpush.bf16.msra.mxu3 %v4118_v50  ;;  %v876_v10 = vor.u32 1.1754944e-38, %v875_v62  ;;  %v4089_v50 = vld [vmem:[%s8450_s3] sm:$0xf]  ;;  %vm909_vm2 = vweird.f32 %v6390_v54 }
 0x13a   :  { %v829_v49 = vmul.f32 %v6388_v60, %v828_v16  ;;  %5403 = vrcp.f32 %v6416_v3  ;;  %vm874_vm7 = vcmp.eq.f32.partialorder %v873_v2, 8.507059e+37  ;;  %vm846_vm10 = vweird.f32 %v6416_v3 }
 0x13b   :  { %v867_v61 = vmul.f32 %v5392_v51, %v866_v0  ;;  %5405 = vrcp.f32 %v6418_v14  ;;  %vm884_vm11 = vweird.f32 %v6418_v14 }
 0x13c   :  { %v5398_v9 = vpop.eup %5397  ;;  %v830_v4 = vadd.f32 %v6388_v60, %v829_v49  ;;  %v816_v49 = vadd.f32 %v793_v63, %v401_v11  ;;  %v4097_v63 = vld [vmem:[%s8450_s3 + $0x8] sm:$0xf] }
 0x13d   :  { %v5400_v12 = vpop.eup %5399  ;;  %v868_v7 = vadd.f32 %v5392_v51, %v867_v61  ;;  %v6433_v13 = vadd.f32 1.0, %v5398_v9  ;;  %v4091_v61 = vld [vmem:[%s8450_s3 + $0x10] sm:$0xf0]  ;;  %v5114_v9 = vld [vmem:[%s8450_s3 + $0x14] sm:$0xf0] }
 0x13e   :  { %v6435_v53 = vpop.eup %5401  ;;  %v834_v15 = vsel %vm833_vm4, %v6388_v60, %v830_v4 }
 0x13f   :  { %v839_v5 = vsel %vm836_vm5, %v838_v56, %v834_v15  ;;  %v872_v8 = vsel %vm871_vm6, %v5392_v51, %v868_v7  ;;  %5407 = vrcp.f32 %v6433_v13  ;;  %v5111_v51 = vld [vmem:[%s8450_s3 + $0x4] sm:$0xf]  ;;  %v905_v4 = vmul.f32 %v6435_v53, %v6390_v54  ;;  %v5112_v7 = vld [vmem:[%s8450_s3 + $0xc] sm:$0xf] }
 0x140   :  { %v5404_v16 = vpop.eup %5403  ;;  %v877_v0 = vsel %vm874_vm7, %v876_v10, %v872_v8  ;;  %v938_v55 = vmul.f32 %v5400_v12, %v839_v5  ;;  %5409 = vtanh.f32 %v816_v49  ;;  %v4090_v56 = vor.u32 %v5113_v52, %v4089_v50  ;;  %v4099_v10 = vld [vmem:[%s8450_s3 + $0x18] sm:$0xf0] }
 0x141   :  { %v5406_v60 = vpop.eup %5405  ;;  %v936_v1 = vmul.f32 0.0, %v877_v0  ;;  %v842_v62 = vmul.f32 %v5404_v16, %v6416_v3  ;;  %v890_v49 = vand.u32 2147483648, %v6418_v14  ;;  %v852_v5 = vand.u32 2147483648, %v6416_v3 }
 0x142   :  { %v880_v2 = vmul.f32 %v5406_v60, %v6418_v14  ;;  %v4094_v8 = vor.u32 %v5111_v51, %v4091_v61  ;;  %vm847_vm8 = vweird.f32 %v5404_v16  ;;  %1165 = vmatpush.bf16.msra.mxu0 %v4090_v56  ;;  %v4098_v50 = vor.u32 %v5114_v9, %v4097_v63 }
 0x143   :  { %v6460_v11 = vadd.f32 %v938_v55, %v936_v1  ;;  %v843_v12 = vsub.f32 1.0, %v842_v62  ;;  %v850_v55 = vand.u32 2147483647, %v6416_v3  ;;  %vm885_vm9 = vweird.f32 %v5406_v60  ;;  %vm848_vm12 = vmor %vm846_vm10, %vm847_vm8 }
 0x144   :  { %v881_v15 = vsub.f32 1.0, %v880_v2  ;;  %v888_v62 = vand.u32 2147483647, %v6418_v14  ;;  %1179 = vmatpush.bf16.msra.mxu1 %v4094_v8  ;;  %v4102_v47 = vor.u32 %v5112_v7, %v4099_v10  ;;  %v906_v48 = vsub.f32 1.0, %v905_v4  ;;  %1193 = vmatpush.bf16.msra.mxu2 %v4098_v50  ;;  %vm886_vm14 = vmor %vm884_vm11, %vm885_vm9 }
 0x145   :  { %v844_v0 = vmul.f32 %v5404_v16, %v843_v12  ;;  %v5408_v52 = vpop.eup %5407  ;;  %v853_v61 = vor.u32 1.1754944e-38, %v852_v5  ;;  %v891_v9 = vor.u32 1.1754944e-38, %v890_v49  ;;  %vm851_vm13 = vcmp.eq.f32.partialorder %v850_v55, 8.507059e+37 }
 0x146   :  { %v882_v1 = vmul.f32 %v5406_v60, %v881_v15  ;;  %v920_v43 = vmul.f32 %v5408_v52, %v6433_v13  ;;  %v5410_v51 = vpop.eup %5409  ;;  %1207 = vmatpush.bf16.msra.mxu3 %v4102_v47  ;;  %vm889_vm15 = vcmp.eq.f32.partialorder %v888_v62, 8.507059e+37  ;;  %v907_v3 = vmul.f32 %v6435_v53, %v906_v48 }
 0x147   :  { %v845_v2 = vadd.f32 %v5404_v16, %v844_v0  ;;  %5411 = vtanh.f32 %v6460_v11  ;;  %vm910_vm0 = vweird.f32 %v6435_v53  ;;  %vm925_vm1 = vweird.f32 %v5408_v52 }
 0x148   :  { %v883_v63 = vadd.f32 %v5406_v60, %v882_v1  ;;  %v921_v4 = vsub.f32 1.0, %v920_v43  ;;  %v915_v43 = vand.u32 2147483648, %v6390_v54  ;;  %v930_v48 = vand.u32 2147483648, %v6433_v13  ;;  %vm911_vm3 = vmor %vm909_vm2, %vm910_vm0 }
 0x149   :  { %v849_v12 = vsel %vm848_vm12, %v5404_v16, %v845_v2  ;;  %v908_v16 = vadd.f32 %v6435_v53, %v907_v3  ;;  %vm924_vm4 = vweird.f32 %v6433_v13  ;;  %v928_v5 = vand.u32 2147483647, %v6433_v13  ;;  %v5173_v13 = vld [vmem:[%s8450_s3 + $0xec] sm:$0xf0] }
 0x14a   :  { %v854_v56 = vsel %vm851_vm13, %v853_v61, %v849_v12  ;;  %v887_v7 = vsel %vm886_vm14, %v5406_v60, %v883_v63  ;;  %v922_v8 = vmul.f32 %v5408_v52, %v921_v4  ;;  %v913_v60 = vand.u32 2147483647, %v6390_v54  ;;  %vm926_vm5 = vmor %vm924_vm4, %vm925_vm1  ;;  %v4337_v54 = vld [vmem:[%s8450_s3 + $0xe0] sm:$0xf]  ;;  %v4339_v4 = vld [vmem:[%s8450_s3 + $0xf0] sm:$0xf0] }
 0x14b   :  { %v892_v10 = vsel %vm889_vm15, %v891_v9, %v887_v7  ;;  %v939_v15 = vmul.f32 %v5410_v51, %v854_v56  ;;  %v912_v0 = vsel %vm911_vm3, %v6435_v53, %v908_v16  ;;  %v916_v1 = vor.u32 1.1754944e-38, %v915_v43  ;;  %v5171_v53 = vld [vmem:[%s8450_s3 + $0xe4] sm:$0xf]  ;;  %v4345_v56 = vld [vmem:[%s8450_s3 + $0xe8] sm:$0xf] }
 0x14c   :  { %v937_v14 = vmul.f32 0.0, %v892_v10  ;;  %v923_v49 = vadd.f32 %v5408_v52, %v922_v8  ;;  %v931_v62 = vor.u32 1.1754944e-38, %v930_v48  ;;  %vm914_vm6 = vcmp.eq.f32.partialorder %v913_v60, 8.507059e+37  ;;  %v5174_v7 = vld [vmem:[%s8450_s3 + $0xf4] sm:$0xf0] }
 0x14d   :  { %v5412_v50 = vpop.eup %5411  ;;  %vm929_vm7 = vcmp.eq.f32.partialorder %v928_v5, 8.507059e+37  ;;  %v917_v51 = vsel %vm914_vm6, %v916_v1, %v912_v0  ;;  %v306_v3 = vadd.f32 %v6089_v17, %v6199_v6  ;;  %v355_v10 = vadd.f32 %v6091_v18, %v6224_v59  ;;  %v4347_v16 = vld [vmem:[%s8450_s3 + $0xf8] sm:$0xf0]  ;;  %v4321_v17 = vld [vmem:[%s8450_s3 + $0xc0] sm:$0xf] }
 0x14e   :  { %v6482_v47 = vadd.f32 %v939_v15, %v937_v14  ;;  %v927_v55 = vsel %vm926_vm5, %v5408_v52, %v923_v49  ;;  %v944_v63 = vmul.f32 %v5412_v50, %v917_v51  ;;  %v4338_v52 = vor.u32 %v5173_v13, %v4337_v54  ;;  %v5172_v14 = vld [vmem:[%s8450_s3 + $0xec] sm:$0xf]  ;;  %v5169_v18 = vld [vmem:[%s8450_s3 + $0xcc] sm:$0xf0]  ;;  %v5167_v0 = vld [vmem:[%s8450_s3 + $0xc4] sm:$0xf] }
 0x14f   :  { %v932_v61 = vsel %vm929_vm7, %v931_v62, %v927_v55  ;;  %v4342_v15 = vor.u32 %v5171_v53, %v4339_v4  ;;  %v4346_v8 = vor.u32 %v5174_v7, %v4345_v56  ;;  %v4350_v48 = vor.u32 %v5172_v14, %v4347_v16  ;;  %v4323_v50 = vld [vmem:[%s8450_s3 + $0xd0] sm:$0xf0]  ;;  %v4329_v1 = vld [vmem:[%s8450_s3 + $0xc8] sm:$0xf]  ;;  %v5170_v62 = vld [vmem:[%s8450_s3 + $0xd4] sm:$0xf0] }
 0x150   :  { %5413 = vtanh.f32 %v6482_v47  ;;  %1563 = vmatpush.bf16.msrb.mxu0 %v4338_v52  ;;  %v4322_v55 = vor.u32 %v5169_v18, %v4321_v17  ;;  %v4305_v13 = vld [vmem:[%s8450_s3 + $0xa0] sm:$0xf]  ;;  %v5165_v53 = vld [vmem:[%s8450_s3 + $0xac] sm:$0xf0]  ;;  %v5163_v52 = vld [vmem:[%s8450_s3 + $0xa4] sm:$0xf]  ;;  %v453_v4 = vadd.f32 %v6095_v20, %v6263_v57  ;;  %v357_v20 = vadd.f32 %v6099_v22, %v6224_v59 }
 0x151   :  { %1577 = vmatpush.bf16.msrb.mxu1 %v4342_v15  ;;  %1591 = vmatpush.bf16.msrb.mxu2 %v4346_v8  ;;  %v4306_v56 = vor.u32 %v5165_v53, %v4305_v13  ;;  %v4307_v7 = vld [vmem:[%s8450_s3 + $0xb0] sm:$0xf0]  ;;  %v308_v15 = vadd.f32 %v6097_v21, %v6199_v6  ;;  %v4289_v22 = vld [vmem:[%s8450_s3 + $0x80] sm:$0xf] }
 0x152   :  { %1605 = vmatpush.bf16.msrb.mxu3 %v4350_v48  ;;  %v4310_v14 = vor.u32 %v5163_v52, %v4307_v7  ;;  %v5160_v52 = vld [vmem:[%s8450_s3 + $0x8c] sm:$0xf] }
 0x154   :  { %1564 = vmatpush.bf16.msrb.mxu0 %v4322_v55  ;;  %v5159_v55 = vld [vmem:[%s8450_s3 + $0x84] sm:$0xf] }
 0x156   :  { %v5414_v2 = vpop.eup %5413 }
 0x157   :  { %v945_v9 = vmul.f32 %v5414_v2, %v932_v61  ;;  %v4326_v61 = vor.u32 %v5167_v0, %v4323_v50  ;;  %v5161_v0 = vld [vmem:[%s8450_s3 + $0x8c] sm:$0xf0] }
 0x158   :  { %1565 = vmatpush.bf16.msrb.mxu0 %v4306_v56 }
 0x159   :  { %v5338_v12 = vpack.c.bf16 %v945_v9, %v944_v63  ;;  %v4330_v63 = vor.u32 %v5170_v62, %v4329_v1  ;;  %v5168_v9 = vld [vmem:[%s8450_s3 + $0xcc] sm:$0xf]  ;;  %1578 = vmatpush.bf16.msrb.mxu1 %v4326_v61  ;;  %v4290_v1 = vor.u32 %v5161_v0, %v4289_v22  ;;  %v4291_v62 = vld [vmem:[%s8450_s3 + $0x90] sm:$0xf0] }
 0x15b   :  { %5339 = vst [vmem:[%s8453_s4] sm:$0xff] %v5338_v12   ;;  %1166 = vmatmul.bf16.vlgmr.msra.gmra.mxu0 %v5338_v12  ;;  %1180 = vmatmul.bf16.vlgmr.msra.gmra.mxu1 %v5338_v12 }
 0x15c   :  { %1194 = vmatmul.bf16.vlgmr.msra.gmra.mxu2 %v5338_v12  ;;  %1208 = vmatmul.bf16.vlgmr.msra.gmra.mxu3 %v5338_v12  ;;  %v4331_v12 = vld [vmem:[%s8450_s3 + $0xd8] sm:$0xf0] }
 0x15d   :  { %1592 = vmatpush.bf16.msrb.mxu2 %v4330_v63  ;;  %v4334_v54 = vor.u32 %v5168_v9, %v4331_v12  ;;  %1579 = vmatpush.bf16.msrb.mxu1 %v4310_v14  ;;  %v4294_v9 = vor.u32 %v5159_v55, %v4291_v62  ;;  %v5162_v12 = vld [vmem:[%s8450_s3 + $0x94] sm:$0xf0]  ;;  %v404_v14 = vadd.f32 %v6093_v19, %v6334_v58  ;;  %v4283_v19 = vld [vmem:[%s8450_s3 + $0x78] sm:$0xf0]  ;;  %v4257_v55 = vld [vmem:[%s8450_s3 + $0x40] sm:$0xf] }
 0x15e   :  { %1566 = vmatpush.bf16.msrb.mxu0 %v4290_v1 }
 0x15f   :  { %1606 = vmatpush.bf16.msrb.mxu3 %v4334_v54 }
 0x161   :  { %1580 = vmatpush.bf16.msrb.mxu1 %v4294_v9 }
 0x1d8   :  { %v1167_v49 = vpop.f32.mrf.mxu0  ;;  %v1181_v43 = vpop.f32.mrf.mxu1 }
 0x1d9   :  { %v1214_v60 = vadd.f32 %v1167_v49, %v306_v3  ;;  %v1215_v5 = vadd.f32 %v1181_v43, %v355_v10  ;;  %v4313_v3 = vld [vmem:[%s8450_s3 + $0xa8] sm:$0xf]  ;;  %v5166_v10 = vld [vmem:[%s8450_s3 + $0xb4] sm:$0xf0]  ;;  %v5164_v49 = vld [vmem:[%s8450_s3 + $0xac] sm:$0xf] }
 0x1da   :  { %v4314_v16 = vor.u32 %v5166_v10, %v4313_v3  ;;  %v4315_v43 = vld [vmem:[%s8450_s3 + $0xb8] sm:$0xf0]  ;;  %v4273_v10 = vld [vmem:[%s8450_s3 + $0x60] sm:$0xf] }
 0x1db   :  { %v4215_v2 = vmul.f32 -1.442695, %v1214_v60  ;;  %v4217_v51 = vmul.f32 -1.442695, %v1215_v5  ;;  %v4318_v21 = vor.u32 %v5164_v49, %v4315_v43  ;;  %v4281_v49 = vld [vmem:[%s8450_s3 + $0x68] sm:$0xf] }
 0x1dc   :  { %1593 = vmatpush.bf16.msrb.mxu2 %v4314_v16  ;;  %v5158_v43 = vld [vmem:[%s8450_s3 + $0x74] sm:$0xf0] }
 0x1dd   :  { %5415 = vpow2.f32 %v4215_v2  ;;  %v4297_v2 = vld [vmem:[%s8450_s3 + $0x88] sm:$0xf]  ;;  %1607 = vmatpush.bf16.msrb.mxu3 %v4318_v21  ;;  %v4282_v22 = vor.u32 %v5158_v43, %v4281_v49  ;;  %v5143_v43 = vld [vmem:[%s8450_s3 + $0x4] sm:$0xf] }
 0x1de   :  { %5417 = vpow2.f32 %v4217_v51  ;;  %v4298_v53 = vor.u32 %v5162_v12, %v4297_v2 }
 0x1df   :  { %v1209_v8 = vpop.f32.mrf.mxu3  ;;  %v1195_v7 = vpop.f32.mrf.mxu2 }
 0x1e0   :  { %v1217_v48 = vadd.f32 %v1209_v8, %v453_v4  ;;  %v1169_v60 = vpop.f32.mrf.mxu0  ;;  %v1183_v5 = vpop.f32.mrf.mxu1  ;;  %v4299_v4 = vld [vmem:[%s8450_s3 + $0x98] sm:$0xf0]  ;;  %1594 = vmatpush.bf16.msrb.mxu2 %v4298_v53  ;;  %v4275_v8 = vld [vmem:[%s8450_s3 + $0x70] sm:$0xf0] }
 0x1e1   :  { %v1218_v17 = vadd.f32 %v1169_v60, %v308_v15  ;;  %v1219_v18 = vadd.f32 %v1183_v5, %v357_v20  ;;  %v4302_v3 = vor.u32 %v5160_v52, %v4299_v4  ;;  %v5157_v15 = vld [vmem:[%s8450_s3 + $0x6c] sm:$0xf0]  ;;  %v5155_v20 = vld [vmem:[%s8450_s3 + $0x64] sm:$0xf]  ;;  %v5156_v5 = vld [vmem:[%s8450_s3 + $0x6c] sm:$0xf]  ;;  %v406_v52 = vadd.f32 %v6101_v23, %v6334_v58 }
 0x1e2   :  { %v4219_v50 = vmul.f32 -1.442695, %v1217_v48  ;;  %v455_v48 = vadd.f32 %v6103_v24, %v6263_v57  ;;  %v4274_v60 = vor.u32 %v5157_v15, %v4273_v10  ;;  %v4286_v0 = vor.u32 %v5156_v5, %v4283_v19  ;;  %v5153_v24 = vld [vmem:[%s8450_s3 + $0x4c] sm:$0xf0] }
 0x1e3   :  { %v5416_v51 = vpop.eup %5415  ;;  %v4216_v61 = vmul.f32 -1.442695, %v1218_v17  ;;  %v4218_v63 = vmul.f32 -1.442695, %v1219_v18  ;;  %1608 = vmatpush.bf16.msrb.mxu3 %v4302_v3  ;;  %v1216_v17 = vadd.f32 %v1195_v7, %v404_v14  ;;  %v4278_v18 = vor.u32 %v5155_v20, %v4275_v8 }
 0x1e4   :  { %v5418_v54 = vpop.eup %5417  ;;  %v6596_v13 = vadd.f32 1.0, %v5416_v51  ;;  %5419 = vpow2.f32 %v4219_v50  ;;  %v5151_v50 = vld [vmem:[%s8450_s3 + $0x44] sm:$0xf]  ;;  %1567 = vmatpush.bf16.msrb.mxu0 %v4274_v60  ;;  %v4258_v2 = vor.u32 %v5153_v24, %v4257_v55  ;;  %v4259_v51 = vld [vmem:[%s8450_s3 + $0x50] sm:$0xf0]  ;;  %1595 = vmatpush.bf16.msrb.mxu2 %v4282_v22 }
 0x1e5   :  { %v6604_v56 = vadd.f32 1.0, %v5418_v54  ;;  %5421 = vpow2.f32 %v4216_v61  ;;  %1581 = vmatpush.bf16.msrb.mxu1 %v4278_v18  ;;  %v4262_v54 = vor.u32 %v5151_v50, %v4259_v51  ;;  %v5154_v60 = vld [vmem:[%s8450_s3 + $0x54] sm:$0xf0]  ;;  %v4267_v22 = vld [vmem:[%s8450_s3 + $0x58] sm:$0xf0] }
 0x1e6   :  { %5423 = vrcp.f32 %v6596_v13  ;;  %v1241_v7 = vand.u32 2147483648, %v6596_v13  ;;  %vm1235_vm12 = vweird.f32 %v6596_v13  ;;  %v5149_v55 = vld [vmem:[%s8450_s3 + $0x2c] sm:$0xf0] }
 0x1e7   :  { %5425 = vrcp.f32 %v6604_v56  ;;  %v1211_v16 = vpop.f32.mrf.mxu3  ;;  %1609 = vmatpush.bf16.msrb.mxu3 %v4286_v0  ;;  %v1279_v15 = vand.u32 2147483648, %v6604_v56  ;;  %v1277_v20 = vand.u32 2147483647, %v6604_v56  ;;  %v1197_v23 = vpop.f32.mrf.mxu2  ;;  %vm1273_vm11 = vweird.f32 %v6604_v56  ;;  %v4241_v0 = vld [vmem:[%s8450_s3 + $0x20] sm:$0xf] }
 0x1e8   :  { %5427 = vpow2.f32 %v4218_v63  ;;  %v1221_v62 = vadd.f32 %v1211_v16, %v455_v48  ;;  %v1239_v63 = vand.u32 2147483647, %v6596_v13  ;;  %1568 = vmatpush.bf16.msrb.mxu0 %v4258_v2  ;;  %v4265_v48 = vld [vmem:[%s8450_s3 + $0x48] sm:$0xf]  ;;  %v1242_v19 = vor.u32 1.1754944e-38, %v1241_v7 }
 0x1e9   :  { %5429 = vtanh.f32 %v1216_v17  ;;  %1582 = vmatpush.bf16.msrb.mxu1 %v4262_v54  ;;  %v1220_v18 = vadd.f32 %v1197_v23, %v406_v52  ;;  %v1280_v24 = vor.u32 1.1754944e-38, %v1279_v15  ;;  %vm6719_vm15 = vcmp.eq.f32.partialorder %v1277_v20, 8.507059e+37  ;;  %v4249_v7 = vld [vmem:[%s8450_s3 + $0x28] sm:$0xf]  ;;  %v5148_v23 = vld [vmem:[%s8450_s3 + $0x2c] sm:$0xf] }
 0x1ea   :  { %v5420_v21 = vpop.eup %5419  ;;  %v4220_v16 = vmul.f32 -1.442695, %v1221_v62  ;;  %vm6670_vm9 = vcmp.eq.f32.partialorder %v1239_v63, 8.507059e+37  ;;  %v4243_v62 = vld [vmem:[%s8450_s3 + $0x30] sm:$0xf0]  ;;  %v4242_v20 = vor.u32 %v5149_v55, %v4241_v0 }
 0x1eb   :  { %v5422_v1 = vpop.eup %5421  ;;  %v6651_v9 = vadd.f32 1.0, %v5420_v21  ;;  %v5152_v21 = vld [vmem:[%s8450_s3 + $0x4c] sm:$0xf]  ;;  %v4233_v0 = vld [vmem:[%s8450_s3 + $0x8] sm:$0xf] }
 0x1ec   :  { %v6648_v61 = vpop.eup %5423  ;;  %v6653_v12 = vadd.f32 1.0, %v5422_v1  ;;  %v5147_v1 = vld [vmem:[%s8450_s3 + $0x24] sm:$0xf]  ;;  %v4270_v15 = vor.u32 %v5152_v21, %v4267_v22  ;;  %v5145_v21 = vld [vmem:[%s8450_s3 + $0xc] sm:$0xf0]  ;;  %1569 = vmatpush.bf16.msrb.mxu0 %v4242_v20 }
 0x1ed   :  { %v6655_v53 = vpop.eup %5425  ;;  %v1231_v4 = vmul.f32 %v6648_v61, %v6596_v13  ;;  %vm1236_vm8 = vweird.f32 %v6648_v61  ;;  %v4227_v22 = vld [vmem:[%s8450_s3 + $0x10] sm:$0xf0]  ;;  %v5146_v55 = vld [vmem:[%s8450_s3 + $0x14] sm:$0xf0] }
 0x1ee   :  { %v5428_v3 = vpop.eup %5427  ;;  %v1269_v10 = vmul.f32 %v6655_v53, %v6604_v56  ;;  %5431 = vrcp.f32 %v6653_v12  ;;  %vm1274_vm10 = vweird.f32 %v6655_v53  ;;  %vm6702_vm13 = vmor %vm1235_vm12, %vm1236_vm8  ;;  %v4266_v56 = vor.u32 %v5154_v60, %v4265_v48  ;;  %1610 = vmatpush.bf16.msrb.mxu3 %v4270_v15 }
 0x1ef   :  { %v1232_v8 = vsub.f32 1.0, %v1231_v4  ;;  %v6667_v14 = vadd.f32 1.0, %v5428_v3  ;;  %5433 = vrcp.f32 %v6651_v9  ;;  %v5430_v2 = vpop.eup %5429  ;;  %vm6714_vm14 = vmor %vm1273_vm11, %vm1274_vm10  ;;  %vm1250_vm0 = vweird.f32 %v6653_v12 }
 0x1f0   :  { %v1270_v49 = vsub.f32 1.0, %v1269_v10  ;;  %1596 = vmatpush.bf16.msrb.mxu2 %v4266_v56  ;;  %v1256_v56 = vand.u32 2147483648, %v6653_v12 }
 0x1f1   :  { %v1233_v5 = vmul.f32 %v6648_v61, %v1232_v8  ;;  %5435 = vrcp.f32 %v6667_v14  ;;  %v5150_v8 = vld [vmem:[%s8450_s3 + $0x34] sm:$0xf0]  ;;  %vm1288_vm3 = vweird.f32 %v6667_v14 }
 0x1f2   :  { %v1271_v17 = vmul.f32 %v6655_v53, %v1270_v49  ;;  %5437 = vpow2.f32 %v4220_v16  ;;  %v4251_v16 = vld [vmem:[%s8450_s3 + $0x38] sm:$0xf0] }
 0x1f3   :  { %v1234_v50 = vadd.f32 %v6648_v61, %v1233_v5  ;;  %5439 = vtanh.f32 %v1220_v18  ;;  %v4225_v5 = vld [vmem:[%s8450_s3] sm:$0xf]  ;;  %v4246_v18 = vor.u32 %v5147_v1, %v4243_v62  ;;  %v5144_v1 = vld [vmem:[%s8450_s3 + $0xc] sm:$0xf]  ;;  %v4235_v62 = vld [vmem:[%s8450_s3 + $0x18] sm:$0xf0] }
 0x1f4   :  { %v1272_v63 = vadd.f32 %v6655_v53, %v1271_v17  ;;  %v6728_v3 = vpop.eup %5431  ;;  %v4226_v54 = vor.u32 %v5145_v21, %v4225_v5  ;;  %v8489_v21 = vand.u32 2147483647, %v6653_v12 }
 0x1f5   :  { %v1238_v10 = vsel %vm6702_vm13, %v6648_v61, %v1234_v50  ;;  %v6742_v49 = vpop.eup %5433  ;;  %v1246_v60 = vmul.f32 %v6728_v3, %v6653_v12  ;;  %1583 = vmatpush.bf16.msrb.mxu1 %v4246_v18  ;;  %vm1251_vm1 = vweird.f32 %v6728_v3 }
 0x1f6   :  { %v1243_v61 = vsel %vm6670_vm9, %v1242_v19, %v1238_v10  ;;  %v1276_v48 = vsel %vm6714_vm14, %v6655_v53, %v1272_v63  ;;  %v1309_v51 = vmul.f32 %v6742_v49, %v6651_v9  ;;  %v4250_v63 = vor.u32 %v5150_v8, %v4249_v7  ;;  %1570 = vmatpush.bf16.msrb.mxu0 %v4226_v54  ;;  %vm1252_vm4 = vmor %vm1250_vm0, %vm1251_vm1 }
 0x1f7   :  { %v5436_v19 = vpop.eup %5435  ;;  %v1281_v53 = vsel %vm6719_vm15, %v1280_v24, %v1276_v48  ;;  %v1342_v17 = vmul.f32 %v5430_v2, %v1243_v61  ;;  %v1247_v50 = vsub.f32 1.0, %v1246_v60  ;;  %v4230_v48 = vor.u32 %v5143_v43, %v4227_v22 }
 0x1f8   :  { %v1340_v24 = vmul.f32 %v1281_v53, %v6460_v11  ;;  %v1284_v13 = vmul.f32 %v5436_v19, %v6667_v14  ;;  %v5438_v2 = vpop.eup %5437  ;;  %v4254_v11 = vor.u32 %v5148_v23, %v4251_v16  ;;  %1597 = vmatpush.bf16.msrb.mxu2 %v4250_v63  ;;  %v4234_v60 = vor.u32 %v5146_v55, %v4233_v0 }
 0x1f9   :  { %v1248_v20 = vmul.f32 %v6728_v3, %v1247_v50  ;;  %v1307_v61 = vadd.f32 1.0, %v5438_v2  ;;  %v4238_v53 = vor.u32 %v5144_v1, %v4235_v62  ;;  %v5440_v52 = vpop.eup %5439  ;;  %vm1289_vm2 = vweird.f32 %v5436_v19  ;;  %1584 = vmatpush.bf16.msrb.mxu1 %v4230_v48 }
 0x1fa   :  { %v6783_v10 = vadd.f32 %v1342_v17, %v1340_v24  ;;  %v1285_v15 = vsub.f32 1.0, %v1284_v13  ;;  %1611 = vmatpush.bf16.msrb.mxu3 %v4254_v11  ;;  %v1292_v8 = vand.u32 2147483647, %v6667_v14  ;;  %v1257_v23 = vor.u32 1.1754944e-38, %v1256_v56  ;;  %vm1290_vm6 = vmor %vm1288_vm3, %vm1289_vm2 }
 0x1fb   :  { %v1249_v7 = vadd.f32 %v6728_v3, %v1248_v20  ;;  %5441 = vrcp.f32 %v1307_v61  ;;  %v1310_v16 = vsub.f32 1.0, %v1309_v51  ;;  %vm1255_vm5 = vcmp.eq.f32.partialorder %v8489_v21, 8.507059e+37  ;;  %v5206_v21 = vld [vmem:[%s8450_s3 + $0xf4] sm:$0xf0] }
 0x1fc   :  { %v1286_v4 = vmul.f32 %v5436_v19, %v1285_v15  ;;  %v8490_v17 = vand.u32 2147483648, %v6667_v14  ;;  %1598 = vmatpush.bf16.msrb.mxu2 %v4234_v60  ;;  %vm1293_vm7 = vcmp.eq.f32.partialorder %v1292_v8, 8.507059e+37  ;;  %5443 = vtanh.f32 %v6783_v10  ;;  %v5203_v8 = vld [vmem:[%s8450_s3 + $0xe4] sm:$0xf] }
 0x1fd   :  { %v1253_v5 = vsel %vm1252_vm4, %v6728_v3, %v1249_v7  ;;  %v1311_v50 = vmul.f32 %v6742_v49, %v1310_v16  ;;  %vm1314_vm8 = vweird.f32 %v6742_v49  ;;  %vm1313_vm9 = vweird.f32 %v6651_v9  ;;  %v4475_v16 = vld [vmem:[%s8450_s3 + $0xf0] sm:$0xf0] }
 0x1fe   :  { %v1287_v43 = vadd.f32 %v5436_v19, %v1286_v4  ;;  %v1295_v18 = vor.u32 1.1754944e-38, %v8490_v17  ;;  %v1258_v22 = vsel %vm1255_vm5, %v1257_v23, %v1253_v5  ;;  %1612 = vmatpush.bf16.msrb.mxu3 %v4238_v53  ;;  %v1332_v62 = vand.u32 2147483647, %v1307_v61  ;;  %vm1315_vm11 = vmor %vm1313_vm9, %vm1314_vm8  ;;  %v4481_v5 = vld [vmem:[%s8450_s3 + $0xe8] sm:$0xf] }
 0x1ff   :  { %v1343_v55 = vmul.f32 %v5440_v52, %v1258_v22  ;;  %v1312_v14 = vadd.f32 %v6742_v49, %v1311_v50  ;;  %v1319_v52 = vand.u32 2147483648, %v6651_v9  ;;  %vm1328_vm12 = vweird.f32 %v1307_v61 }
 0x200   :  { %v1291_v0 = vsel %vm1290_vm6, %v5436_v19, %v1287_v43  ;;  %v1334_v19 = vand.u32 2147483648, %v1307_v61  ;;  %vm1333_vm15 = vcmp.eq.f32.partialorder %v1332_v62, 8.507059e+37  ;;  %v311_v43 = vadd.f32 %v6105_v25, %v6199_v6  ;;  %v4457_v25 = vld [vmem:[%s8450_s3 + $0xc0] sm:$0xf] }
 0x201   :  { %v1296_v24 = vsel %vm1293_vm7, %v1295_v18, %v1291_v0  ;;  %v5442_v3 = vpop.eup %5441  ;;  %v1316_v51 = vsel %vm1315_vm11, %v6742_v49, %v1312_v14  ;;  %v1320_v11 = vor.u32 1.1754944e-38, %v1319_v52  ;;  %v4473_v49 = vld [vmem:[%s8450_s3 + $0xe0] sm:$0xf]  ;;  %v360_v17 = vadd.f32 %v6107_v26, %v6224_v59  ;;  %v5204_v0 = vld [vmem:[%s8450_s3 + $0xec] sm:$0xf] }
 0x202   :  { %v1341_v13 = vmul.f32 %v1296_v24, %v6482_v47  ;;  %v1324_v12 = vmul.f32 %v5442_v3, %v1307_v61  ;;  %v1317_v47 = vand.u32 2147483647, %v6651_v9  ;;  %vm1329_vm10 = vweird.f32 %v5442_v3  ;;  %v5444_v63 = vpop.eup %5443  ;;  %v5205_v61 = vld [vmem:[%s8450_s3 + $0xec] sm:$0xf0]  ;;  %v5199_v14 = vld [vmem:[%s8450_s3 + $0xc4] sm:$0xf] }
 0x203   :  { %vm1330_vm13 = vmor %vm1328_vm12, %vm1329_vm10  ;;  %v1335_v54 = vor.u32 1.1754944e-38, %v1334_v19  ;;  %v4474_v23 = vor.u32 %v5205_v61, %v4473_v49  ;;  %v4478_v18 = vor.u32 %v5203_v8, %v4475_v16  ;;  %v4482_v22 = vor.u32 %v5206_v21, %v4481_v5  ;;  %v5201_v26 = vld [vmem:[%s8450_s3 + $0xcc] sm:$0xf0]  ;;  %v4459_v52 = vld [vmem:[%s8450_s3 + $0xd0] sm:$0xf0] }
 0x204   :  { %v6799_v56 = vadd.f32 %v1343_v55, %v1341_v13  ;;  %v1325_v4 = vsub.f32 1.0, %v1324_v12  ;;  %vm1318_vm14 = vcmp.eq.f32.partialorder %v1317_v47, 8.507059e+37  ;;  %v4483_v55 = vld [vmem:[%s8450_s3 + $0xf8] sm:$0xf0]  ;;  %v4465_v19 = vld [vmem:[%s8450_s3 + $0xc8] sm:$0xf]  ;;  %v313_v61 = vadd.f32 %v6113_v29, %v6199_v6 }
 0x205   :  { %v1321_v48 = vsel %vm1318_vm14, %v1320_v11, %v1316_v51  ;;  %1968 = vmatpush.bf16.msra.mxu0 %v4474_v23  ;;  %v4486_v13 = vor.u32 %v5204_v0, %v4483_v55  ;;  %1982 = vmatpush.bf16.msra.mxu1 %v4478_v18  ;;  %v5202_v47 = vld [vmem:[%s8450_s3 + $0xd4] sm:$0xf0]  ;;  %v4467_v11 = vld [vmem:[%s8450_s3 + $0xd8] sm:$0xf0]  ;;  %v5196_v5 = vld [vmem:[%s8450_s3 + $0xac] sm:$0xf] }
 0x206   :  { %5445 = vtanh.f32 %v6799_v56  ;;  %v1326_v1 = vmul.f32 %v5442_v3, %v1325_v4  ;;  %v1348_v53 = vmul.f32 %v5444_v63, %v1321_v48  ;;  %1996 = vmatpush.bf16.msra.mxu2 %v4482_v22  ;;  %v4458_v4 = vor.u32 %v5201_v26, %v4457_v25  ;;  %v5200_v63 = vld [vmem:[%s8450_s3 + $0xcc] sm:$0xf]  ;;  %v5195_v48 = vld [vmem:[%s8450_s3 + $0xa4] sm:$0xf]  ;;  %v5198_v49 = vld [vmem:[%s8450_s3 + $0xb4] sm:$0xf0] }
 0x207   :  { %2010 = vmatpush.bf16.msra.mxu3 %v4486_v13  ;;  %v4466_v51 = vor.u32 %v5202_v47, %v4465_v19  ;;  %v4451_v21 = vld [vmem:[%s8450_s3 + $0xb8] sm:$0xf0]  ;;  %v5193_v55 = vld [vmem:[%s8450_s3 + $0x8c] sm:$0xf0] }
 0x208   :  { %v1327_v2 = vadd.f32 %v5442_v3, %v1326_v1  ;;  %v4454_v29 = vor.u32 %v5196_v5, %v4451_v21 }
 0x209   :  { %1969 = vmatpush.bf16.msra.mxu0 %v4458_v4 }
 0x20a   :  { %v1331_v20 = vsel %vm1330_vm13, %v5442_v3, %v1327_v2  ;;  %v4462_v2 = vor.u32 %v5199_v14, %v4459_v52  ;;  %1997 = vmatpush.bf16.msra.mxu2 %v4466_v51  ;;  %v5194_v52 = vld [vmem:[%s8450_s3 + $0x94] sm:$0xf0] }
 0x20b   :  { %v1336_v60 = vsel %vm1333_vm15, %v1335_v54, %v1331_v20  ;;  %v4470_v54 = vor.u32 %v5200_v63, %v4467_v11  ;;  %v5197_v20 = vld [vmem:[%s8450_s3 + $0xac] sm:$0xf0] }
 0x20c   :  { %v5446_v15 = vpop.eup %5445  ;;  %1983 = vmatpush.bf16.msra.mxu1 %v4462_v2  ;;  %v4435_v2 = vld [vmem:[%s8450_s3 + $0x98] sm:$0xf0] }
 0x20d   :  { %v1349_v9 = vmul.f32 %v5446_v15, %v1336_v60  ;;  %v4441_v15 = vld [vmem:[%s8450_s3 + $0xa0] sm:$0xf]  ;;  %v458_v60 = vadd.f32 %v6111_v28, %v6263_v57  ;;  %v362_v28 = vadd.f32 %v6115_v30, %v6224_v59  ;;  %2011 = vmatpush.bf16.msra.mxu3 %v4470_v54 }
 0x20e   :  { %v4425_v30 = vld [vmem:[%s8450_s3 + $0x80] sm:$0xf] }
 0x20f   :  { %v5343_v7 = vpack.c.bf16 %v1349_v9, %v1348_v53  ;;  %v4442_v53 = vor.u32 %v5197_v20, %v4441_v15  ;;  %v4443_v9 = vld [vmem:[%s8450_s3 + $0xb0] sm:$0xf0]  ;;  %v4426_v13 = vor.u32 %v5193_v55, %v4425_v30  ;;  %v4409_v54 = vld [vmem:[%s8450_s3 + $0x60] sm:$0xf]  ;;  %v5189_v15 = vld [vmem:[%s8450_s3 + $0x6c] sm:$0xf0] }
 0x210   :  { %v4446_v23 = vor.u32 %v5195_v48, %v4443_v9  ;;  %v5187_v20 = vld [vmem:[%s8450_s3 + $0x64] sm:$0xf]  ;;  %v4411_v48 = vld [vmem:[%s8450_s3 + $0x70] sm:$0xf0]  ;;  %v4417_v9 = vld [vmem:[%s8450_s3 + $0x68] sm:$0xf] }
 0x211   :  { %5375 = vst [vmem:[%s8453_s4 + $0x8] sm:$0xff] %v5343_v7   ;;  %1571 = vmatmul.bf16.vlgmr.msrb.gmra.mxu0 %v5343_v7  ;;  %1585 = vmatmul.bf16.vlgmr.msrb.gmra.mxu1 %v5343_v7 }
 0x212   :  { %1599 = vmatmul.bf16.vlgmr.msrb.gmra.mxu2 %v5343_v7  ;;  %1613 = vmatmul.bf16.vlgmr.msrb.gmra.mxu3 %v5343_v7  ;;  %v4449_v7 = vld [vmem:[%s8450_s3 + $0xa8] sm:$0xf] }
 0x213   :  { %v4450_v16 = vor.u32 %v5198_v49, %v4449_v7  ;;  %1970 = vmatpush.bf16.msra.mxu0 %v4442_v53  ;;  %1984 = vmatpush.bf16.msra.mxu1 %v4446_v23  ;;  %v5190_v7 = vld [vmem:[%s8450_s3 + $0x74] sm:$0xf0]  ;;  %v460_v49 = vadd.f32 %v6119_v32, %v6263_v57  ;;  %v5185_v32 = vld [vmem:[%s8450_s3 + $0x4c] sm:$0xf0] }
 0x214   :  { %2012 = vmatpush.bf16.msra.mxu3 %v4454_v29  ;;  %v4418_v5 = vor.u32 %v5190_v7, %v4417_v9  ;;  %v4403_v7 = vld [vmem:[%s8450_s3 + $0x58] sm:$0xf0] }
 0x215   :  { %1998 = vmatpush.bf16.msra.mxu2 %v4450_v16  ;;  %v4414_v16 = vor.u32 %v5187_v20, %v4411_v48 }
 0x217   :  { %1971 = vmatpush.bf16.msra.mxu0 %v4426_v13 }
 0x28e   :  { %v1572_v24 = vpop.f32.mrf.mxu0  ;;  %v1586_v50 = vpop.f32.mrf.mxu1 }
 0x28f   :  { %v1619_v3 = vadd.f32 %v1572_v24, %v311_v43  ;;  %v1620_v12 = vadd.f32 %v1586_v50, %v360_v17  ;;  %v5191_v24 = vld [vmem:[%s8450_s3 + $0x84] sm:$0xf] }
 0x291   :  { %v4351_v1 = vmul.f32 -1.442695, %v1619_v3  ;;  %v4353_v62 = vmul.f32 -1.442695, %v1620_v12  ;;  %v4427_v3 = vld [vmem:[%s8450_s3 + $0x90] sm:$0xf0] }
 0x292   :  { %v4433_v12 = vld [vmem:[%s8450_s3 + $0x88] sm:$0xf]  ;;  %v4430_v4 = vor.u32 %v5191_v24, %v4427_v3 }
 0x293   :  { %5447 = vpow2.f32 %v4351_v1  ;;  %v4434_v1 = vor.u32 %v5194_v52, %v4433_v12  ;;  %v411_v12 = vadd.f32 %v6117_v31, %v6334_v58 }
 0x294   :  { %5449 = vpow2.f32 %v4353_v62  ;;  %v5192_v62 = vld [vmem:[%s8450_s3 + $0x8c] sm:$0xf]  ;;  %1985 = vmatpush.bf16.msra.mxu1 %v4430_v4 }
 0x295   :  { %v1614_v8 = vpop.f32.mrf.mxu3  ;;  %v1600_v63 = vpop.f32.mrf.mxu2  ;;  %v4438_v11 = vor.u32 %v5192_v62, %v4435_v2  ;;  %1999 = vmatpush.bf16.msra.mxu2 %v4434_v1 }
 0x296   :  { %v1622_v43 = vadd.f32 %v1614_v8, %v458_v60  ;;  %v1574_v17 = vpop.f32.mrf.mxu0  ;;  %v1588_v18 = vpop.f32.mrf.mxu1  ;;  %v409_v60 = vadd.f32 %v6109_v27, %v6334_v58  ;;  %v4419_v27 = vld [vmem:[%s8450_s3 + $0x78] sm:$0xf0] }
 0x297   :  { %v1623_v22 = vadd.f32 %v1574_v17, %v313_v61  ;;  %v1624_v0 = vadd.f32 %v1588_v18, %v362_v28  ;;  %2013 = vmatpush.bf16.msra.mxu3 %v4438_v11  ;;  %v4410_v61 = vor.u32 %v5189_v15, %v4409_v54  ;;  %v5188_v28 = vld [vmem:[%s8450_s3 + $0x6c] sm:$0xf]  ;;  %v5183_v17 = vld [vmem:[%s8450_s3 + $0x44] sm:$0xf]  ;;  %v4401_v54 = vld [vmem:[%s8450_s3 + $0x48] sm:$0xf] }
 0x298   :  { %v4355_v50 = vmul.f32 -1.442695, %v1622_v43  ;;  %v1621_v23 = vadd.f32 %v1600_v63, %v409_v60  ;;  %v4422_v21 = vor.u32 %v5188_v28, %v4419_v27  ;;  %v4393_v43 = vld [vmem:[%s8450_s3 + $0x40] sm:$0xf]  ;;  %1986 = vmatpush.bf16.msra.mxu1 %v4414_v16  ;;  %v5186_v15 = vld [vmem:[%s8450_s3 + $0x54] sm:$0xf0] }
 0x299   :  { %v5448_v25 = vpop.eup %5447  ;;  %v4352_v26 = vmul.f32 -1.442695, %v1623_v22  ;;  %v4354_v14 = vmul.f32 -1.442695, %v1624_v0  ;;  %1972 = vmatpush.bf16.msra.mxu0 %v4410_v61  ;;  %v4394_v22 = vor.u32 %v5185_v32, %v4393_v43  ;;  %v4395_v0 = vld [vmem:[%s8450_s3 + $0x50] sm:$0xf0]  ;;  %2000 = vmatpush.bf16.msra.mxu2 %v4418_v5 }
 0x29a   :  { %v5450_v19 = vpop.eup %5449  ;;  %v6912_v47 = vadd.f32 1.0, %v5448_v25  ;;  %5451 = vpow2.f32 %v4355_v50  ;;  %v4398_v13 = vor.u32 %v5183_v17, %v4395_v0  ;;  %v5184_v60 = vld [vmem:[%s8450_s3 + $0x4c] sm:$0xf]  ;;  %v5181_v61 = vld [vmem:[%s8450_s3 + $0x2c] sm:$0xf0] }
 0x29b   :  { %v6920_v51 = vadd.f32 1.0, %v5450_v19  ;;  %5453 = vpow2.f32 %v4352_v26  ;;  %2014 = vmatpush.bf16.msra.mxu3 %v4422_v21  ;;  %v4406_v0 = vor.u32 %v5184_v60, %v4403_v7  ;;  %v4363_v11 = vld [vmem:[%s8450_s3 + $0x10] sm:$0xf0]  ;;  %v4371_v7 = vld [vmem:[%s8450_s3 + $0x18] sm:$0xf0] }
 0x29c   :  { %5455 = vrcp.f32 %v6912_v47  ;;  %v1644_v55 = vand.u32 2147483647, %v6912_v47  ;;  %v1646_v26 = vand.u32 2147483648, %v6912_v47  ;;  %1987 = vmatpush.bf16.msra.mxu1 %v4398_v13  ;;  %vm1640_vm4 = vweird.f32 %v6912_v47  ;;  %v5182_v13 = vld [vmem:[%s8450_s3 + $0x34] sm:$0xf0] }
 0x29d   :  { %5457 = vrcp.f32 %v6920_v51  ;;  %v1616_v53 = vpop.f32.mrf.mxu3  ;;  %v1684_v52 = vand.u32 2147483648, %v6920_v51  ;;  %v1682_v19 = vand.u32 2147483647, %v6920_v51  ;;  %v1602_v31 = vpop.f32.mrf.mxu2  ;;  %1973 = vmatpush.bf16.msra.mxu0 %v4394_v22  ;;  %vm1678_vm3 = vweird.f32 %v6920_v51 }
 0x29e   :  { %5459 = vpow2.f32 %v4354_v14  ;;  %v1626_v29 = vadd.f32 %v1616_v53, %v460_v49  ;;  %vm6986_vm1 = vcmp.eq.f32.partialorder %v1644_v55, 8.507059e+37  ;;  %v1647_v48 = vor.u32 1.1754944e-38, %v1646_v26  ;;  %v4377_v49 = vld [vmem:[%s8450_s3 + $0x20] sm:$0xf] }
 0x29f   :  { %5461 = vtanh.f32 %v1621_v23  ;;  %v1625_v9 = vadd.f32 %v1602_v31, %v411_v12  ;;  %v1685_v28 = vor.u32 1.1754944e-38, %v1684_v52  ;;  %v4379_v23 = vld [vmem:[%s8450_s3 + $0x30] sm:$0xf0]  ;;  %vm7035_vm7 = vcmp.eq.f32.partialorder %v1682_v19, 8.507059e+37  ;;  %v5180_v12 = vld [vmem:[%s8450_s3 + $0x2c] sm:$0xf]  ;;  %2015 = vmatpush.bf16.msra.mxu3 %v4406_v0 }
 0x2a0   :  { %v5452_v8 = vpop.eup %5451  ;;  %v4356_v2 = vmul.f32 -1.442695, %v1626_v29  ;;  %v4378_v55 = vor.u32 %v5181_v61, %v4377_v49  ;;  %v4361_v52 = vld [vmem:[%s8450_s3] sm:$0xf]  ;;  %v5177_v19 = vld [vmem:[%s8450_s3 + $0xc] sm:$0xf0] }
 0x2a1   :  { %v5454_v18 = vpop.eup %5453  ;;  %v6967_v24 = vadd.f32 1.0, %v5452_v8  ;;  %v5179_v8 = vld [vmem:[%s8450_s3 + $0x24] sm:$0xf] }
 0x2a2   :  { %v6964_v30 = vpop.eup %5455  ;;  %v6969_v50 = vadd.f32 1.0, %v5454_v18  ;;  %v4385_v18 = vld [vmem:[%s8450_s3 + $0x28] sm:$0xf]  ;;  %1974 = vmatpush.bf16.msra.mxu0 %v4378_v55 }
 0x2a3   :  { %v6971_v3 = vpop.eup %5457  ;;  %v1636_v25 = vmul.f32 %v6964_v30, %v6912_v47  ;;  %vm1641_vm0 = vweird.f32 %v6964_v30 }
 0x2a4   :  { %v5460_v14 = vpop.eup %5459  ;;  %v1674_v4 = vmul.f32 %v6971_v3, %v6920_v51  ;;  %5463 = vrcp.f32 %v6969_v50  ;;  %vm1679_vm2 = vweird.f32 %v6971_v3  ;;  %vm7018_vm5 = vmor %vm1640_vm4, %vm1641_vm0  ;;  %v4402_v51 = vor.u32 %v5186_v15, %v4401_v54  ;;  %v4369_v54 = vld [vmem:[%s8450_s3 + $0x8] sm:$0xf]  ;;  %v5178_v15 = vld [vmem:[%s8450_s3 + $0x14] sm:$0xf0] }
 0x2a5   :  { %v1637_v1 = vsub.f32 1.0, %v1636_v25  ;;  %v6983_v62 = vadd.f32 1.0, %v5460_v14  ;;  %5465 = vrcp.f32 %v6967_v24  ;;  %v5462_v16 = vpop.eup %5461  ;;  %vm7030_vm6 = vmor %vm1678_vm3, %vm1679_vm2  ;;  %v1659_v17 = vand.u32 2147483647, %v6969_v50  ;;  %v4387_v25 = vld [vmem:[%s8450_s3 + $0x38] sm:$0xf0] }
 0x2a6   :  { %v1675_v63 = vsub.f32 1.0, %v1674_v4  ;;  %2001 = vmatpush.bf16.msra.mxu2 %v4402_v51  ;;  %vm1655_vm8 = vweird.f32 %v6969_v50  ;;  %v4370_v5 = vor.u32 %v5178_v15, %v4369_v54 }
 0x2a7   :  { %v1638_v20 = vmul.f32 %v6964_v30, %v1637_v1  ;;  %5467 = vrcp.f32 %v6983_v62  ;;  %v1699_v32 = vand.u32 2147483648, %v6983_v62  ;;  %v5175_v1 = vld [vmem:[%s8450_s3 + $0x4] sm:$0xf]  ;;  %v1697_v0 = vand.u32 2147483647, %v6983_v62 }
 0x2a8   :  { %v1676_v53 = vmul.f32 %v6971_v3, %v1675_v63  ;;  %5469 = vpow2.f32 %v4356_v2  ;;  %v4382_v63 = vor.u32 %v5179_v8, %v4379_v23  ;;  %vm1693_vm11 = vweird.f32 %v6983_v62 }
 0x2a9   :  { %v1639_v27 = vadd.f32 %v6964_v30, %v1638_v20  ;;  %5471 = vtanh.f32 %v1625_v9  ;;  %v5176_v9 = vld [vmem:[%s8450_s3 + $0xc] sm:$0xf]  ;;  %vm1660_vm13 = vcmp.eq.f32.partialorder %v1659_v17, 8.507059e+37  ;;  %vm1698_vm15 = vcmp.eq.f32.partialorder %v1697_v0, 8.507059e+37  ;;  %v4619_v0 = vld [vmem:[%s8450_s3 + $0xf8] sm:$0xf0] }
 0x2aa   :  { %v1677_v21 = vadd.f32 %v6971_v3, %v1676_v53  ;;  %v7044_v29 = vpop.eup %5463  ;;  %v1661_v53 = vand.u32 2147483648, %v6969_v50  ;;  %1988 = vmatpush.bf16.msra.mxu1 %v4382_v63  ;;  %v1724_v17 = vand.u32 2147483648, %v6967_v24 }
 0x2ab   :  { %v1643_v22 = vsel %vm7018_vm5, %v6964_v30, %v1639_v27  ;;  %v7058_v26 = vpop.eup %5465  ;;  %v1651_v4 = vmul.f32 %v7044_v29, %v6969_v50  ;;  %v4362_v27 = vor.u32 %v5177_v19, %v4361_v52  ;;  %vm1656_vm9 = vweird.f32 %v7044_v29 }
 0x2ac   :  { %v1648_v30 = vsel %vm6986_vm1, %v1647_v48, %v1643_v22  ;;  %v1681_v14 = vsel %vm7030_vm6, %v6971_v3, %v1677_v21  ;;  %v1714_v61 = vmul.f32 %v7058_v26, %v6967_v24  ;;  %v4374_v21 = vor.u32 %v5176_v9, %v4371_v7  ;;  %vm1657_vm12 = vmor %vm1655_vm8, %vm1656_vm9 }
 0x2ad   :  { %v5468_v31 = vpop.eup %5467  ;;  %v1686_v3 = vsel %vm7035_vm7, %v1685_v28, %v1681_v14  ;;  %v1747_v2 = vmul.f32 %v5462_v16, %v1648_v30  ;;  %v1652_v48 = vsub.f32 1.0, %v1651_v4  ;;  %v4386_v28 = vor.u32 %v5182_v13, %v4385_v18  ;;  %1975 = vmatpush.bf16.msra.mxu0 %v4362_v27  ;;  %v5235_v27 = vld [vmem:[%s8450_s3 + $0xe4] sm:$0xf] }
 0x2ae   :  { %v1745_v20 = vmul.f32 %v1686_v3, %v6783_v10  ;;  %v1689_v60 = vmul.f32 %v5468_v31, %v6983_v62  ;;  %v5470_v49 = vpop.eup %5469  ;;  %v4390_v10 = vor.u32 %v5180_v12, %v4387_v25  ;;  %v4366_v16 = vor.u32 %v5175_v1, %v4363_v11 }
 0x2af   :  { %v1653_v8 = vmul.f32 %v7044_v29, %v1652_v48  ;;  %v1712_v23 = vadd.f32 1.0, %v5470_v49  ;;  %2002 = vmatpush.bf16.msra.mxu2 %v4386_v28  ;;  %v5472_v43 = vpop.eup %5471  ;;  %vm1694_vm10 = vweird.f32 %v5468_v31  ;;  %v1662_v55 = vor.u32 1.1754944e-38, %v1661_v53 }
 0x2b0   :  { %v7099_v47 = vadd.f32 %v1747_v2, %v1745_v20  ;;  %v1690_v51 = vsub.f32 1.0, %v1689_v60  ;;  %2016 = vmatpush.bf16.msra.mxu3 %v4390_v10  ;;  %1989 = vmatpush.bf16.msra.mxu1 %v4366_v16  ;;  %v1715_v13 = vsub.f32 1.0, %v1714_v61  ;;  %vm1695_vm14 = vmor %vm1693_vm11, %vm1694_vm10  ;;  %v1700_v30 = vor.u32 1.1754944e-38, %v1699_v32  ;;  %v5237_v10 = vld [vmem:[%s8450_s3 + $0xec] sm:$0xf0] }
 0x2b1   :  { %v1654_v18 = vadd.f32 %v7044_v29, %v1653_v8  ;;  %5473 = vrcp.f32 %v1712_v23  ;;  %vm1719_vm0 = vweird.f32 %v7058_v26  ;;  %vm1718_vm1 = vweird.f32 %v6967_v24  ;;  %v4611_v8 = vld [vmem:[%s8450_s3 + $0xf0] sm:$0xf0]  ;;  %v5238_v16 = vld [vmem:[%s8450_s3 + $0xf4] sm:$0xf0] }
 0x2b2   :  { %v1691_v22 = vmul.f32 %v5468_v31, %v1690_v51  ;;  %v1716_v1 = vmul.f32 %v7058_v26, %v1715_v13  ;;  %5475 = vtanh.f32 %v7099_v47  ;;  %v1737_v11 = vand.u32 2147483647, %v1712_v23  ;;  %vm1720_vm3 = vmor %vm1718_vm1, %vm1719_vm0 }
 0x2b3   :  { %v1658_v12 = vsel %vm1657_vm12, %v7044_v29, %v1654_v18  ;;  %2003 = vmatpush.bf16.msra.mxu2 %v4370_v5  ;;  %vm1733_vm4 = vweird.f32 %v1712_v23  ;;  %v1725_v48 = vor.u32 1.1754944e-38, %v1724_v17  ;;  %v316_v5 = vadd.f32 %v6121_v33, %v6199_v6  ;;  %v5236_v18 = vld [vmem:[%s8450_s3 + $0xec] sm:$0xf]  ;;  %v4593_v33 = vld [vmem:[%s8450_s3 + $0xc0] sm:$0xf] }
 0x2b4   :  { %v1692_v25 = vadd.f32 %v5468_v31, %v1691_v22  ;;  %v1663_v14 = vsel %vm1660_vm13, %v1662_v55, %v1658_v12  ;;  %2017 = vmatpush.bf16.msra.mxu3 %v4374_v21  ;;  %v1717_v62 = vadd.f32 %v7058_v26, %v1716_v1  ;;  %vm1738_vm7 = vcmp.eq.f32.partialorder %v1737_v11, 8.507059e+37  ;;  %v5234_v1 = vld [vmem:[%s8450_s3 + $0xd4] sm:$0xf0]  ;;  %v4603_v17 = vld [vmem:[%s8450_s3 + $0xd8] sm:$0xf0] }
 0x2b5   :  { %v1748_v52 = vmul.f32 %v5472_v43, %v1663_v14  ;;  %v365_v21 = vadd.f32 %v6123_v34, %v6224_v59  ;;  %v4614_v43 = vor.u32 %v5235_v27, %v4611_v8  ;;  %v4622_v12 = vor.u32 %v5236_v18, %v4619_v0  ;;  %v5233_v34 = vld [vmem:[%s8450_s3 + $0xcc] sm:$0xf0]  ;;  %v5231_v14 = vld [vmem:[%s8450_s3 + $0xc4] sm:$0xf] }
 0x2b6   :  { %v1696_v4 = vsel %vm1695_vm14, %v5468_v31, %v1692_v25  ;;  %v1739_v31 = vand.u32 2147483648, %v1712_v23  ;;  %v1721_v15 = vsel %vm1720_vm3, %v7058_v26, %v1717_v62  ;;  %v4609_v26 = vld [vmem:[%s8450_s3 + $0xe0] sm:$0xf]  ;;  %v5227_v11 = vld [vmem:[%s8450_s3 + $0xa4] sm:$0xf] }
 0x2b7   :  { %v1701_v19 = vsel %vm1698_vm15, %v1700_v30, %v1696_v4  ;;  %v5474_v29 = vpop.eup %5473  ;;  %v4610_v51 = vor.u32 %v5237_v10, %v4609_v26  ;;  %2387 = vmatpush.bf16.msrb.mxu1 %v4614_v43  ;;  %v4594_v4 = vor.u32 %v5233_v34, %v4593_v33  ;;  %v5225_v8 = vld [vmem:[%s8450_s3 + $0x8c] sm:$0xf0]  ;;  %v4569_v43 = vld [vmem:[%s8450_s3 + $0x88] sm:$0xf]  ;;  %v5224_v33 = vld [vmem:[%s8450_s3 + $0x8c] sm:$0xf] }
 0x2b8   :  { %v1746_v3 = vmul.f32 %v1701_v19, %v6799_v56  ;;  %v1729_v50 = vmul.f32 %v5474_v29, %v1712_v23  ;;  %v1722_v56 = vand.u32 2147483647, %v6967_v24  ;;  %vm1734_vm2 = vweird.f32 %v5474_v29  ;;  %v5476_v20 = vpop.eup %5475  ;;  %v4617_v23 = vld [vmem:[%s8450_s3 + $0xe8] sm:$0xf]  ;;  %2415 = vmatpush.bf16.msrb.mxu3 %v4622_v12  ;;  %v4571_v34 = vld [vmem:[%s8450_s3 + $0x98] sm:$0xf0] }
 0x2b9   :  { %vm1735_vm5 = vmor %vm1733_vm4, %vm1734_vm2  ;;  %v1740_v60 = vor.u32 1.1754944e-38, %v1739_v31  ;;  %v4618_v22 = vor.u32 %v5238_v16, %v4617_v23  ;;  %2373 = vmatpush.bf16.msrb.mxu0 %v4610_v51  ;;  %v4601_v19 = vld [vmem:[%s8450_s3 + $0xc8] sm:$0xf]  ;;  %v5223_v23 = vld [vmem:[%s8450_s3 + $0x84] sm:$0xf] }
 0x2ba   :  { %v7115_v2 = vadd.f32 %v1748_v52, %v1746_v3  ;;  %v1730_v32 = vsub.f32 1.0, %v1729_v50  ;;  %vm1723_vm6 = vcmp.eq.f32.partialorder %v1722_v56, 8.507059e+37  ;;  %v4595_v52 = vld [vmem:[%s8450_s3 + $0xd0] sm:$0xf0]  ;;  %v4602_v62 = vor.u32 %v5234_v1, %v4601_v19  ;;  %v4577_v56 = vld [vmem:[%s8450_s3 + $0xa0] sm:$0xf] }
 0x2bb   :  { %v1726_v7 = vsel %vm1723_vm6, %v1725_v48, %v1721_v15  ;;  %2401 = vmatpush.bf16.msrb.mxu2 %v4618_v22  ;;  %v4598_v50 = vor.u32 %v5231_v14, %v4595_v52  ;;  %v4585_v48 = vld [vmem:[%s8450_s3 + $0xa8] sm:$0xf]  ;;  %v4574_v52 = vor.u32 %v5224_v33, %v4571_v34  ;;  %v4545_v19 = vld [vmem:[%s8450_s3 + $0x60] sm:$0xf]  ;;  %v5221_v1 = vld [vmem:[%s8450_s3 + $0x6c] sm:$0xf0] }
 0x2bc   :  { %5477 = vtanh.f32 %v7115_v2  ;;  %v1731_v63 = vmul.f32 %v5474_v29, %v1730_v32  ;;  %v1753_v61 = vmul.f32 %v5476_v20, %v1726_v7  ;;  %v5232_v32 = vld [vmem:[%s8450_s3 + $0xcc] sm:$0xf]  ;;  %v4579_v20 = vld [vmem:[%s8450_s3 + $0xb0] sm:$0xf0] }
 0x2bd   :  { %2374 = vmatpush.bf16.msrb.mxu0 %v4594_v4  ;;  %2388 = vmatpush.bf16.msrb.mxu1 %v4598_v50  ;;  %v4606_v31 = vor.u32 %v5232_v32, %v4603_v17  ;;  %v4582_v7 = vor.u32 %v5227_v11, %v4579_v20  ;;  %v414_v50 = vadd.f32 %v6125_v35, %v6334_v58  ;;  %v4553_v32 = vld [vmem:[%s8450_s3 + $0x68] sm:$0xf]  ;;  %v5222_v17 = vld [vmem:[%s8450_s3 + $0x74] sm:$0xf0]  ;;  %v4555_v35 = vld [vmem:[%s8450_s3 + $0x78] sm:$0xf0] }
 0x2be   :  { %v1732_v54 = vadd.f32 %v5474_v29, %v1731_v63  ;;  %v5229_v63 = vld [vmem:[%s8450_s3 + $0xac] sm:$0xf0]  ;;  %v4554_v20 = vor.u32 %v5222_v17, %v4553_v32  ;;  %v5216_v33 = vld [vmem:[%s8450_s3 + $0x4c] sm:$0xf] }
 0x2bf   :  { %2402 = vmatpush.bf16.msrb.mxu2 %v4602_v62  ;;  %v4578_v15 = vor.u32 %v5229_v63, %v4577_v56  ;;  %2416 = vmatpush.bf16.msrb.mxu3 %v4606_v31  ;;  %v465_v31 = vadd.f32 %v6135_v40, %v6263_v57  ;;  %v4546_v56 = vor.u32 %v5221_v1, %v4545_v19  ;;  %v5220_v63 = vld [vmem:[%s8450_s3 + $0x6c] sm:$0xf]  ;;  %v5217_v40 = vld [vmem:[%s8450_s3 + $0x4c] sm:$0xf0]  ;;  %v4513_v19 = vld [vmem:[%s8450_s3 + $0x20] sm:$0xf] }
 0x2c0   :  { %v1736_v9 = vsel %vm1735_vm5, %v5474_v29, %v1732_v54  ;;  %v463_v54 = vadd.f32 %v6127_v36, %v6263_v57  ;;  %v367_v36 = vadd.f32 %v6131_v38, %v6224_v59  ;;  %v4561_v38 = vld [vmem:[%s8450_s3 + $0x80] sm:$0xf]  ;;  %v5213_v1 = vld [vmem:[%s8450_s3 + $0x2c] sm:$0xf0] }
 0x2c1   :  { %v1741_v49 = vsel %vm1738_vm7, %v1740_v60, %v1736_v9  ;;  %v5230_v60 = vld [vmem:[%s8450_s3 + $0xb4] sm:$0xf0]  ;;  %2375 = vmatpush.bf16.msrb.mxu0 %v4578_v15  ;;  %2389 = vmatpush.bf16.msrb.mxu1 %v4582_v7 }
 0x2c2   :  { %v5478_v53 = vpop.eup %5477 }
 0x2c3   :  { %v1754_v24 = vmul.f32 %v5478_v53, %v1741_v49  ;;  %v318_v53 = vadd.f32 %v6129_v37, %v6199_v6  ;;  %v4586_v49 = vor.u32 %v5230_v60, %v4585_v48  ;;  %v4558_v48 = vor.u32 %v5220_v63, %v4555_v35  ;;  %v4529_v60 = vld [vmem:[%s8450_s3 + $0x40] sm:$0xf] }
 0x2c4   :  { %v4530_v7 = vor.u32 %v5217_v40, %v4529_v60  ;;  %v5214_v60 = vld [vmem:[%s8450_s3 + $0x34] sm:$0xf0]  ;;  %v5212_v40 = vld [vmem:[%s8450_s3 + $0x2c] sm:$0xf] }
 0x2c5   :  { %v5348_v28 = vpack.c.bf16 %v1754_v24, %v1753_v61  ;;  %v5228_v61 = vld [vmem:[%s8450_s3 + $0xac] sm:$0xf]  ;;  %v4587_v24 = vld [vmem:[%s8450_s3 + $0xb8] sm:$0xf0]  ;;  %2403 = vmatpush.bf16.msrb.mxu2 %v4586_v49  ;;  %v4531_v49 = vld [vmem:[%s8450_s3 + $0x50] sm:$0xf0] }
 0x2c6   :  { %v4590_v37 = vor.u32 %v5228_v61, %v4587_v24 }
 0x2c7   :  { %5376 = vst [vmem:[%s8453_s4 + $0x10] sm:$0xff] %v5348_v28   ;;  %1976 = vmatmul.bf16.vlgmr.msra.gmra.mxu0 %v5348_v28  ;;  %1990 = vmatmul.bf16.vlgmr.msra.gmra.mxu1 %v5348_v28 }
 0x2c8   :  { %2004 = vmatmul.bf16.vlgmr.msra.gmra.mxu2 %v5348_v28  ;;  %2018 = vmatmul.bf16.vlgmr.msra.gmra.mxu3 %v5348_v28 }
 0x2c9   :  { %2417 = vmatpush.bf16.msrb.mxu3 %v4590_v37 }
 0x2cd   :  { %2418 = vmatpush.bf16.msrb.mxu3 %v4574_v52  ;;  %v4539_v52 = vld [vmem:[%s8450_s3 + $0x58] sm:$0xf0] }
 0x2d1   :  { %2419 = vmatpush.bf16.msrb.mxu3 %v4558_v48  ;;  %v4514_v48 = vor.u32 %v5213_v1, %v4513_v19 }
 0x344   :  { %v1977_v55 = vpop.f32.mrf.mxu0  ;;  %v1991_v13 = vpop.f32.mrf.mxu1 }
 0x345   :  { %v2024_v25 = vadd.f32 %v1977_v55, %v316_v5  ;;  %v2025_v30 = vadd.f32 %v1991_v13, %v365_v21  ;;  %v4562_v5 = vor.u32 %v5225_v8, %v4561_v38  ;;  %v4563_v21 = vld [vmem:[%s8450_s3 + $0x90] sm:$0xf0]  ;;  %v5226_v13 = vld [vmem:[%s8450_s3 + $0x94] sm:$0xf0] }
 0x346   :  { %v4566_v55 = vor.u32 %v5223_v23, %v4563_v21 }
 0x347   :  { %v4487_v3 = vmul.f32 -1.442695, %v2024_v25  ;;  %v4489_v29 = vmul.f32 -1.442695, %v2025_v30  ;;  %2376 = vmatpush.bf16.msrb.mxu0 %v4562_v5  ;;  %v4570_v30 = vor.u32 %v5226_v13, %v4569_v43  ;;  %v5218_v13 = vld [vmem:[%s8450_s3 + $0x54] sm:$0xf0] }
 0x348   :  { %2390 = vmatpush.bf16.msrb.mxu1 %v4566_v55  ;;  %v4537_v55 = vld [vmem:[%s8450_s3 + $0x48] sm:$0xf] }
 0x349   :  { %5479 = vpow2.f32 %v4487_v3  ;;  %2404 = vmatpush.bf16.msrb.mxu2 %v4570_v30  ;;  %v5219_v3 = vld [vmem:[%s8450_s3 + $0x64] sm:$0xf] }
 0x34a   :  { %5481 = vpow2.f32 %v4489_v29  ;;  %v4547_v29 = vld [vmem:[%s8450_s3 + $0x70] sm:$0xf0] }
 0x34b   :  { %v2019_v9 = vpop.f32.mrf.mxu3  ;;  %v2005_v4 = vpop.f32.mrf.mxu2  ;;  %v4550_v15 = vor.u32 %v5219_v3, %v4547_v29  ;;  %2377 = vmatpush.bf16.msrb.mxu0 %v4546_v56 }
 0x34c   :  { %v2027_v28 = vadd.f32 %v2019_v9, %v463_v54  ;;  %v1979_v26 = vpop.f32.mrf.mxu0  ;;  %v1993_v10 = vpop.f32.mrf.mxu1  ;;  %v2026_v54 = vadd.f32 %v2005_v4, %v414_v50  ;;  %v5211_v50 = vld [vmem:[%s8450_s3 + $0x24] sm:$0xf] }
 0x34d   :  { %v2028_v27 = vadd.f32 %v1979_v26, %v318_v53  ;;  %v2029_v51 = vadd.f32 %v1993_v10, %v367_v36  ;;  %v5215_v53 = vld [vmem:[%s8450_s3 + $0x44] sm:$0xf]  ;;  %2391 = vmatpush.bf16.msrb.mxu1 %v4550_v15  ;;  %2405 = vmatpush.bf16.msrb.mxu2 %v4554_v20  ;;  %v4542_v20 = vor.u32 %v5216_v33, %v4539_v52 }
 0x34e   :  { %v4491_v16 = vmul.f32 -1.442695, %v2027_v28  ;;  %v4534_v10 = vor.u32 %v5215_v53, %v4531_v49  ;;  %v4523_v53 = vld [vmem:[%s8450_s3 + $0x38] sm:$0xf0] }
 0x34f   :  { %v5480_v22 = vpop.eup %5479  ;;  %v4488_v18 = vmul.f32 -1.442695, %v2028_v27  ;;  %v4490_v0 = vmul.f32 -1.442695, %v2029_v51  ;;  %v416_v27 = vadd.f32 %v6133_v39, %v6334_v58  ;;  %2378 = vmatpush.bf16.msrb.mxu0 %v4530_v7  ;;  %2420 = vmatpush.bf16.msrb.mxu3 %v4542_v20 }
 0x350   :  { %v5482_v12 = vpop.eup %5481  ;;  %v7228_v25 = vadd.f32 1.0, %v5480_v22  ;;  %5483 = vpow2.f32 %v4491_v16 }
 0x351   :  { %v7236_v14 = vadd.f32 1.0, %v5482_v12  ;;  %5485 = vpow2.f32 %v4488_v18  ;;  %2392 = vmatpush.bf16.msrb.mxu1 %v4534_v10  ;;  %v5207_v10 = vld [vmem:[%s8450_s3 + $0x4] sm:$0xf] }
 0x352   :  { %5487 = vrcp.f32 %v7228_v25  ;;  %v2049_v24 = vand.u32 2147483647, %v7228_v25  ;;  %v2051_v38 = vand.u32 2147483648, %v7228_v25  ;;  %vm2045_vm12 = vweird.f32 %v7228_v25 }
 0x353   :  { %5489 = vrcp.f32 %v7236_v14  ;;  %v2021_v62 = vpop.f32.mrf.mxu3  ;;  %v2089_v16 = vand.u32 2147483648, %v7236_v14  ;;  %v2087_v5 = vand.u32 2147483647, %v7236_v14  ;;  %v2007_v39 = vpop.f32.mrf.mxu2  ;;  %vm2083_vm11 = vweird.f32 %v7236_v14  ;;  %2379 = vmatpush.bf16.msrb.mxu0 %v4514_v48 }
 0x354   :  { %5491 = vpow2.f32 %v4490_v0  ;;  %v2031_v9 = vadd.f32 %v2021_v62, %v465_v31  ;;  %vm7302_vm9 = vcmp.eq.f32.partialorder %v2049_v24, 8.507059e+37  ;;  %v2052_v30 = vor.u32 1.1754944e-38, %v2051_v38  ;;  %v4515_v62 = vld [vmem:[%s8450_s3 + $0x30] sm:$0xf0]  ;;  %v5209_v24 = vld [vmem:[%s8450_s3 + $0xc] sm:$0xf0] }
 0x355   :  { %5493 = vtanh.f32 %v2026_v54  ;;  %v2030_v4 = vadd.f32 %v2007_v39, %v416_v27  ;;  %v2090_v3 = vor.u32 1.1754944e-38, %v2089_v16  ;;  %vm7351_vm15 = vcmp.eq.f32.partialorder %v2087_v5, 8.507059e+37  ;;  %v5210_v16 = vld [vmem:[%s8450_s3 + $0x14] sm:$0xf0]  ;;  %v4507_v0 = vld [vmem:[%s8450_s3 + $0x18] sm:$0xf0] }
 0x356   :  { %v5484_v11 = vpop.eup %5483  ;;  %v4492_v22 = vmul.f32 -1.442695, %v2031_v9  ;;  %v4518_v38 = vor.u32 %v5211_v50, %v4515_v62 }
 0x357   :  { %v5486_v36 = vpop.eup %5485  ;;  %v7283_v28 = vadd.f32 1.0, %v5484_v11  ;;  %v4521_v11 = vld [vmem:[%s8450_s3 + $0x28] sm:$0xf] }
 0x358   :  { %v7280_v61 = vpop.eup %5487  ;;  %v7285_v26 = vadd.f32 1.0, %v5486_v36  ;;  %2393 = vmatpush.bf16.msrb.mxu1 %v4518_v38 }
 0x359   :  { %v7287_v37 = vpop.eup %5489  ;;  %v2041_v51 = vmul.f32 %v7280_v61, %v7228_v25  ;;  %vm2046_vm8 = vweird.f32 %v7280_v61 }
 0x35a   :  { %v5492_v8 = vpop.eup %5491  ;;  %v2079_v23 = vmul.f32 %v7287_v37, %v7236_v14  ;;  %5495 = vrcp.f32 %v7285_v26  ;;  %vm2084_vm10 = vweird.f32 %v7287_v37  ;;  %vm7334_vm13 = vmor %vm2045_vm12, %vm2046_vm8  ;;  %v4538_v14 = vor.u32 %v5218_v13, %v4537_v55 }
 0x35b   :  { %v2042_v21 = vsub.f32 1.0, %v2041_v51  ;;  %v7299_v43 = vadd.f32 1.0, %v5492_v8  ;;  %5497 = vrcp.f32 %v7283_v28  ;;  %v5494_v32 = vpop.eup %5493  ;;  %vm7346_vm14 = vmor %vm2083_vm11, %vm2084_vm10  ;;  %v2064_v35 = vand.u32 2147483647, %v7285_v26  ;;  %v4499_v8 = vld [vmem:[%s8450_s3 + $0x10] sm:$0xf0] }
 0x35c   :  { %v2080_v18 = vsub.f32 1.0, %v2079_v23  ;;  %2406 = vmatpush.bf16.msrb.mxu2 %v4538_v14  ;;  %vm2060_vm0 = vweird.f32 %v7285_v26  ;;  %v4505_v23 = vld [vmem:[%s8450_s3 + $0x8] sm:$0xf]  ;;  %v4502_v19 = vor.u32 %v5207_v10, %v4499_v8 }
 0x35d   :  { %v2043_v12 = vmul.f32 %v7280_v61, %v2042_v21  ;;  %5499 = vrcp.f32 %v7299_v43  ;;  %v2104_v63 = vand.u32 2147483648, %v7299_v43  ;;  %v4506_v1 = vor.u32 %v5210_v16, %v4505_v23 }
 0x35e   :  { %v2081_v34 = vmul.f32 %v7287_v37, %v2080_v18  ;;  %5501 = vpow2.f32 %v4492_v22  ;;  %v2066_v22 = vand.u32 2147483648, %v7285_v26  ;;  %v5208_v18 = vld [vmem:[%s8450_s3 + $0xc] sm:$0xf]  ;;  %v2102_v50 = vand.u32 2147483647, %v7299_v43  ;;  %2394 = vmatpush.bf16.msrb.mxu1 %v4502_v19 }
 0x35f   :  { %v2044_v29 = vadd.f32 %v7280_v61, %v2043_v12  ;;  %5503 = vtanh.f32 %v2030_v4  ;;  %v4522_v12 = vor.u32 %v5214_v60, %v4521_v11  ;;  %vm2098_vm3 = vweird.f32 %v7299_v43 }
 0x360   :  { %v2082_v31 = vadd.f32 %v7287_v37, %v2081_v34  ;;  %v7360_v54 = vpop.eup %5495  ;;  %v2067_v62 = vor.u32 1.1754944e-38, %v2066_v22  ;;  %vm2065_vm5 = vcmp.eq.f32.partialorder %v2064_v35, 8.507059e+37  ;;  %v2105_v56 = vor.u32 1.1754944e-38, %v2104_v63 }
 0x361   :  { %v2048_v15 = vsel %vm7334_vm13, %v7280_v61, %v2044_v29  ;;  %v7374_v36 = vpop.eup %5497  ;;  %v2056_v49 = vmul.f32 %v7360_v54, %v7285_v26  ;;  %v4497_v61 = vld [vmem:[%s8450_s3] sm:$0xf]  ;;  %vm2061_vm1 = vweird.f32 %v7360_v54  ;;  %2407 = vmatpush.bf16.msrb.mxu2 %v4522_v12  ;;  %vm2103_vm7 = vcmp.eq.f32.partialorder %v2102_v50, 8.507059e+37  ;;  %v4731_v50 = vld [vmem:[%s8450_s3 + $0xd0] sm:$0xf0] }
 0x362   :  { %v2053_v9 = vsel %vm7302_vm9, %v2052_v30, %v2048_v15  ;;  %v2086_v7 = vsel %vm7346_vm14, %v7287_v37, %v2082_v31  ;;  %v2119_v13 = vmul.f32 %v7374_v36, %v7283_v28  ;;  %v4498_v30 = vor.u32 %v5209_v24, %v4497_v61  ;;  %vm2062_vm4 = vmor %vm2060_vm0, %vm2061_vm1 }
 0x363   :  { %v5500_v27 = vpop.eup %5499  ;;  %v2091_v37 = vsel %vm7351_vm15, %v2090_v3, %v2086_v7  ;;  %v2152_v51 = vmul.f32 %v5494_v32, %v2053_v9  ;;  %v2057_v21 = vsub.f32 1.0, %v2056_v49  ;;  %v4510_v3 = vor.u32 %v5208_v18, %v4507_v0  ;;  %v4747_v18 = vld [vmem:[%s8450_s3 + $0xf0] sm:$0xf0]  ;;  %v4753_v0 = vld [vmem:[%s8450_s3 + $0xe8] sm:$0xf] }
 0x364   :  { %v2150_v5 = vmul.f32 %v2091_v37, %v7099_v47  ;;  %v2094_v39 = vmul.f32 %v5500_v27, %v7299_v43  ;;  %v5502_v55 = vpop.eup %5501  ;;  %v4526_v47 = vor.u32 %v5212_v40, %v4523_v53  ;;  %vm2099_vm2 = vweird.f32 %v5500_v27  ;;  %2380 = vmatpush.bf16.msrb.mxu0 %v4498_v30 }
 0x365   :  { %v2058_v4 = vmul.f32 %v7360_v54, %v2057_v21  ;;  %v2117_v52 = vadd.f32 1.0, %v5502_v55  ;;  %v5504_v29 = vpop.eup %5503  ;;  %v2120_v32 = vsub.f32 1.0, %v2119_v13  ;;  %vm2100_vm6 = vmor %vm2098_vm3, %vm2099_vm2  ;;  %2408 = vmatpush.bf16.msrb.mxu2 %v4506_v1  ;;  %vm2124_vm8 = vweird.f32 %v7374_v36  ;;  %v5269_v21 = vld [vmem:[%s8450_s3 + $0xec] sm:$0xf0]  ;;  %v5270_v55 = vld [vmem:[%s8450_s3 + $0xf4] sm:$0xf0] }
 0x366   :  { %v7415_v33 = vadd.f32 %v2152_v51, %v2150_v5  ;;  %v2095_v34 = vsub.f32 1.0, %v2094_v39  ;;  %2421 = vmatpush.bf16.msrb.mxu3 %v4526_v47  ;;  %vm2123_vm9 = vweird.f32 %v7283_v28  ;;  %v2129_v35 = vand.u32 2147483648, %v7283_v28  ;;  %v5267_v39 = vld [vmem:[%s8450_s3 + $0xe4] sm:$0xf] }
 0x367   :  { %v2059_v14 = vadd.f32 %v7360_v54, %v2058_v4  ;;  %5505 = vrcp.f32 %v2117_v52  ;;  %v2121_v60 = vmul.f32 %v7374_v36, %v2120_v32  ;;  %v2144_v9 = vand.u32 2147483648, %v2117_v52  ;;  %vm2125_vm11 = vmor %vm2123_vm9, %vm2124_vm8  ;;  %v4755_v4 = vld [vmem:[%s8450_s3 + $0xf8] sm:$0xf0]  ;;  %v5266_v32 = vld [vmem:[%s8450_s3 + $0xd4] sm:$0xf0] }
 0x368   :  { %v2096_v25 = vmul.f32 %v5500_v27, %v2095_v34  ;;  %5507 = vtanh.f32 %v7415_v33  ;;  %v2142_v49 = vand.u32 2147483647, %v2117_v52  ;;  %vm2138_vm12 = vweird.f32 %v2117_v52  ;;  %v5268_v34 = vld [vmem:[%s8450_s3 + $0xec] sm:$0xf] }
 0x369   :  { %v2063_v17 = vsel %vm2062_vm4, %v7360_v54, %v2059_v14  ;;  %v2122_v43 = vadd.f32 %v7374_v36, %v2121_v60  ;;  %v2145_v37 = vor.u32 1.1754944e-38, %v2144_v9  ;;  %v321_v13 = vadd.f32 %v6137_v41, %v6199_v6  ;;  %v4729_v41 = vld [vmem:[%s8450_s3 + $0xc0] sm:$0xf]  ;;  %v5262_v9 = vld [vmem:[%s8450_s3 + $0xb4] sm:$0xf0] }
 0x36a   :  { %v2097_v31 = vadd.f32 %v5500_v27, %v2096_v25  ;;  %v2068_v11 = vsel %vm2065_vm5, %v2067_v62, %v2063_v17  ;;  %2422 = vmatpush.bf16.msrb.mxu3 %v4510_v3  ;;  %vm2143_vm15 = vcmp.eq.f32.partialorder %v2142_v49, 8.507059e+37  ;;  %v370_v12 = vadd.f32 %v6139_v42, %v6224_v59  ;;  %v5265_v42 = vld [vmem:[%s8450_s3 + $0xcc] sm:$0xf0]  ;;  %v5263_v25 = vld [vmem:[%s8450_s3 + $0xc4] sm:$0xf] }
 0x36b   :  { %v2153_v20 = vmul.f32 %v5504_v29, %v2068_v11  ;;  %v2126_v24 = vsel %vm2125_vm11, %v7374_v36, %v2122_v43  ;;  %v4745_v36 = vld [vmem:[%s8450_s3 + $0xe0] sm:$0xf]  ;;  %v4750_v47 = vor.u32 %v5267_v39, %v4747_v18  ;;  %v4754_v30 = vor.u32 %v5270_v55, %v4753_v0  ;;  %v4737_v62 = vld [vmem:[%s8450_s3 + $0xc8] sm:$0xf]  ;;  %v5258_v55 = vld [vmem:[%s8450_s3 + $0x94] sm:$0xf0] }
 0x36c   :  { %v2101_v15 = vsel %vm2100_vm6, %v5500_v27, %v2097_v31  ;;  %v2130_v27 = vor.u32 1.1754944e-38, %v2129_v35  ;;  %v4746_v22 = vor.u32 %v5269_v21, %v4745_v36  ;;  %v4758_v1 = vor.u32 %v5268_v34, %v4755_v4  ;;  %v4713_v60 = vld [vmem:[%s8450_s3 + $0xa0] sm:$0xf]  ;;  %v4721_v35 = vld [vmem:[%s8450_s3 + $0xa8] sm:$0xf] }
 0x36d   :  { %v2106_v48 = vsel %vm2103_vm7, %v2105_v56, %v2101_v15  ;;  %v5506_v54 = vpop.eup %5505  ;;  %2792 = vmatpush.bf16.msra.mxu1 %v4750_v47  ;;  %2806 = vmatpush.bf16.msra.mxu2 %v4754_v30  ;;  %v4730_v14 = vor.u32 %v5265_v42, %v4729_v41  ;;  %v4734_v56 = vor.u32 %v5263_v25, %v4731_v50  ;;  %v5264_v15 = vld [vmem:[%s8450_s3 + $0xcc] sm:$0xf]  ;;  %v4699_v36 = vld [vmem:[%s8450_s3 + $0x90] sm:$0xf0]  ;;  %v4705_v21 = vld [vmem:[%s8450_s3 + $0x88] sm:$0xf] }
 0x36e   :  { %v2151_v40 = vmul.f32 %v2106_v48, %v7115_v2  ;;  %v2134_v26 = vmul.f32 %v5506_v54, %v2117_v52  ;;  %v2127_v2 = vand.u32 2147483647, %v7283_v28  ;;  %vm2139_vm10 = vweird.f32 %v5506_v54  ;;  %v5508_v10 = vpop.eup %5507  ;;  %2778 = vmatpush.bf16.msra.mxu0 %v4746_v22  ;;  %2820 = vmatpush.bf16.msra.mxu3 %v4758_v1  ;;  %v5256_v30 = vld [vmem:[%s8450_s3 + $0x8c] sm:$0xf]  ;;  %v4707_v34 = vld [vmem:[%s8450_s3 + $0x98] sm:$0xf0] }
 0x36f   :  { %vm2140_vm13 = vmor %vm2138_vm12, %vm2139_vm10  ;;  %v4738_v11 = vor.u32 %v5266_v32, %v4737_v62  ;;  %v4706_v47 = vor.u32 %v5258_v55, %v4705_v21  ;;  %v4681_v1 = vld [vmem:[%s8450_s3 + $0x60] sm:$0xf]  ;;  %v4683_v41 = vld [vmem:[%s8450_s3 + $0x70] sm:$0xf0] }
 0x370   :  { %v7431_v53 = vadd.f32 %v2153_v20, %v2151_v40  ;;  %v2135_v63 = vsub.f32 1.0, %v2134_v26  ;;  %vm2128_vm14 = vcmp.eq.f32.partialorder %v2127_v2, 8.507059e+37  ;;  %v4739_v20 = vld [vmem:[%s8450_s3 + $0xd8] sm:$0xf0]  ;;  %v5261_v40 = vld [vmem:[%s8450_s3 + $0xac] sm:$0xf0]  ;;  %v468_v26 = vadd.f32 %v6143_v44, %v6263_v57 }
 0x371   :  { %v2131_v8 = vsel %vm2128_vm14, %v2130_v27, %v2126_v24  ;;  %2793 = vmatpush.bf16.msra.mxu1 %v4734_v56  ;;  %2807 = vmatpush.bf16.msra.mxu2 %v4738_v11  ;;  %v4742_v48 = vor.u32 %v5264_v15, %v4739_v20  ;;  %v4714_v43 = vor.u32 %v5261_v40, %v4713_v60  ;;  %v5260_v24 = vld [vmem:[%s8450_s3 + $0xac] sm:$0xf]  ;;  %v8507_v42 = vld [vmem:[#allocation5_spill] sm:$0xff]  ;;  %v4689_v50 = vld [vmem:[%s8450_s3 + $0x68] sm:$0xf] }
 0x372   :  { %5509 = vtanh.f32 %v7431_v53  ;;  %v2136_v7 = vmul.f32 %v5506_v54, %v2135_v63  ;;  %v2158_v16 = vmul.f32 %v5508_v10, %v2131_v8  ;;  %2779 = vmatpush.bf16.msra.mxu0 %v4730_v14  ;;  %v4715_v63 = vld [vmem:[%s8450_s3 + $0xb0] sm:$0xf0]  ;;  %v323_v2 = vadd.f32 %v6145_v45, %v6199_v6  ;;  %v4723_v10 = vld [vmem:[%s8450_s3 + $0xb8] sm:$0xf0]  ;;  %v5254_v62 = vld [vmem:[%s8450_s3 + $0x74] sm:$0xf0] }
 0x373   :  { %v372_v44 = vadd.f32 %v6147_v46, %v6224_v59  ;;  %2821 = vmatpush.bf16.msra.mxu3 %v4742_v48  ;;  %v4726_v45 = vor.u32 %v5260_v24, %v4723_v10  ;;  %v4697_v46 = vld [vmem:[%s8450_s3 + $0x80] sm:$0xf]  ;;  %v419_v25 = vadd.f32 %v8507_v42, %v6334_v58  ;;  %v8508_v32 = vld [vmem:[#allocation7_spill] sm:$0xff]  ;;  %v5252_v56 = vld [vmem:[%s8450_s3 + $0x6c] sm:$0xf]  ;;  %v4690_v60 = vor.u32 %v5254_v62, %v4689_v50 }
 0x374   :  { %v2137_v61 = vadd.f32 %v5506_v54, %v2136_v7  ;;  %v4691_v11 = vld [vmem:[%s8450_s3 + $0x78] sm:$0xf0] }
 0x375   :  { %v4694_v40 = vor.u32 %v5252_v56, %v4691_v11 }
 0x376   :  { %v2141_v38 = vsel %vm2140_vm13, %v5506_v54, %v2137_v61  ;;  %v5259_v54 = vld [vmem:[%s8450_s3 + $0xa4] sm:$0xf]  ;;  %v4722_v61 = vor.u32 %v5262_v9, %v4721_v35  ;;  %2780 = vmatpush.bf16.msra.mxu0 %v4714_v43 }
 0x377   :  { %v2146_v23 = vsel %vm2143_vm15, %v2145_v37, %v2141_v38  ;;  %v4718_v49 = vor.u32 %v5259_v54, %v4715_v63  ;;  %2822 = vmatpush.bf16.msra.mxu3 %v4726_v45  ;;  %v4665_v54 = vld [vmem:[%s8450_s3 + $0x40] sm:$0xf]  ;;  %v5247_v43 = vld [vmem:[%s8450_s3 + $0x44] sm:$0xf] }
 0x378   :  { %v5510_v51 = vpop.eup %5509  ;;  %2808 = vmatpush.bf16.msra.mxu2 %v4722_v61 }
 0x379   :  { %v2159_v28 = vmul.f32 %v5510_v51, %v2146_v23  ;;  %2794 = vmatpush.bf16.msra.mxu1 %v4718_v49  ;;  %v5257_v23 = vld [vmem:[%s8450_s3 + $0x8c] sm:$0xf0] }
 0x37b   :  { %v5353_v5 = vpack.c.bf16 %v2159_v28, %v2158_v16  ;;  %v5255_v16 = vld [vmem:[%s8450_s3 + $0x84] sm:$0xf] }
 0x37c   :  { %v4702_v0 = vor.u32 %v5255_v16, %v4699_v36  ;;  %2809 = vmatpush.bf16.msra.mxu2 %v4706_v47 }
 0x37d   :  { %5377 = vst [vmem:[%s8453_s4 + $0x18] sm:$0xff] %v5353_v5   ;;  %2381 = vmatmul.bf16.vlgmr.msrb.gmra.mxu0 %v5353_v5  ;;  %2395 = vmatmul.bf16.vlgmr.msrb.gmra.mxu1 %v5353_v5 }
 0x37e   :  { %2409 = vmatmul.bf16.vlgmr.msrb.gmra.mxu2 %v5353_v5  ;;  %2423 = vmatmul.bf16.vlgmr.msrb.gmra.mxu3 %v5353_v5  ;;  %v4698_v5 = vor.u32 %v5257_v23, %v4697_v46 }
 0x37f   :  { %2795 = vmatpush.bf16.msra.mxu1 %v4702_v0 }
 0x380   :  { %2781 = vmatpush.bf16.msra.mxu0 %v4698_v5  ;;  %2810 = vmatpush.bf16.msra.mxu2 %v4690_v60  ;;  %v4659_v60 = vld [vmem:[%s8450_s3 + $0x38] sm:$0xf0] }
 0x3fa   :  { %v2382_v52 = vpop.f32.mrf.mxu0  ;;  %v2396_v19 = vpop.f32.mrf.mxu1 }
 0x3fb   :  { %v2429_v3 = vadd.f32 %v2382_v52, %v321_v13  ;;  %v2430_v29 = vadd.f32 %v2396_v19, %v370_v12  ;;  %v4710_v19 = vor.u32 %v5256_v30, %v4707_v34  ;;  %v4675_v34 = vld [vmem:[%s8450_s3 + $0x58] sm:$0xf0] }
 0x3fd   :  { %v4623_v17 = vmul.f32 -1.442695, %v2429_v3  ;;  %v4625_v31 = vmul.f32 -1.442695, %v2430_v29  ;;  %v5253_v3 = vld [vmem:[%s8450_s3 + $0x6c] sm:$0xf0]  ;;  %2823 = vmatpush.bf16.msra.mxu3 %v4710_v19 }
 0x3fe   :  { %v5251_v29 = vld [vmem:[%s8450_s3 + $0x64] sm:$0xf]  ;;  %v5245_v19 = vld [vmem:[%s8450_s3 + $0x2c] sm:$0xf0] }
 0x3ff   :  { %5511 = vpow2.f32 %v4623_v17  ;;  %v470_v17 = vadd.f32 %v8508_v32, %v6263_v57  ;;  %v4686_v48 = vor.u32 %v5251_v29, %v4683_v41  ;;  %v5243_v29 = vld [vmem:[%s8450_s3 + $0x24] sm:$0xf]  ;;  %v4651_v41 = vld [vmem:[%s8450_s3 + $0x30] sm:$0xf0] }
 0x400   :  { %5513 = vpow2.f32 %v4625_v31  ;;  %v4682_v31 = vor.u32 %v5253_v3, %v4681_v1 }
 0x401   :  { %v2424_v7 = vpop.f32.mrf.mxu3  ;;  %v2410_v52 = vpop.f32.mrf.mxu2  ;;  %2796 = vmatpush.bf16.msra.mxu1 %v4686_v48  ;;  %2824 = vmatpush.bf16.msra.mxu3 %v4694_v40  ;;  %v5244_v48 = vld [vmem:[%s8450_s3 + $0x2c] sm:$0xf] }
 0x402   :  { %v2432_v27 = vadd.f32 %v2424_v7, %v468_v26  ;;  %v2384_v37 = vpop.f32.mrf.mxu0  ;;  %v2398_v51 = vpop.f32.mrf.mxu1  ;;  %v2431_v20 = vadd.f32 %v2410_v52, %v419_v25  ;;  %v5249_v26 = vld [vmem:[%s8450_s3 + $0x4c] sm:$0xf0]  ;;  %2782 = vmatpush.bf16.msra.mxu0 %v4682_v31  ;;  %v4649_v52 = vld [vmem:[%s8450_s3 + $0x20] sm:$0xf] }
 0x403   :  { %v2433_v38 = vadd.f32 %v2384_v37, %v323_v2  ;;  %v2434_v8 = vadd.f32 %v2398_v51, %v372_v44  ;;  %v4666_v9 = vor.u32 %v5249_v26, %v4665_v54  ;;  %v4667_v2 = vld [vmem:[%s8450_s3 + $0x50] sm:$0xf0] }
 0x404   :  { %v4627_v28 = vmul.f32 -1.442695, %v2432_v27  ;;  %v4670_v24 = vor.u32 %v5247_v43, %v4667_v2  ;;  %v8509_v27 = vld [vmem:[#allocation6_spill] sm:$0xff] }
 0x405   :  { %v5512_v39 = vpop.eup %5511  ;;  %v4624_v22 = vmul.f32 -1.442695, %v2433_v38  ;;  %v4626_v18 = vmul.f32 -1.442695, %v2434_v8  ;;  %v421_v37 = vadd.f32 %v8509_v27, %v6334_v58  ;;  %v4641_v27 = vld [vmem:[%s8450_s3 + $0x8] sm:$0xf] }
 0x406   :  { %v5514_v13 = vpop.eup %5513  ;;  %v7544_v12 = vadd.f32 1.0, %v5512_v39  ;;  %5515 = vpow2.f32 %v4627_v28  ;;  %2783 = vmatpush.bf16.msra.mxu0 %v4666_v9  ;;  %2797 = vmatpush.bf16.msra.mxu1 %v4670_v24  ;;  %v5239_v9 = vld [vmem:[%s8450_s3 + $0x4] sm:$0xf]  ;;  %v4654_v24 = vor.u32 %v5243_v29, %v4651_v41 }
 0x407   :  { %v7552_v4 = vadd.f32 1.0, %v5514_v13  ;;  %5517 = vpow2.f32 %v4624_v22  ;;  %v4673_v22 = vld [vmem:[%s8450_s3 + $0x48] sm:$0xf]  ;;  %v5248_v13 = vld [vmem:[%s8450_s3 + $0x4c] sm:$0xf] }
 0x408   :  { %5519 = vrcp.f32 %v7544_v12  ;;  %v2454_v7 = vand.u32 2147483647, %v7544_v12  ;;  %v2456_v45 = vand.u32 2147483648, %v7544_v12  ;;  %vm2450_vm4 = vweird.f32 %v7544_v12 }
 0x409   :  { %5521 = vrcp.f32 %v7552_v4  ;;  %v2426_v14 = vpop.f32.mrf.mxu3  ;;  %v2494_v46 = vand.u32 2147483648, %v7552_v4  ;;  %v2492_v23 = vand.u32 2147483647, %v7552_v4  ;;  %v2412_v5 = vpop.f32.mrf.mxu2  ;;  %vm2488_vm3 = vweird.f32 %v7552_v4 }
 0x40a   :  { %5523 = vpow2.f32 %v4626_v18  ;;  %v2436_v35 = vadd.f32 %v2426_v14, %v470_v17  ;;  %vm7618_vm1 = vcmp.eq.f32.partialorder %v2454_v7, 8.507059e+37  ;;  %v5250_v18 = vld [vmem:[%s8450_s3 + $0x54] sm:$0xf0]  ;;  %v2457_v55 = vor.u32 1.1754944e-38, %v2456_v45  ;;  %v4657_v17 = vld [vmem:[%s8450_s3 + $0x28] sm:$0xf]  ;;  %2798 = vmatpush.bf16.msra.mxu1 %v4654_v24 }
 0x40b   :  { %5525 = vtanh.f32 %v2431_v20  ;;  %v2435_v30 = vadd.f32 %v2412_v5, %v421_v37  ;;  %v2495_v1 = vor.u32 1.1754944e-38, %v2494_v46  ;;  %vm7667_vm7 = vcmp.eq.f32.partialorder %v2492_v23, 8.507059e+37  ;;  %v5246_v20 = vld [vmem:[%s8450_s3 + $0x34] sm:$0xf0]  ;;  %v5240_v46 = vld [vmem:[%s8450_s3 + $0xc] sm:$0xf] }
 0x40c   :  { %v5516_v15 = vpop.eup %5515  ;;  %v4628_v36 = vmul.f32 -1.442695, %v2436_v35  ;;  %v4678_v11 = vor.u32 %v5248_v13, %v4675_v34  ;;  %v5241_v35 = vld [vmem:[%s8450_s3 + $0xc] sm:$0xf0]  ;;  %v5242_v37 = vld [vmem:[%s8450_s3 + $0x14] sm:$0xf0] }
 0x40d   :  { %v5518_v63 = vpop.eup %5517  ;;  %v7599_v49 = vadd.f32 1.0, %v5516_v15  ;;  %v4650_v15 = vor.u32 %v5245_v19, %v4649_v52  ;;  %v4643_v23 = vld [vmem:[%s8450_s3 + $0x18] sm:$0xf0]  ;;  %v4642_v13 = vor.u32 %v5242_v37, %v4641_v27  ;;  %v5301_v24 = vld [vmem:[%s8450_s3 + $0xec] sm:$0xf0] }
 0x40e   :  { %v7596_v44 = vpop.eup %5519  ;;  %v7601_v61 = vadd.f32 1.0, %v5518_v63  ;;  %v4633_v63 = vld [vmem:[%s8450_s3] sm:$0xf]  ;;  %2825 = vmatpush.bf16.msra.mxu3 %v4678_v11  ;;  %v4883_v37 = vld [vmem:[%s8450_s3 + $0xf0] sm:$0xf0] }
 0x40f   :  { %v7603_v10 = vpop.eup %5521  ;;  %v2446_v51 = vmul.f32 %v7596_v44, %v7544_v12  ;;  %vm2451_vm0 = vweird.f32 %v7596_v44  ;;  %2784 = vmatpush.bf16.msra.mxu0 %v4650_v15 }
 0x410   :  { %v5524_v38 = vpop.eup %5523  ;;  %v2484_v8 = vmul.f32 %v7603_v10, %v7552_v4  ;;  %5527 = vrcp.f32 %v7601_v61  ;;  %vm2489_vm2 = vweird.f32 %v7603_v10  ;;  %vm7650_vm5 = vmor %vm2450_vm4, %vm2451_vm0  ;;  %v4674_v4 = vor.u32 %v5250_v18, %v4673_v22 }
 0x411   :  { %v2447_v16 = vsub.f32 1.0, %v2446_v51  ;;  %v7615_v28 = vadd.f32 1.0, %v5524_v38  ;;  %5529 = vrcp.f32 %v7599_v49  ;;  %v5526_v42 = vpop.eup %5525  ;;  %vm7662_vm6 = vmor %vm2488_vm3, %vm2489_vm2  ;;  %v2469_v32 = vand.u32 2147483647, %v7601_v61 }
 0x412   :  { %v2485_v21 = vsub.f32 1.0, %v2484_v8  ;;  %2811 = vmatpush.bf16.msra.mxu2 %v4674_v4  ;;  %vm2465_vm8 = vweird.f32 %v7601_v61  ;;  %v2471_v8 = vand.u32 2147483648, %v7601_v61 }
 0x413   :  { %v2448_v0 = vmul.f32 %v7596_v44, %v2447_v16  ;;  %5531 = vrcp.f32 %v7615_v28  ;;  %v2509_v62 = vand.u32 2147483648, %v7615_v28  ;;  %v2507_v19 = vand.u32 2147483647, %v7615_v28 }
 0x414   :  { %v2486_v47 = vmul.f32 %v7603_v10, %v2485_v21  ;;  %5533 = vpow2.f32 %v4628_v36  ;;  %v4658_v36 = vor.u32 %v5246_v20, %v4657_v17  ;;  %v4634_v21 = vor.u32 %v5241_v35, %v4633_v63 }
 0x415   :  { %v2449_v3 = vadd.f32 %v7596_v44, %v2448_v0  ;;  %5535 = vtanh.f32 %v2435_v30  ;;  %vm2503_vm11 = vweird.f32 %v7615_v28  ;;  %vm2470_vm13 = vcmp.eq.f32.partialorder %v2469_v32, 8.507059e+37 }
 0x416   :  { %v2487_v14 = vadd.f32 %v7603_v10, %v2486_v47  ;;  %v7676_v31 = vpop.eup %5527  ;;  %2812 = vmatpush.bf16.msra.mxu2 %v4658_v36  ;;  %v4646_v47 = vor.u32 %v5240_v46, %v4643_v23  ;;  %2785 = vmatpush.bf16.msra.mxu0 %v4634_v21  ;;  %v2510_v29 = vor.u32 1.1754944e-38, %v2509_v62  ;;  %vm2508_vm15 = vcmp.eq.f32.partialorder %v2507_v19, 8.507059e+37  ;;  %v8519_v46 = vld [vmem:[#allocation9_spill] sm:$0xff]  ;;  %v5300_v36 = vld [vmem:[%s8450_s3 + $0xec] sm:$0xf] }
 0x417   :  { %v2453_v56 = vsel %vm7650_vm5, %v7596_v44, %v2449_v3  ;;  %v7690_v40 = vpop.eup %5529  ;;  %v2461_v43 = vmul.f32 %v7676_v31, %v7601_v61  ;;  %vm2466_vm9 = vweird.f32 %v7676_v31  ;;  %v2534_v32 = vand.u32 2147483648, %v7599_v49  ;;  %v4873_v19 = vld [vmem:[%s8450_s3 + $0xc8] sm:$0xf] }
 0x418   :  { %v2458_v54 = vsel %vm7618_vm1, %v2457_v55, %v2453_v56  ;;  %v2491_v26 = vsel %vm7662_vm6, %v7603_v10, %v2487_v14  ;;  %v4635_v10 = vld [vmem:[%s8450_s3 + $0x10] sm:$0xf0]  ;;  %v2524_v5 = vmul.f32 %v7690_v40, %v7599_v49  ;;  %vm2467_vm12 = vmor %vm2465_vm8, %vm2466_vm9  ;;  %vm2529_vm0 = vweird.f32 %v7690_v40 }
 0x419   :  { %v5532_v2 = vpop.eup %5531  ;;  %v2496_v44 = vsel %vm7667_vm7, %v2495_v1, %v2491_v26  ;;  %v2557_v7 = vmul.f32 %v5526_v42, %v2458_v54  ;;  %v2462_v45 = vsub.f32 1.0, %v2461_v43  ;;  %v4638_v55 = vor.u32 %v5239_v9, %v4635_v10  ;;  %v5299_v10 = vld [vmem:[%s8450_s3 + $0xe4] sm:$0xf] }
 0x41a   :  { %v2555_v51 = vmul.f32 %v2496_v44, %v7415_v33  ;;  %v2499_v38 = vmul.f32 %v5532_v2, %v7615_v28  ;;  %v5534_v16 = vpop.eup %5533  ;;  %v4662_v33 = vor.u32 %v5244_v48, %v4659_v60  ;;  %vm2504_vm10 = vweird.f32 %v5532_v2  ;;  %2813 = vmatpush.bf16.msra.mxu2 %v4642_v13  ;;  %v4865_v13 = vld [vmem:[%s8450_s3 + $0xc0] sm:$0xf] }
 0x41b   :  { %v2463_v18 = vmul.f32 %v7676_v31, %v2462_v45  ;;  %v2522_v0 = vadd.f32 1.0, %v5534_v16  ;;  %v5536_v30 = vpop.eup %5535  ;;  %v2472_v1 = vor.u32 1.1754944e-38, %v2471_v8  ;;  %2799 = vmatpush.bf16.msra.mxu1 %v4638_v55  ;;  %v2525_v3 = vsub.f32 1.0, %v2524_v5  ;;  %vm2505_vm14 = vmor %vm2503_vm11, %vm2504_vm10  ;;  %v5302_v45 = vld [vmem:[%s8450_s3 + $0xf4] sm:$0xf0] }
 0x41c   :  { %v7731_v39 = vadd.f32 %v2557_v7, %v2555_v51  ;;  %v2500_v22 = vsub.f32 1.0, %v2499_v38  ;;  %2826 = vmatpush.bf16.msra.mxu3 %v4662_v33  ;;  %vm2528_vm1 = vweird.f32 %v7599_v49  ;;  %v2535_v26 = vor.u32 1.1754944e-38, %v2534_v32  ;;  %v4889_v51 = vld [vmem:[%s8450_s3 + $0xe8] sm:$0xf]  ;;  %v8518_v38 = vld [vmem:[#allocation8_spill] sm:$0xff] }
 0x41d   :  { %v2464_v52 = vadd.f32 %v7676_v31, %v2463_v18  ;;  %5537 = vrcp.f32 %v2522_v0  ;;  %v2526_v50 = vmul.f32 %v7690_v40, %v2525_v3  ;;  %v2549_v11 = vand.u32 2147483648, %v2522_v0  ;;  %vm2530_vm3 = vmor %vm2528_vm1, %vm2529_vm0  ;;  %v4891_v33 = vld [vmem:[%s8450_s3 + $0xf8] sm:$0xf0]  ;;  %v4857_v32 = vld [vmem:[%s8450_s3 + $0xa8] sm:$0xf] }
 0x41e   :  { %v2501_v34 = vmul.f32 %v5532_v2, %v2500_v22  ;;  %5539 = vtanh.f32 %v7731_v39  ;;  %v2547_v20 = vand.u32 2147483647, %v2522_v0  ;;  %vm2543_vm4 = vweird.f32 %v2522_v0 }
 0x41f   :  { %v2468_v12 = vsel %vm2467_vm12, %v7676_v31, %v2464_v52  ;;  %v2527_v28 = vadd.f32 %v7690_v40, %v2526_v50  ;;  %v2550_v43 = vor.u32 1.1754944e-38, %v2549_v11  ;;  %v326_v8 = vadd.f32 %v8518_v38, %v6199_v6  ;;  %v4867_v52 = vld [vmem:[%s8450_s3 + $0xd0] sm:$0xf0]  ;;  %v5293_v50 = vld [vmem:[%s8450_s3 + $0xac] sm:$0xf0] }
 0x420   :  { %v2502_v4 = vadd.f32 %v5532_v2, %v2501_v34  ;;  %v2473_v41 = vsel %vm2470_vm13, %v2472_v1, %v2468_v12  ;;  %2827 = vmatpush.bf16.msra.mxu3 %v4646_v47  ;;  %vm2548_vm7 = vcmp.eq.f32.partialorder %v2547_v20, 8.507059e+37  ;;  %v375_v23 = vadd.f32 %v8519_v46, %v6224_v59  ;;  %v5297_v47 = vld [vmem:[%s8450_s3 + $0xcc] sm:$0xf0]  ;;  %v5298_v1 = vld [vmem:[%s8450_s3 + $0xd4] sm:$0xf0]  ;;  %v8522_v20 = vld [vmem:[#allocation13_spill] sm:$0xff] }
 0x421   :  { %v2558_v25 = vmul.f32 %v5536_v30, %v2473_v41  ;;  %v2531_v60 = vsel %vm2530_vm3, %v7690_v40, %v2527_v28  ;;  %v4881_v40 = vld [vmem:[%s8450_s3 + $0xe0] sm:$0xf]  ;;  %v4886_v16 = vor.u32 %v5299_v10, %v4883_v37  ;;  %v4890_v5 = vor.u32 %v5302_v45, %v4889_v51  ;;  %v5295_v30 = vld [vmem:[%s8450_s3 + $0xc4] sm:$0xf]  ;;  %v5296_v41 = vld [vmem:[%s8450_s3 + $0xcc] sm:$0xf] }
 0x422   :  { %v2506_v42 = vsel %vm2505_vm14, %v5532_v2, %v2502_v4  ;;  %v4882_v27 = vor.u32 %v5301_v24, %v4881_v40  ;;  %v4894_v18 = vor.u32 %v5300_v36, %v4891_v33  ;;  %v4866_v34 = vor.u32 %v5297_v47, %v4865_v13  ;;  %v5294_v11 = vld [vmem:[%s8450_s3 + $0xb4] sm:$0xf0]  ;;  %v4833_v40 = vld [vmem:[%s8450_s3 + $0x80] sm:$0xf]  ;;  %v5289_v24 = vld [vmem:[%s8450_s3 + $0x8c] sm:$0xf0] }
 0x423   :  { %v2511_v14 = vsel %vm2508_vm15, %v2510_v29, %v2506_v42  ;;  %v5538_v31 = vpop.eup %5537  ;;  %3197 = vmatpush.bf16.msrb.mxu1 %v4886_v16  ;;  %3211 = vmatpush.bf16.msrb.mxu2 %v4890_v5  ;;  %v4870_v4 = vor.u32 %v5295_v30, %v4867_v52  ;;  %v4874_v29 = vor.u32 %v5298_v1, %v4873_v19  ;;  %v4875_v42 = vld [vmem:[%s8450_s3 + $0xd8] sm:$0xf0]  ;;  %v5287_v10 = vld [vmem:[%s8450_s3 + $0x84] sm:$0xf]  ;;  %v4835_v51 = vld [vmem:[%s8450_s3 + $0x90] sm:$0xf0] }
 0x424   :  { %v2556_v17 = vmul.f32 %v2511_v14, %v7431_v53  ;;  %v2539_v61 = vmul.f32 %v5538_v31, %v2522_v0  ;;  %v2532_v53 = vand.u32 2147483647, %v7599_v49  ;;  %vm2544_vm2 = vweird.f32 %v5538_v31  ;;  %v5540_v54 = vpop.eup %5539  ;;  %3183 = vmatpush.bf16.msrb.mxu0 %v4882_v27  ;;  %3225 = vmatpush.bf16.msrb.mxu3 %v4894_v18  ;;  %v4849_v14 = vld [vmem:[%s8450_s3 + $0xa0] sm:$0xf]  ;;  %v4841_v45 = vld [vmem:[%s8450_s3 + $0x88] sm:$0xf] }
 0x425   :  { %vm2545_vm5 = vmor %vm2543_vm4, %vm2544_vm2  ;;  %v4850_v28 = vor.u32 %v5293_v50, %v4849_v14  ;;  %v4834_v37 = vor.u32 %v5289_v24, %v4833_v40  ;;  %v5290_v16 = vld [vmem:[%s8450_s3 + $0x94] sm:$0xf0]  ;;  %v4817_v13 = vld [vmem:[%s8450_s3 + $0x60] sm:$0xf] }
 0x426   :  { %v7747_v56 = vadd.f32 %v2558_v25, %v2556_v17  ;;  %v2540_v62 = vsub.f32 1.0, %v2539_v61  ;;  %vm2533_vm6 = vcmp.eq.f32.partialorder %v2532_v53, 8.507059e+37  ;;  %v4878_v25 = vor.u32 %v5296_v41, %v4875_v42  ;;  %v5291_v17 = vld [vmem:[%s8450_s3 + $0xa4] sm:$0xf]  ;;  %v8521_v53 = vld [vmem:[#allocation12_spill] sm:$0xff]  ;;  %v8523_v52 = vld [vmem:[#allocation10_spill] sm:$0xff] }
 0x427   :  { %v2536_v9 = vsel %vm2533_vm6, %v2535_v26, %v2531_v60  ;;  %3198 = vmatpush.bf16.msrb.mxu1 %v4870_v4  ;;  %3212 = vmatpush.bf16.msrb.mxu2 %v4874_v29  ;;  %v4858_v26 = vor.u32 %v5294_v11, %v4857_v32  ;;  %v4842_v33 = vor.u32 %v5290_v16, %v4841_v45  ;;  %v5285_v47 = vld [vmem:[%s8450_s3 + $0x6c] sm:$0xf0]  ;;  %v5283_v30 = vld [vmem:[%s8450_s3 + $0x64] sm:$0xf]  ;;  %v5284_v42 = vld [vmem:[%s8450_s3 + $0x6c] sm:$0xf] }
 0x428   :  { %5541 = vtanh.f32 %v7747_v56  ;;  %v2541_v15 = vmul.f32 %v5538_v31, %v2540_v62  ;;  %v2563_v44 = vmul.f32 %v5540_v54, %v2536_v9  ;;  %3184 = vmatpush.bf16.msrb.mxu0 %v4866_v34  ;;  %v4851_v62 = vld [vmem:[%s8450_s3 + $0xb0] sm:$0xf0]  ;;  %3226 = vmatpush.bf16.msrb.mxu3 %v4878_v25  ;;  %v424_v19 = vadd.f32 %v8523_v52, %v6334_v58  ;;  %v4827_v25 = vld [vmem:[%s8450_s3 + $0x78] sm:$0xf0]  ;;  %v5279_v32 = vld [vmem:[%s8450_s3 + $0x44] sm:$0xf] }
 0x429   :  { %v4854_v54 = vor.u32 %v5291_v17, %v4851_v62  ;;  %v4819_v34 = vld [vmem:[%s8450_s3 + $0x70] sm:$0xf0]  ;;  %v4818_v41 = vor.u32 %v5285_v47, %v4817_v13  ;;  %v5281_v62 = vld [vmem:[%s8450_s3 + $0x4c] sm:$0xf0] }
 0x42a   :  { %v2542_v48 = vadd.f32 %v5538_v31, %v2541_v15  ;;  %v328_v15 = vadd.f32 %v8521_v53, %v6199_v6  ;;  %v8524_v4 = vld [vmem:[#allocation15_spill] sm:$0xff]  ;;  %v4822_v17 = vor.u32 %v5283_v30, %v4819_v34  ;;  %v5275_v30 = vld [vmem:[%s8450_s3 + $0x24] sm:$0xf] }
 0x42b   :  { %3199 = vmatpush.bf16.msrb.mxu1 %v4854_v54  ;;  %3213 = vmatpush.bf16.msrb.mxu2 %v4858_v26  ;;  %v475_v29 = vadd.f32 %v8524_v4, %v6263_v57  ;;  %v4787_v34 = vld [vmem:[%s8450_s3 + $0x30] sm:$0xf0] }
 0x42c   :  { %v2546_v35 = vsel %vm2545_vm5, %v5538_v31, %v2542_v48  ;;  %v8520_v31 = vld [vmem:[#allocation11_spill] sm:$0xff]  ;;  %v377_v48 = vadd.f32 %v8522_v20, %v6224_v59  ;;  %3185 = vmatpush.bf16.msrb.mxu0 %v4850_v28  ;;  %v4801_v28 = vld [vmem:[%s8450_s3 + $0x40] sm:$0xf] }
 0x42d   :  { %v2551_v2 = vsel %vm2548_vm7, %v2550_v43, %v2546_v35  ;;  %v473_v61 = vadd.f32 %v8520_v31, %v6263_v57  ;;  %v5292_v43 = vld [vmem:[%s8450_s3 + $0xac] sm:$0xf]  ;;  %v4803_v20 = vld [vmem:[%s8450_s3 + $0x50] sm:$0xf0] }
 0x42e   :  { %v5542_v63 = vpop.eup %5541 }
 0x42f   :  { %v2564_v49 = vmul.f32 %v5542_v63, %v2551_v2  ;;  %v4859_v63 = vld [vmem:[%s8450_s3 + $0xb8] sm:$0xf0]  ;;  %3214 = vmatpush.bf16.msrb.mxu2 %v4842_v33 }
 0x430   :  { %3186 = vmatpush.bf16.msrb.mxu0 %v4834_v37 }
 0x431   :  { %v5358_v7 = vpack.c.bf16 %v2564_v49, %v2563_v44  ;;  %v4862_v44 = vor.u32 %v5292_v43, %v4859_v63  ;;  %v4806_v43 = vor.u32 %v5279_v32, %v4803_v20 }
 0x433   :  { %5378 = vst [vmem:[%s8453_s4 + $0x20] sm:$0xff] %v5358_v7   ;;  %2786 = vmatmul.bf16.vlgmr.msra.gmra.mxu0 %v5358_v7  ;;  %2800 = vmatmul.bf16.vlgmr.msra.gmra.mxu1 %v5358_v7 }
 0x434   :  { %2814 = vmatmul.bf16.vlgmr.msra.gmra.mxu2 %v5358_v7  ;;  %2828 = vmatmul.bf16.vlgmr.msra.gmra.mxu3 %v5358_v7 }
 0x435   :  { %3227 = vmatpush.bf16.msrb.mxu3 %v4862_v44  ;;  %3187 = vmatpush.bf16.msrb.mxu0 %v4818_v41 }
 0x4b0   :  { %v2787_v21 = vpop.f32.mrf.mxu0  ;;  %v2801_v22 = vpop.f32.mrf.mxu1 }
 0x4b1   :  { %v2834_v0 = vadd.f32 %v2787_v21, %v326_v8  ;;  %v2835_v55 = vadd.f32 %v2801_v22, %v375_v23  ;;  %v4838_v23 = vor.u32 %v5287_v10, %v4835_v51  ;;  %v5288_v21 = vld [vmem:[%s8450_s3 + $0x8c] sm:$0xf]  ;;  %v4843_v22 = vld [vmem:[%s8450_s3 + $0x98] sm:$0xf0] }
 0x4b3   :  { %v4759_v3 = vmul.f32 -1.442695, %v2834_v0  ;;  %v4761_v12 = vmul.f32 -1.442695, %v2835_v55  ;;  %3200 = vmatpush.bf16.msrb.mxu1 %v4838_v23  ;;  %v4846_v55 = vor.u32 %v5288_v21, %v4843_v22  ;;  %v4811_v22 = vld [vmem:[%s8450_s3 + $0x58] sm:$0xf0] }
 0x4b5   :  { %5543 = vpow2.f32 %v4759_v3  ;;  %3228 = vmatpush.bf16.msrb.mxu3 %v4846_v55  ;;  %v4825_v3 = vld [vmem:[%s8450_s3 + $0x68] sm:$0xf]  ;;  %v5277_v55 = vld [vmem:[%s8450_s3 + $0x2c] sm:$0xf0] }
 0x4b6   :  { %5545 = vpow2.f32 %v4761_v12  ;;  %v5286_v12 = vld [vmem:[%s8450_s3 + $0x74] sm:$0xf0] }
 0x4b7   :  { %v2829_v60 = vpop.f32.mrf.mxu3  ;;  %v2815_v0 = vpop.f32.mrf.mxu2  ;;  %v4826_v31 = vor.u32 %v5286_v12, %v4825_v3  ;;  %3201 = vmatpush.bf16.msrb.mxu1 %v4822_v17  ;;  %v5276_v17 = vld [vmem:[%s8450_s3 + $0x2c] sm:$0xf] }
 0x4b8   :  { %v2837_v35 = vadd.f32 %v2829_v60, %v473_v61  ;;  %v2789_v9 = vpop.f32.mrf.mxu0  ;;  %v2803_v2 = vpop.f32.mrf.mxu1  ;;  %v2836_v50 = vadd.f32 %v2815_v0, %v424_v19  ;;  %v4830_v61 = vor.u32 %v5284_v42, %v4827_v25  ;;  %v4785_v0 = vld [vmem:[%s8450_s3 + $0x20] sm:$0xf] }
 0x4b9   :  { %v2838_v49 = vadd.f32 %v2789_v9, %v328_v15  ;;  %v2839_v7 = vadd.f32 %v2803_v2, %v377_v48  ;;  %v4802_v15 = vor.u32 %v5281_v62, %v4801_v28  ;;  %3215 = vmatpush.bf16.msrb.mxu2 %v4826_v31  ;;  %v4795_v31 = vld [vmem:[%s8450_s3 + $0x38] sm:$0xf0] }
 0x4ba   :  { %v4763_v27 = vmul.f32 -1.442695, %v2837_v35  ;;  %v8525_v35 = vld [vmem:[#allocation14_spill] sm:$0xff]  ;;  %3229 = vmatpush.bf16.msrb.mxu3 %v4830_v61 }
 0x4bb   :  { %v5544_v38 = vpop.eup %5543  ;;  %v4760_v8 = vmul.f32 -1.442695, %v2838_v49  ;;  %v4762_v46 = vmul.f32 -1.442695, %v2839_v7  ;;  %v426_v9 = vadd.f32 %v8525_v35, %v6334_v58  ;;  %3188 = vmatpush.bf16.msrb.mxu0 %v4802_v15  ;;  %3202 = vmatpush.bf16.msrb.mxu1 %v4806_v43  ;;  %v5271_v15 = vld [vmem:[%s8450_s3 + $0x4] sm:$0xf]  ;;  %v4790_v43 = vor.u32 %v5275_v30, %v4787_v34 }
 0x4bc   :  { %v5546_v5 = vpop.eup %5545  ;;  %v7860_v36 = vadd.f32 1.0, %v5544_v38  ;;  %5547 = vpow2.f32 %v4763_v27  ;;  %v4777_v35 = vld [vmem:[%s8450_s3 + $0x8] sm:$0xf] }
 0x4bd   :  { %v7868_v18 = vadd.f32 1.0, %v5546_v5  ;;  %5549 = vpow2.f32 %v4760_v8  ;;  %v4809_v8 = vld [vmem:[%s8450_s3 + $0x48] sm:$0xf]  ;;  %v5280_v5 = vld [vmem:[%s8450_s3 + $0x4c] sm:$0xf] }
 0x4be   :  { %5551 = vrcp.f32 %v7860_v36  ;;  %v2859_v60 = vand.u32 2147483647, %v7860_v36  ;;  %v2861_v44 = vand.u32 2147483648, %v7860_v36  ;;  %vm2855_vm12 = vweird.f32 %v7860_v36 }
 0x4bf   :  { %5553 = vrcp.f32 %v7868_v18  ;;  %v2831_v1 = vpop.f32.mrf.mxu3  ;;  %v2899_v40 = vand.u32 2147483648, %v7868_v18  ;;  %v2897_v24 = vand.u32 2147483647, %v7868_v18  ;;  %v2817_v37 = vpop.f32.mrf.mxu2  ;;  %vm2893_vm11 = vweird.f32 %v7868_v18  ;;  %3203 = vmatpush.bf16.msrb.mxu1 %v4790_v43  ;;  %v5333_v43 = vld [vmem:[%s8450_s3 + $0xec] sm:$0xf0] }
 0x4c0   :  { %5555 = vpow2.f32 %v4762_v46  ;;  %v2841_v53 = vadd.f32 %v2831_v1, %v475_v29  ;;  %vm7934_vm9 = vcmp.eq.f32.partialorder %v2859_v60, 8.507059e+37  ;;  %v5282_v46 = vld [vmem:[%s8450_s3 + $0x54] sm:$0xf0]  ;;  %v2862_v16 = vor.u32 1.1754944e-38, %v2861_v44  ;;  %v4793_v29 = vld [vmem:[%s8450_s3 + $0x28] sm:$0xf] }
 0x4c1   :  { %5557 = vtanh.f32 %v2836_v50  ;;  %v2840_v21 = vadd.f32 %v2817_v37, %v426_v9  ;;  %v2900_v13 = vor.u32 1.1754944e-38, %v2899_v40  ;;  %vm7983_vm15 = vcmp.eq.f32.partialorder %v2897_v24, 8.507059e+37  ;;  %v5278_v50 = vld [vmem:[%s8450_s3 + $0x34] sm:$0xf0]  ;;  %v5272_v40 = vld [vmem:[%s8450_s3 + $0xc] sm:$0xf] }
 0x4c2   :  { %v5548_v14 = vpop.eup %5547  ;;  %v4764_v51 = vmul.f32 -1.442695, %v2841_v53  ;;  %v4814_v25 = vor.u32 %v5280_v5, %v4811_v22  ;;  %v5273_v53 = vld [vmem:[%s8450_s3 + $0xc] sm:$0xf0]  ;;  %v5274_v9 = vld [vmem:[%s8450_s3 + $0x14] sm:$0xf0] }
 0x4c3   :  { %v5550_v11 = vpop.eup %5549  ;;  %v7915_v54 = vadd.f32 1.0, %v5548_v14  ;;  %v4786_v14 = vor.u32 %v5277_v55, %v4785_v0  ;;  %v4779_v24 = vld [vmem:[%s8450_s3 + $0x18] sm:$0xf0]  ;;  %v4778_v5 = vor.u32 %v5274_v9, %v4777_v35  ;;  %v5019_v9 = vld [vmem:[%s8450_s3 + $0xf0] sm:$0xf0] }
 0x4c4   :  { %v7912_v48 = vpop.eup %5551  ;;  %v7917_v26 = vadd.f32 1.0, %v5550_v11  ;;  %v4769_v11 = vld [vmem:[%s8450_s3] sm:$0xf]  ;;  %3230 = vmatpush.bf16.msrb.mxu3 %v4814_v25 }
 0x4c5   :  { %v7919_v63 = vpop.eup %5553  ;;  %v2851_v2 = vmul.f32 %v7912_v48, %v7860_v36  ;;  %vm2856_vm8 = vweird.f32 %v7912_v48  ;;  %3189 = vmatpush.bf16.msrb.mxu0 %v4786_v14 }
 0x4c6   :  { %v5556_v49 = vpop.eup %5555  ;;  %v2889_v7 = vmul.f32 %v7919_v63, %v7868_v18  ;;  %5559 = vrcp.f32 %v7917_v26  ;;  %vm2894_vm10 = vweird.f32 %v7919_v63  ;;  %vm7966_vm13 = vmor %vm2855_vm12, %vm2856_vm8  ;;  %v4810_v18 = vor.u32 %v5282_v46, %v4809_v8 }
 0x4c7   :  { %v2852_v10 = vsub.f32 1.0, %v2851_v2  ;;  %v7931_v27 = vadd.f32 1.0, %v5556_v49  ;;  %5561 = vrcp.f32 %v7915_v54  ;;  %v5558_v52 = vpop.eup %5557  ;;  %vm7978_vm14 = vmor %vm2893_vm11, %vm2894_vm10  ;;  %v2874_v4 = vand.u32 2147483647, %v7917_v26 }
 0x4c8   :  { %v2890_v45 = vsub.f32 1.0, %v2889_v7  ;;  %3216 = vmatpush.bf16.msrb.mxu2 %v4810_v18  ;;  %vm2870_vm0 = vweird.f32 %v7917_v26  ;;  %v2876_v7 = vand.u32 2147483648, %v7917_v26 }
 0x4c9   :  { %v2853_v23 = vmul.f32 %v7912_v48, %v2852_v10  ;;  %5563 = vrcp.f32 %v7931_v27  ;;  %v2914_v12 = vand.u32 2147483648, %v7931_v27  ;;  %v2912_v55 = vand.u32 2147483647, %v7931_v27 }
 0x4ca   :  { %v2891_v33 = vmul.f32 %v7919_v63, %v2890_v45  ;;  %5565 = vpow2.f32 %v4764_v51  ;;  %v4794_v51 = vor.u32 %v5278_v50, %v4793_v29  ;;  %v4770_v45 = vor.u32 %v5273_v53, %v4769_v11 }
 0x4cb   :  { %v2854_v47 = vadd.f32 %v7912_v48, %v2853_v23  ;;  %5567 = vtanh.f32 %v2840_v21  ;;  %vm2908_vm3 = vweird.f32 %v7931_v27  ;;  %vm2875_vm5 = vcmp.eq.f32.partialorder %v2874_v4, 8.507059e+37 }
 0x4cc   :  { %v2892_v1 = vadd.f32 %v7919_v63, %v2891_v33  ;;  %v7992_v41 = vpop.eup %5559  ;;  %3217 = vmatpush.bf16.msrb.mxu2 %v4794_v51  ;;  %v4782_v33 = vor.u32 %v5272_v40, %v4779_v24  ;;  %3190 = vmatpush.bf16.msrb.mxu0 %v4770_v45  ;;  %v2915_v30 = vor.u32 1.1754944e-38, %v2914_v12  ;;  %vm2913_vm7 = vcmp.eq.f32.partialorder %v2912_v55, 8.507059e+37  ;;  %v8535_v40 = vld [vmem:[#allocation17_spill] sm:$0xff]  ;;  %v5332_v51 = vld [vmem:[%s8450_s3 + $0xec] sm:$0xf] }
 0x4cd   :  { %v2858_v42 = vsel %vm7966_vm13, %v7912_v48, %v2854_v47  ;;  %v8006_v61 = vpop.eup %5561  ;;  %v2866_v32 = vmul.f32 %v7992_v41, %v7917_v26  ;;  %vm2871_vm1 = vweird.f32 %v7992_v41  ;;  %v2939_v4 = vand.u32 2147483648, %v7915_v54  ;;  %v5009_v55 = vld [vmem:[%s8450_s3 + $0xc8] sm:$0xf] }
 0x4ce   :  { %v2863_v28 = vsel %vm7934_vm9, %v2862_v16, %v2858_v42  ;;  %v2896_v62 = vsel %vm7978_vm14, %v7919_v63, %v2892_v1  ;;  %v4771_v63 = vld [vmem:[%s8450_s3 + $0x10] sm:$0xf0]  ;;  %v2929_v37 = vmul.f32 %v8006_v61, %v7915_v54  ;;  %vm2872_vm4 = vmor %vm2870_vm0, %vm2871_vm1  ;;  %vm2934_vm8 = vweird.f32 %v8006_v61 }
 0x4cf   :  { %v5564_v20 = vpop.eup %5563  ;;  %v2901_v48 = vsel %vm7983_vm15, %v2900_v13, %v2896_v62  ;;  %v2962_v60 = vmul.f32 %v5558_v52, %v2863_v28  ;;  %v2867_v44 = vsub.f32 1.0, %v2866_v32  ;;  %v4774_v16 = vor.u32 %v5271_v15, %v4771_v63  ;;  %v5331_v63 = vld [vmem:[%s8450_s3 + $0xe4] sm:$0xf] }
 0x4d0   :  { %v2960_v2 = vmul.f32 %v2901_v48, %v7731_v39  ;;  %v2904_v49 = vmul.f32 %v5564_v20, %v7931_v27  ;;  %v5566_v10 = vpop.eup %5565  ;;  %v4798_v39 = vor.u32 %v5276_v17, %v4795_v31  ;;  %vm2909_vm2 = vweird.f32 %v5564_v20  ;;  %3218 = vmatpush.bf16.msrb.mxu2 %v4778_v5  ;;  %v5001_v5 = vld [vmem:[%s8450_s3 + $0xc0] sm:$0xf] }
 0x4d1   :  { %v2868_v46 = vmul.f32 %v7992_v41, %v2867_v44  ;;  %v2927_v23 = vadd.f32 1.0, %v5566_v10  ;;  %v5568_v21 = vpop.eup %5567  ;;  %v2877_v13 = vor.u32 1.1754944e-38, %v2876_v7  ;;  %3204 = vmatpush.bf16.msrb.mxu1 %v4774_v16  ;;  %v2930_v47 = vsub.f32 1.0, %v2929_v37  ;;  %vm2910_vm6 = vmor %vm2908_vm3, %vm2909_vm2  ;;  %v5334_v44 = vld [vmem:[%s8450_s3 + $0xf4] sm:$0xf0] }
 0x4d2   :  { %v8047_v38 = vadd.f32 %v2962_v60, %v2960_v2  ;;  %v2905_v8 = vsub.f32 1.0, %v2904_v49  ;;  %3231 = vmatpush.bf16.msrb.mxu3 %v4798_v39  ;;  %vm2933_vm9 = vweird.f32 %v7915_v54  ;;  %v2940_v62 = vor.u32 1.1754944e-38, %v2939_v4  ;;  %v5025_v2 = vld [vmem:[%s8450_s3 + $0xe8] sm:$0xf]  ;;  %v8534_v49 = vld [vmem:[#allocation16_spill] sm:$0xff] }
 0x4d3   :  { %v2869_v0 = vadd.f32 %v7992_v41, %v2868_v46  ;;  %5569 = vrcp.f32 %v2927_v23  ;;  %v2931_v3 = vmul.f32 %v8006_v61, %v2930_v47  ;;  %v2954_v25 = vand.u32 2147483648, %v2927_v23  ;;  %vm2935_vm11 = vmor %vm2933_vm9, %vm2934_vm8  ;;  %v5027_v39 = vld [vmem:[%s8450_s3 + $0xf8] sm:$0xf0]  ;;  %v4993_v4 = vld [vmem:[%s8450_s3 + $0xa8] sm:$0xf] }
 0x4d4   :  { %v2906_v22 = vmul.f32 %v5564_v20, %v2905_v8  ;;  %5571 = vtanh.f32 %v8047_v38  ;;  %v2952_v50 = vand.u32 2147483647, %v2927_v23  ;;  %vm2948_vm12 = vweird.f32 %v2927_v23 }
 0x4d5   :  { %v2873_v36 = vsel %vm2872_vm4, %v7992_v41, %v2869_v0  ;;  %v2932_v27 = vadd.f32 %v8006_v61, %v2931_v3  ;;  %v2955_v32 = vor.u32 1.1754944e-38, %v2954_v25  ;;  %v331_v7 = vadd.f32 %v8534_v49, %v6199_v6  ;;  %v5003_v0 = vld [vmem:[%s8450_s3 + $0xd0] sm:$0xf0]  ;;  %v5325_v3 = vld [vmem:[%s8450_s3 + $0xac] sm:$0xf0] }
 0x4d6   :  { %v2907_v18 = vadd.f32 %v5564_v20, %v2906_v22  ;;  %v2878_v34 = vsel %vm2875_vm5, %v2877_v13, %v2873_v36  ;;  %3232 = vmatpush.bf16.msrb.mxu3 %v4782_v33  ;;  %vm2953_vm15 = vcmp.eq.f32.partialorder %v2952_v50, 8.507059e+37  ;;  %v380_v24 = vadd.f32 %v8535_v40, %v6224_v59  ;;  %v5329_v33 = vld [vmem:[%s8450_s3 + $0xcc] sm:$0xf0]  ;;  %v5330_v13 = vld [vmem:[%s8450_s3 + $0xd4] sm:$0xf0]  ;;  %v8538_v50 = vld [vmem:[#allocation21_spill] sm:$0xff] }
 0x4d7   :  { %v2963_v19 = vmul.f32 %v5568_v21, %v2878_v34  ;;  %v2936_v31 = vsel %vm2935_vm11, %v8006_v61, %v2932_v27  ;;  %v5017_v61 = vld [vmem:[%s8450_s3 + $0xe0] sm:$0xf]  ;;  %v5022_v10 = vor.u32 %v5331_v63, %v5019_v9  ;;  %v5026_v37 = vor.u32 %v5334_v44, %v5025_v2  ;;  %v5327_v21 = vld [vmem:[%s8450_s3 + $0xc4] sm:$0xf]  ;;  %v5328_v34 = vld [vmem:[%s8450_s3 + $0xcc] sm:$0xf] }
 0x4d8   :  { %v2911_v52 = vsel %vm2910_vm6, %v5564_v20, %v2907_v18  ;;  %v5018_v35 = vor.u32 %v5333_v43, %v5017_v61  ;;  %v5030_v46 = vor.u32 %v5332_v51, %v5027_v39  ;;  %v5002_v22 = vor.u32 %v5329_v33, %v5001_v5  ;;  %v5326_v25 = vld [vmem:[%s8450_s3 + $0xb4] sm:$0xf0]  ;;  %v4969_v61 = vld [vmem:[%s8450_s3 + $0x80] sm:$0xf]  ;;  %v5321_v43 = vld [vmem:[%s8450_s3 + $0x8c] sm:$0xf0] }
 0x4d9   :  { %v2916_v1 = vsel %vm2913_vm7, %v2915_v30, %v2911_v52  ;;  %v5570_v41 = vpop.eup %5569  ;;  %3602 = vmatpush.bf16.msra.mxu1 %v5022_v10  ;;  %3616 = vmatpush.bf16.msra.mxu2 %v5026_v37  ;;  %v5006_v18 = vor.u32 %v5327_v21, %v5003_v0  ;;  %v5010_v30 = vor.u32 %v5330_v13, %v5009_v55  ;;  %v5011_v52 = vld [vmem:[%s8450_s3 + $0xd8] sm:$0xf0]  ;;  %v5319_v63 = vld [vmem:[%s8450_s3 + $0x84] sm:$0xf]  ;;  %v4971_v2 = vld [vmem:[%s8450_s3 + $0x90] sm:$0xf0] }
 0x4da   :  { %v2961_v29 = vmul.f32 %v2916_v1, %v7747_v56  ;;  %v2944_v26 = vmul.f32 %v5570_v41, %v2927_v23  ;;  %v2937_v56 = vand.u32 2147483647, %v7915_v54  ;;  %vm2949_vm10 = vweird.f32 %v5570_v41  ;;  %v5572_v28 = vpop.eup %5571  ;;  %3588 = vmatpush.bf16.msra.mxu0 %v5018_v35  ;;  %3630 = vmatpush.bf16.msra.mxu3 %v5030_v46  ;;  %v4985_v1 = vld [vmem:[%s8450_s3 + $0xa0] sm:$0xf]  ;;  %v4977_v44 = vld [vmem:[%s8450_s3 + $0x88] sm:$0xf] }
 0x4db   :  { %vm2950_vm13 = vmor %vm2948_vm12, %vm2949_vm10  ;;  %v4986_v27 = vor.u32 %v5325_v3, %v4985_v1  ;;  %v4970_v9 = vor.u32 %v5321_v43, %v4969_v61  ;;  %v5322_v10 = vld [vmem:[%s8450_s3 + $0x94] sm:$0xf0]  ;;  %v4953_v5 = vld [vmem:[%s8450_s3 + $0x60] sm:$0xf] }
 0x4dc   :  { %v8063_v42 = vadd.f32 %v2963_v19, %v2961_v29  ;;  %v2945_v12 = vsub.f32 1.0, %v2944_v26  ;;  %vm2938_vm14 = vcmp.eq.f32.partialorder %v2937_v56, 8.507059e+37  ;;  %v5014_v19 = vor.u32 %v5328_v34, %v5011_v52  ;;  %v5323_v29 = vld [vmem:[%s8450_s3 + $0xa4] sm:$0xf]  ;;  %v8537_v56 = vld [vmem:[#allocation20_spill] sm:$0xff]  ;;  %v8539_v0 = vld [vmem:[#allocation18_spill] sm:$0xff] }
 0x4dd   :  { %v2941_v15 = vsel %vm2938_vm14, %v2940_v62, %v2936_v31  ;;  %3603 = vmatpush.bf16.msra.mxu1 %v5006_v18  ;;  %3617 = vmatpush.bf16.msra.mxu2 %v5010_v30  ;;  %v4994_v62 = vor.u32 %v5326_v25, %v4993_v4  ;;  %v4978_v39 = vor.u32 %v5322_v10, %v4977_v44  ;;  %v5317_v33 = vld [vmem:[%s8450_s3 + $0x6c] sm:$0xf0]  ;;  %v5315_v21 = vld [vmem:[%s8450_s3 + $0x64] sm:$0xf]  ;;  %v8540_v18 = vld [vmem:[#allocation22_spill] sm:$0xff] }
 0x4de   :  { %5573 = vtanh.f32 %v8063_v42  ;;  %v2946_v14 = vmul.f32 %v5570_v41, %v2945_v12  ;;  %v2968_v48 = vmul.f32 %v5572_v28, %v2941_v15  ;;  %3589 = vmatpush.bf16.msra.mxu0 %v5002_v22  ;;  %v4987_v12 = vld [vmem:[%s8450_s3 + $0xb0] sm:$0xf0]  ;;  %3631 = vmatpush.bf16.msra.mxu3 %v5014_v19  ;;  %v429_v55 = vadd.f32 %v8539_v0, %v6334_v58  ;;  %v5316_v52 = vld [vmem:[%s8450_s3 + $0x6c] sm:$0xf]  ;;  %v4963_v19 = vld [vmem:[%s8450_s3 + $0x78] sm:$0xf0] }
 0x4df   :  { %v4990_v28 = vor.u32 %v5323_v29, %v4987_v12  ;;  %v4955_v22 = vld [vmem:[%s8450_s3 + $0x70] sm:$0xf0]  ;;  %v480_v30 = vadd.f32 %v8540_v18, %v6263_v57  ;;  %v4954_v34 = vor.u32 %v5317_v33, %v4953_v5  ;;  %v5313_v12 = vld [vmem:[%s8450_s3 + $0x4c] sm:$0xf0]  ;;  %v5311_v4 = vld [vmem:[%s8450_s3 + $0x44] sm:$0xf] }
 0x4e0   :  { %v2947_v17 = vadd.f32 %v5570_v41, %v2946_v14  ;;  %v333_v14 = vadd.f32 %v8537_v56, %v6199_v6  ;;  %v4958_v29 = vor.u32 %v5315_v21, %v4955_v22  ;;  %v5307_v21 = vld [vmem:[%s8450_s3 + $0x24] sm:$0xf]  ;;  %v4923_v22 = vld [vmem:[%s8450_s3 + $0x30] sm:$0xf0] }
 0x4e1   :  { %3604 = vmatpush.bf16.msra.mxu1 %v4990_v28  ;;  %3618 = vmatpush.bf16.msra.mxu2 %v4994_v62 }
 0x4e2   :  { %v2951_v53 = vsel %vm2950_vm13, %v5570_v41, %v2947_v17  ;;  %v8536_v41 = vld [vmem:[#allocation19_spill] sm:$0xff]  ;;  %v382_v17 = vadd.f32 %v8538_v50, %v6224_v59  ;;  %3590 = vmatpush.bf16.msra.mxu0 %v4986_v27  ;;  %v4937_v27 = vld [vmem:[%s8450_s3 + $0x40] sm:$0xf] }
 0x4e3   :  { %v2956_v20 = vsel %vm2953_vm15, %v2955_v32, %v2951_v53  ;;  %v478_v26 = vadd.f32 %v8536_v41, %v6263_v57  ;;  %v5324_v32 = vld [vmem:[%s8450_s3 + $0xac] sm:$0xf]  ;;  %v4939_v50 = vld [vmem:[%s8450_s3 + $0x50] sm:$0xf0] }
 0x4e4   :  { %v5574_v11 = vpop.eup %5573 }
 0x4e5   :  { %v2969_v54 = vmul.f32 %v5574_v11, %v2956_v20  ;;  %v4995_v11 = vld [vmem:[%s8450_s3 + $0xb8] sm:$0xf0]  ;;  %3619 = vmatpush.bf16.msra.mxu2 %v4978_v39 }
 0x4e6   :  { %3591 = vmatpush.bf16.msra.mxu0 %v4970_v9 }
 0x4e7   :  { %v5363_v60 = vpack.c.bf16 %v2969_v54, %v2968_v48  ;;  %v4998_v48 = vor.u32 %v5324_v32, %v4995_v11  ;;  %v4942_v32 = vor.u32 %v5311_v4, %v4939_v50 }
 0x4e9   :  { %5379 = vst [vmem:[%s8453_s4 + $0x28] sm:$0xff] %v5363_v60   ;;  %3191 = vmatmul.bf16.vlgmr.msrb.gmra.mxu0 %v5363_v60  ;;  %3205 = vmatmul.bf16.vlgmr.msrb.gmra.mxu1 %v5363_v60 }
 0x4ea   :  { %3219 = vmatmul.bf16.vlgmr.msrb.gmra.mxu2 %v5363_v60  ;;  %3233 = vmatmul.bf16.vlgmr.msrb.gmra.mxu3 %v5363_v60 }
 0x4eb   :  { %3632 = vmatpush.bf16.msra.mxu3 %v4998_v48  ;;  %3592 = vmatpush.bf16.msra.mxu0 %v4954_v34 }
 0x566   :  { %v3192_v45 = vpop.f32.mrf.mxu0  ;;  %v3206_v8 = vpop.f32.mrf.mxu1 }
 0x567   :  { %v3239_v23 = vadd.f32 %v3192_v45, %v331_v7  ;;  %v3240_v16 = vadd.f32 %v3206_v8, %v380_v24  ;;  %v4974_v24 = vor.u32 %v5319_v63, %v4971_v2  ;;  %v5320_v45 = vld [vmem:[%s8450_s3 + $0x8c] sm:$0xf]  ;;  %v4979_v8 = vld [vmem:[%s8450_s3 + $0x98] sm:$0xf0] }
 0x569   :  { %v4895_v47 = vmul.f32 -1.442695, %v3239_v23  ;;  %v4897_v36 = vmul.f32 -1.442695, %v3240_v16  ;;  %3605 = vmatpush.bf16.msra.mxu1 %v4974_v24  ;;  %v4982_v16 = vor.u32 %v5320_v45, %v4979_v8  ;;  %v4947_v8 = vld [vmem:[%s8450_s3 + $0x58] sm:$0xf0] }
 0x56b   :  { %5575 = vpow2.f32 %v4895_v47  ;;  %3633 = vmatpush.bf16.msra.mxu3 %v4982_v16  ;;  %v4961_v47 = vld [vmem:[%s8450_s3 + $0x68] sm:$0xf]  ;;  %v5309_v16 = vld [vmem:[%s8450_s3 + $0x2c] sm:$0xf0] }
 0x56c   :  { %5577 = vpow2.f32 %v4897_v36  ;;  %v5318_v36 = vld [vmem:[%s8450_s3 + $0x74] sm:$0xf0] }
 0x56d   :  { %v3234_v31 = vpop.f32.mrf.mxu3  ;;  %v3220_v23 = vpop.f32.mrf.mxu2  ;;  %v4962_v41 = vor.u32 %v5318_v36, %v4961_v47  ;;  %3606 = vmatpush.bf16.msra.mxu1 %v4958_v29  ;;  %v5308_v29 = vld [vmem:[%s8450_s3 + $0x2c] sm:$0xf] }
 0x56e   :  { %v3242_v53 = vadd.f32 %v3234_v31, %v478_v26  ;;  %v3194_v15 = vpop.f32.mrf.mxu0  ;;  %v3208_v20 = vpop.f32.mrf.mxu1  ;;  %v3241_v3 = vadd.f32 %v3220_v23, %v429_v55  ;;  %v4966_v26 = vor.u32 %v5316_v52, %v4963_v19  ;;  %v4921_v23 = vld [vmem:[%s8450_s3 + $0x20] sm:$0xf] }
 0x56f   :  { %v3243_v54 = vadd.f32 %v3194_v15, %v333_v14  ;;  %v3244_v60 = vadd.f32 %v3208_v20, %v382_v17  ;;  %v4938_v14 = vor.u32 %v5313_v12, %v4937_v27  ;;  %3620 = vmatpush.bf16.msra.mxu2 %v4962_v41  ;;  %v4931_v41 = vld [vmem:[%s8450_s3 + $0x38] sm:$0xf0] }
 0x570   :  { %v4899_v35 = vmul.f32 -1.442695, %v3242_v53  ;;  %v8541_v53 = vld [vmem:[#allocation24_spill] sm:$0xff]  ;;  %3634 = vmatpush.bf16.msra.mxu3 %v4966_v26 }
 0x571   :  { %v5576_v49 = vpop.eup %5575  ;;  %v4896_v7 = vmul.f32 -1.442695, %v3243_v54  ;;  %v4898_v40 = vmul.f32 -1.442695, %v3244_v60  ;;  %v431_v15 = vadd.f32 %v8541_v53, %v6334_v58  ;;  %3593 = vmatpush.bf16.msra.mxu0 %v4938_v14  ;;  %3607 = vmatpush.bf16.msra.mxu1 %v4942_v32  ;;  %v5303_v14 = vld [vmem:[%s8450_s3 + $0x4] sm:$0xf]  ;;  %v4926_v32 = vor.u32 %v5307_v21, %v4923_v22 }
 0x572   :  { %v5578_v37 = vpop.eup %5577  ;;  %v8176_v51 = vadd.f32 1.0, %v5576_v49  ;;  %5579 = vpow2.f32 %v4899_v35  ;;  %v4913_v53 = vld [vmem:[%s8450_s3 + $0x8] sm:$0xf] }
 0x573   :  { %v8184_v46 = vadd.f32 1.0, %v5578_v37  ;;  %5581 = vpow2.f32 %v4896_v7  ;;  %v4945_v7 = vld [vmem:[%s8450_s3 + $0x48] sm:$0xf]  ;;  %v5312_v37 = vld [vmem:[%s8450_s3 + $0x4c] sm:$0xf] }
 0x574   :  { %5583 = vrcp.f32 %v8176_v51  ;;  %v3264_v31 = vand.u32 2147483647, %v8176_v51  ;;  %v3266_v48 = vand.u32 2147483648, %v8176_v51  ;;  %vm3260_vm4 = vweird.f32 %v8176_v51 }
 0x575   :  { %5585 = vrcp.f32 %v8184_v46  ;;  %v3236_v13 = vpop.f32.mrf.mxu3  ;;  %v3304_v61 = vand.u32 2147483648, %v8184_v46  ;;  %v3302_v43 = vand.u32 2147483647, %v8184_v46  ;;  %v3222_v9 = vpop.f32.mrf.mxu2  ;;  %vm3298_vm3 = vweird.f32 %v8184_v46  ;;  %3608 = vmatpush.bf16.msra.mxu1 %v4926_v32 }
 0x576   :  { %5587 = vpow2.f32 %v4898_v40  ;;  %v3246_v56 = vadd.f32 %v3236_v13, %v480_v30  ;;  %vm8250_vm1 = vcmp.eq.f32.partialorder %v3264_v31, 8.507059e+37  ;;  %v5314_v40 = vld [vmem:[%s8450_s3 + $0x54] sm:$0xf0]  ;;  %v3267_v10 = vor.u32 1.1754944e-38, %v3266_v48  ;;  %v4929_v30 = vld [vmem:[%s8450_s3 + $0x28] sm:$0xf] }
 0x577   :  { %5589 = vtanh.f32 %v3241_v3  ;;  %v3245_v45 = vadd.f32 %v3222_v9, %v431_v15  ;;  %v3305_v5 = vor.u32 1.1754944e-38, %v3304_v61  ;;  %vm8299_vm7 = vcmp.eq.f32.partialorder %v3302_v43, 8.507059e+37  ;;  %v5310_v3 = vld [vmem:[%s8450_s3 + $0x34] sm:$0xf0]  ;;  %v5304_v61 = vld [vmem:[%s8450_s3 + $0xc] sm:$0xf] }
 0x578   :  { %v5580_v1 = vpop.eup %5579  ;;  %v4900_v2 = vmul.f32 -1.442695, %v3246_v56  ;;  %v4950_v19 = vor.u32 %v5312_v37, %v4947_v8  ;;  %v5305_v56 = vld [vmem:[%s8450_s3 + $0xc] sm:$0xf0]  ;;  %v5306_v15 = vld [vmem:[%s8450_s3 + $0x14] sm:$0xf0] }
 0x579   :  { %v5582_v25 = vpop.eup %5581  ;;  %v8231_v28 = vadd.f32 1.0, %v5580_v1  ;;  %v4922_v1 = vor.u32 %v5309_v16, %v4921_v23  ;;  %v4915_v43 = vld [vmem:[%s8450_s3 + $0x18] sm:$0xf0]  ;;  %v4914_v37 = vor.u32 %v5306_v15, %v4913_v53 }
 0x57a   :  { %v8228_v17 = vpop.eup %5583  ;;  %v8233_v62 = vadd.f32 1.0, %v5582_v25  ;;  %v4905_v25 = vld [vmem:[%s8450_s3] sm:$0xf]  ;;  %3635 = vmatpush.bf16.msra.mxu3 %v4950_v19 }
 0x57b   :  { %v8235_v11 = vpop.eup %5585  ;;  %v3256_v20 = vmul.f32 %v8228_v17, %v8176_v51  ;;  %vm3261_vm0 = vweird.f32 %v8228_v17  ;;  %3594 = vmatpush.bf16.msra.mxu0 %v4922_v1 }
 0x57c   :  { %v5588_v54 = vpop.eup %5587  ;;  %v3294_v60 = vmul.f32 %v8235_v11, %v8184_v46  ;;  %5591 = vrcp.f32 %v8233_v62  ;;  %vm3299_vm2 = vweird.f32 %v8235_v11  ;;  %vm8282_vm5 = vmor %vm3260_vm4, %vm3261_vm0  ;;  %v4946_v46 = vor.u32 %v5314_v40, %v4945_v7 }
 0x57d   :  { %v3257_v63 = vsub.f32 1.0, %v3256_v20  ;;  %v8247_v35 = vadd.f32 1.0, %v5588_v54  ;;  %5593 = vrcp.f32 %v8231_v28  ;;  %v5590_v0 = vpop.eup %5589  ;;  %vm8294_vm6 = vmor %vm3298_vm3, %vm3299_vm2  ;;  %v3279_v18 = vand.u32 2147483647, %v8233_v62 }
 0x57e   :  { %v3295_v44 = vsub.f32 1.0, %v3294_v60  ;;  %3621 = vmatpush.bf16.msra.mxu2 %v4946_v46  ;;  %vm3275_vm8 = vweird.f32 %v8233_v62  ;;  %v3281_v60 = vand.u32 2147483648, %v8233_v62 }
 0x57f   :  { %v3258_v24 = vmul.f32 %v8228_v17, %v3257_v63  ;;  %5595 = vrcp.f32 %v8247_v35  ;;  %v3319_v36 = vand.u32 2147483648, %v8247_v35  ;;  %v3317_v16 = vand.u32 2147483647, %v8247_v35 }
 0x580   :  { %v3296_v39 = vmul.f32 %v8235_v11, %v3295_v44  ;;  %5597 = vpow2.f32 %v4900_v2  ;;  %v4930_v2 = vor.u32 %v5310_v3, %v4929_v30  ;;  %v4906_v44 = vor.u32 %v5305_v56, %v4905_v25 }
 0x581   :  { %v3259_v33 = vadd.f32 %v8228_v17, %v3258_v24  ;;  %5599 = vtanh.f32 %v3245_v45  ;;  %vm3313_vm11 = vweird.f32 %v8247_v35  ;;  %vm3280_vm13 = vcmp.eq.f32.partialorder %v3279_v18, 8.507059e+37 }
 0x582   :  { %v3297_v13 = vadd.f32 %v8235_v11, %v3296_v39  ;;  %v8308_v34 = vpop.eup %5591  ;;  %3622 = vmatpush.bf16.msra.mxu2 %v4930_v2  ;;  %v4918_v39 = vor.u32 %v5304_v61, %v4915_v43  ;;  %3595 = vmatpush.bf16.msra.mxu0 %v4906_v44  ;;  %v3320_v21 = vor.u32 1.1754944e-38, %v3319_v36  ;;  %vm3318_vm15 = vcmp.eq.f32.partialorder %v3317_v16, 8.507059e+37  ;;  %v8552_v43 = vld [vmem:[#allocation26_spill] sm:$0xff] }
 0x583   :  { %v3263_v52 = vsel %vm8282_vm5, %v8228_v17, %v3259_v33  ;;  %v8322_v26 = vpop.eup %5593  ;;  %v3271_v4 = vmul.f32 %v8308_v34, %v8233_v62  ;;  %vm3276_vm9 = vweird.f32 %v8308_v34  ;;  %v3344_v18 = vand.u32 2147483648, %v8231_v28 }
 0x584   :  { %v3268_v27 = vsel %vm8250_vm1, %v3267_v10, %v3263_v52  ;;  %v3301_v12 = vsel %vm8294_vm6, %v8235_v11, %v3297_v13  ;;  %v4907_v11 = vld [vmem:[%s8450_s3 + $0x10] sm:$0xf0]  ;;  %v3334_v9 = vmul.f32 %v8322_v26, %v8231_v28  ;;  %vm3277_vm12 = vmor %vm3275_vm8, %vm3276_vm9  ;;  %vm3339_vm0 = vweird.f32 %v8322_v26 }
 0x585   :  { %v5596_v50 = vpop.eup %5595  ;;  %v3306_v17 = vsel %vm8299_vm7, %v3305_v5, %v3301_v12  ;;  %v3367_v31 = vmul.f32 %v5590_v0, %v3268_v27  ;;  %v3272_v48 = vsub.f32 1.0, %v3271_v4  ;;  %v4910_v10 = vor.u32 %v5303_v14, %v4907_v11  ;;  %v8551_v11 = vld [vmem:[#allocation25_spill] sm:$0xff] }
 0x586   :  { %v3365_v20 = vmul.f32 %v3306_v17, %v8047_v38  ;;  %v3309_v54 = vmul.f32 %v5596_v50, %v8247_v35  ;;  %v5598_v63 = vpop.eup %5597  ;;  %v4934_v38 = vor.u32 %v5308_v29, %v4931_v41  ;;  %vm3314_vm10 = vweird.f32 %v5596_v50  ;;  %3623 = vmatpush.bf16.msra.mxu2 %v4914_v37 }
 0x587   :  { %v3273_v40 = vmul.f32 %v8308_v34, %v3272_v48  ;;  %v3332_v24 = vadd.f32 1.0, %v5598_v63  ;;  %v5600_v45 = vpop.eup %5599  ;;  %v3282_v5 = vor.u32 1.1754944e-38, %v3281_v60  ;;  %3609 = vmatpush.bf16.msra.mxu1 %v4910_v10  ;;  %v3335_v33 = vsub.f32 1.0, %v3334_v9  ;;  %vm3315_vm14 = vmor %vm3313_vm11, %vm3314_vm10  ;;  %v8553_v9 = vld [vmem:[#allocation27_spill] sm:$0xff] }
 0x588   :  { %v8363_v49 = vadd.f32 %v3367_v31, %v3365_v20  ;;  %v3310_v7 = vsub.f32 1.0, %v3309_v54  ;;  %3636 = vmatpush.bf16.msra.mxu3 %v4934_v38  ;;  %vm3338_vm1 = vweird.f32 %v8231_v28  ;;  %v3345_v12 = vor.u32 1.1754944e-38, %v3344_v18  ;;  %v8554_v38 = vld [vmem:[#allocation28_spill] sm:$0xff] }
 0x589   :  { %v3274_v23 = vadd.f32 %v8308_v34, %v3273_v40  ;;  %5601 = vrcp.f32 %v3332_v24  ;;  %v3336_v47 = vmul.f32 %v8322_v26, %v3335_v33  ;;  %v3359_v19 = vand.u32 2147483648, %v3332_v24  ;;  %vm3340_vm3 = vmor %vm3338_vm1, %vm3339_vm0 }
 0x58a   :  { %v3311_v8 = vmul.f32 %v5596_v50, %v3310_v7  ;;  %5603 = vtanh.f32 %v8363_v49  ;;  %v3357_v3 = vand.u32 2147483647, %v3332_v24  ;;  %vm3353_vm4 = vweird.f32 %v3332_v24 }
 0x58b   :  { %v3278_v51 = vsel %vm3277_vm12, %v8308_v34, %v3274_v23  ;;  %v3337_v35 = vadd.f32 %v8322_v26, %v3336_v47  ;;  %v3360_v4 = vor.u32 1.1754944e-38, %v3359_v19  ;;  %v385_v53 = vadd.f32 %v8551_v11, %v6224_v59 }
 0x58c   :  { %v3312_v46 = vadd.f32 %v5596_v50, %v3311_v8  ;;  %v3283_v22 = vsel %vm3280_vm13, %v3282_v5, %v3278_v51  ;;  %3637 = vmatpush.bf16.msra.mxu3 %v4918_v39  ;;  %vm3358_vm7 = vcmp.eq.f32.partialorder %v3357_v3, 8.507059e+37  ;;  %v483_v63 = vadd.f32 %v8552_v43, %v6263_v57 }
 0x58d   :  { %v3368_v55 = vmul.f32 %v5600_v45, %v3283_v22  ;;  %v3341_v41 = vsel %vm3340_vm3, %v8322_v26, %v3337_v35  ;;  %v8550_v26 = vld [vmem:[#allocation23_spill] sm:$0xff]  ;;  %v338_v2 = vadd.f32 %v8553_v9, %v6199_v6  ;;  %v387_v44 = vadd.f32 %v8554_v38, %v6224_v59  ;;  %v8555_v59 = vld [vmem:[#allocation29_spill] sm:$0xff]  ;;  %v8556_v22 = vld [vmem:[#allocation30_spill] sm:$0xff] }
 0x58e   :  { %v3316_v0 = vsel %vm3315_vm14, %v5596_v50, %v3312_v46  ;;  %v336_v32 = vadd.f32 %v8550_v26, %v6199_v6  ;;  %v434_v46 = vadd.f32 %v8555_v59, %v6334_v58 }
 0x58f   :  { %v3321_v13 = vsel %vm3318_vm15, %v3320_v21, %v3316_v0  ;;  %v5602_v34 = vpop.eup %5601  ;;  %v485_v0 = vadd.f32 %v8556_v22, %v6263_v57 }
 0x590   :  { %v3366_v30 = vmul.f32 %v3321_v13, %v8063_v42  ;;  %v3349_v62 = vmul.f32 %v5602_v34, %v3332_v24  ;;  %v3342_v42 = vand.u32 2147483647, %v8231_v28  ;;  %vm3354_vm2 = vweird.f32 %v5602_v34  ;;  %v5604_v27 = vpop.eup %5603 }
 0x591   :  { %vm3355_vm5 = vmor %vm3353_vm4, %vm3354_vm2 }
 0x592   :  { %v8379_v52 = vadd.f32 %v3368_v55, %v3366_v30  ;;  %v3350_v36 = vsub.f32 1.0, %v3349_v62  ;;  %vm3343_vm6 = vcmp.eq.f32.partialorder %v3342_v42, 8.507059e+37  ;;  %v8557_v42 = vld [vmem:[#allocation31_spill] sm:$0xff] }
 0x593   :  { %v3346_v14 = vsel %vm3343_vm6, %v3345_v12, %v3341_v41 }
 0x594   :  { %5605 = vtanh.f32 %v8379_v52  ;;  %v3351_v1 = vmul.f32 %v5602_v34, %v3350_v36  ;;  %v3373_v17 = vmul.f32 %v5604_v27, %v3346_v14 }
 0x596   :  { %v3352_v29 = vadd.f32 %v5602_v34, %v3351_v1  ;;  %v436_v1 = vadd.f32 %v8557_v42, %v6334_v58 }
 0x598   :  { %v3356_v56 = vsel %vm3355_vm5, %v5602_v34, %v3352_v29 }
 0x599   :  { %v3361_v50 = vsel %vm3358_vm7, %v3360_v4, %v3356_v56 }
 0x59a   :  { %v5606_v25 = vpop.eup %5605 }
 0x59b   :  { %v3374_v28 = vmul.f32 %v5606_v25, %v3361_v50 }
 0x59d   :  { %v5368_v31 = vpack.c.bf16 %v3374_v28, %v3373_v17 }
 0x59f   :  { %5380 = vst [vmem:[%s8453_s4 + $0x30] sm:$0xff] %v5368_v31   ;;  %3596 = vmatmul.bf16.vlgmr.msra.gmra.mxu0 %v5368_v31  ;;  %3610 = vmatmul.bf16.vlgmr.msra.gmra.mxu1 %v5368_v31 }
 0x5a0   :  { %3624 = vmatmul.bf16.vlgmr.msra.gmra.mxu2 %v5368_v31  ;;  %3638 = vmatmul.bf16.vlgmr.msra.gmra.mxu3 %v5368_v31 }
 0x61c   :  { %v3597_v15 = vpop.f32.mrf.mxu0  ;;  %v3611_v20 = vpop.f32.mrf.mxu1 }
 0x61d   :  { %v3644_v48 = vadd.f32 %v3597_v15, %v336_v32  ;;  %v3645_v54 = vadd.f32 %v3611_v20, %v385_v53 }
 0x61f   :  { %v5031_v60 = vmul.f32 -1.442695, %v3644_v48  ;;  %v5033_v61 = vmul.f32 -1.442695, %v3645_v54 }
 0x621   :  { %5607 = vpow2.f32 %v5031_v60 }
 0x622   :  { %5609 = vpow2.f32 %v5033_v61 }
 0x623   :  { %v3639_v7 = vpop.f32.mrf.mxu3  ;;  %v3625_v6 = vpop.f32.mrf.mxu2 }
 0x624   :  { %v3647_v40 = vadd.f32 %v3639_v7, %v483_v63  ;;  %v3599_v24 = vpop.f32.mrf.mxu0  ;;  %v3613_v10 = vpop.f32.mrf.mxu1  ;;  %v3646_v13 = vadd.f32 %v3625_v6, %v434_v46 }
 0x625   :  { %v3648_v37 = vadd.f32 %v3599_v24, %v338_v2  ;;  %v3649_v39 = vadd.f32 %v3613_v10, %v387_v44 }
 0x626   :  { %v5035_v45 = vmul.f32 -1.442695, %v3647_v40 }
 0x627   :  { %v5608_v8 = vpop.eup %5607  ;;  %v5032_v23 = vmul.f32 -1.442695, %v3648_v37  ;;  %v5034_v33 = vmul.f32 -1.442695, %v3649_v39 }
 0x628   :  { %v5610_v16 = vpop.eup %5609  ;;  %v3658_v5 = vadd.f32 1.0, %v5608_v8  ;;  %5611 = vpow2.f32 %v5035_v45 }
 0x629   :  { %v3696_v51 = vadd.f32 1.0, %v5610_v16  ;;  %5613 = vpow2.f32 %v5032_v23 }
 0x62a   :  { %5615 = vrcp.f32 %v3658_v5  ;;  %v3669_v4 = vand.u32 2147483647, %v3658_v5  ;;  %v3671_v25 = vand.u32 2147483648, %v3658_v5  ;;  %vm3665_vm10 = vweird.f32 %v3658_v5 }
 0x62b   :  { %5617 = vrcp.f32 %v3696_v51  ;;  %v3641_v21 = vpop.f32.mrf.mxu3  ;;  %v3709_v12 = vand.u32 2147483648, %v3696_v51  ;;  %v3627_v56 = vpop.f32.mrf.mxu2  ;;  %v3707_v50 = vand.u32 2147483647, %v3696_v51  ;;  %vm3703_vm11 = vweird.f32 %v3696_v51 }
 0x62c   :  { %5619 = vpow2.f32 %v5034_v33  ;;  %v3651_v34 = vadd.f32 %v3641_v21, %v485_v0  ;;  %v3650_v31 = vadd.f32 %v3627_v56, %v436_v1  ;;  %v3672_v32 = vor.u32 1.1754944e-38, %v3671_v25 }
 0x62d   :  { %v3710_v20 = vor.u32 1.1754944e-38, %v3709_v12  ;;  %vm3670_vm14 = vcmp.eq.f32.partialorder %v3669_v4, 8.507059e+37  ;;  %vm3708_vm15 = vcmp.eq.f32.partialorder %v3707_v50, 8.507059e+37 }
 0x62e   :  { %v5612_v55 = vpop.eup %5611  ;;  %v5036_v41 = vmul.f32 -1.442695, %v3651_v34 }
 0x62f   :  { %v5614_v47 = vpop.eup %5613  ;;  %v8406_v30 = vadd.f32 1.0, %v5612_v55 }
 0x630   :  { %v5616_v62 = vpop.eup %5615  ;;  %v8408_v35 = vadd.f32 1.0, %v5614_v47 }
 0x631   :  { %v5618_v36 = vpop.eup %5617  ;;  %v3661_v18 = vmul.f32 %v5616_v62, %v3658_v5  ;;  %5621 = vrcp.f32 %v8406_v30  ;;  %vm3666_vm8 = vweird.f32 %v5616_v62  ;;  %v3749_v38 = vand.u32 2147483648, %v8406_v30 }
 0x632   :  { %v5620_v19 = vpop.eup %5619  ;;  %v3699_v3 = vmul.f32 %v5618_v36, %v3696_v51  ;;  %5623 = vtanh.f32 %v3646_v13  ;;  %vm3704_vm9 = vweird.f32 %v5618_v36  ;;  %vm3667_vm12 = vmor %vm3665_vm10, %vm3666_vm8  ;;  %vm3680_vm0 = vweird.f32 %v8408_v35 }
 0x633   :  { %v3662_v57 = vsub.f32 1.0, %v3661_v18  ;;  %5625 = vrcp.f32 %v8408_v35  ;;  %v8414_v29 = vadd.f32 1.0, %v5620_v19  ;;  %vm3705_vm13 = vmor %vm3703_vm11, %vm3704_vm9  ;;  %v3684_v39 = vand.u32 2147483647, %v8408_v35 }
 0x634   :  { %v3700_v27 = vsub.f32 1.0, %v3699_v3  ;;  %v3686_v45 = vand.u32 2147483648, %v8408_v35  ;;  %vm3743_vm4 = vweird.f32 %v8406_v30  ;;  %v3747_v46 = vand.u32 2147483647, %v8406_v30 }
 0x635   :  { %v3663_v14 = vmul.f32 %v5616_v62, %v3662_v57  ;;  %5627 = vrcp.f32 %v8414_v29  ;;  %v3724_v37 = vand.u32 2147483648, %v8414_v29  ;;  %v3722_v5 = vand.u32 2147483647, %v8414_v29 }
 0x636   :  { %v3701_v17 = vmul.f32 %v5618_v36, %v3700_v27  ;;  %5629 = vpow2.f32 %v5036_v41  ;;  %v3687_v21 = vor.u32 1.1754944e-38, %v3686_v45  ;;  %vm3718_vm7 = vweird.f32 %v8414_v29 }
 0x637   :  { %v8417_v58 = vpop.eup %5621  ;;  %v3664_v28 = vadd.f32 %v5616_v62, %v3663_v14  ;;  %5631 = vtanh.f32 %v3650_v31  ;;  %vm3685_vm8 = vcmp.eq.f32.partialorder %v3684_v39, 8.507059e+37  ;;  %v3725_v47 = vor.u32 1.1754944e-38, %v3724_v37 }
 0x638   :  { %v5624_v26 = vpop.eup %5623  ;;  %v3702_v11 = vadd.f32 %v5618_v36, %v3701_v17  ;;  %v3739_v53 = vmul.f32 %v8417_v58, %v8406_v30  ;;  %vm3744_vm2 = vweird.f32 %v8417_v58  ;;  %v3750_v34 = vor.u32 1.1754944e-38, %v3749_v38 }
 0x639   :  { %v5626_v15 = vpop.eup %5625  ;;  %v3668_v48 = vsel %vm3667_vm12, %v5616_v62, %v3664_v28  ;;  %vm8437_vm6 = vmor %vm3743_vm4, %vm3744_vm2  ;;  %vm3723_vm10 = vcmp.eq.f32.partialorder %v3722_v5, 8.507059e+37  ;;  %vm3748_vm11 = vcmp.eq.f32.partialorder %v3747_v46, 8.507059e+37 }
 0x63a   :  { %v3673_v54 = vsel %vm3670_vm14, %v3672_v32, %v3668_v48  ;;  %v3706_v60 = vsel %vm3705_vm13, %v5618_v36, %v3702_v11  ;;  %v3740_v61 = vsub.f32 1.0, %v3739_v53  ;;  %v3676_v43 = vmul.f32 %v5626_v15, %v8408_v35 }
 0x63b   :  { %v5628_v63 = vpop.eup %5627  ;;  %v3711_v9 = vsel %vm3708_vm15, %v3710_v20, %v3706_v60  ;;  %v3772_v2 = vmul.f32 %v5624_v26, %v3673_v54  ;;  %vm3681_vm1 = vweird.f32 %v5626_v15 }
 0x63c   :  { %v3770_v44 = vmul.f32 %v3711_v9, %v8363_v49  ;;  %v3741_v7 = vmul.f32 %v8417_v58, %v3740_v61  ;;  %v3677_v40 = vsub.f32 1.0, %v3676_v43  ;;  %v3714_v24 = vmul.f32 %v5628_v63, %v8414_v29  ;;  %v5630_v10 = vpop.eup %5629  ;;  %vm3682_vm5 = vmor %vm3680_vm0, %vm3681_vm1 }
 0x63d   :  { %v3737_v33 = vadd.f32 1.0, %v5630_v10  ;;  %vm3719_vm3 = vweird.f32 %v5628_v63  ;;  %v5632_v59 = vpop.eup %5631 }
 0x63e   :  { %v3774_v8 = vadd.f32 %v3772_v2, %v3770_v44  ;;  %v3715_v23 = vsub.f32 1.0, %v3714_v24  ;;  %v3678_v16 = vmul.f32 %v5626_v15, %v3677_v40  ;;  %v3742_v49 = vadd.f32 %v8417_v58, %v3741_v7  ;;  %vm3720_vm9 = vmor %vm3718_vm7, %vm3719_vm3 }
 0x63f   :  { %v3764_v27 = vand.u32 2147483648, %v3737_v33  ;;  %v3762_v4 = vand.u32 2147483647, %v3737_v33  ;;  %vm3758_vm13 = vweird.f32 %v3737_v33 }
 0x640   :  { %5633 = vtanh.f32 %v3774_v8  ;;  %v3716_v51 = vmul.f32 %v5628_v63, %v3715_v23  ;;  %v3679_v6 = vadd.f32 %v5626_v15, %v3678_v16  ;;  %v3746_v13 = vsel %vm8437_vm6, %v8417_v58, %v3742_v49 }
 0x641   :  { %5635 = vrcp.f32 %v3737_v33  ;;  %v3751_v19 = vsel %vm3748_vm11, %v3750_v34, %v3746_v13  ;;  %v3765_v56 = vor.u32 1.1754944e-38, %v3764_v27  ;;  %vm3763_vm15 = vcmp.eq.f32.partialorder %v3762_v4, 8.507059e+37 }
 0x642   :  { %v3683_v0 = vsel %vm3682_vm5, %v5626_v15, %v3679_v6  ;;  %v3717_v55 = vadd.f32 %v5628_v63, %v3716_v51 }
 0x643   :  { %v3688_v30 = vsel %vm3685_vm8, %v3687_v21, %v3683_v0 }
 0x644   :  { %v3721_v62 = vsel %vm3720_vm9, %v5628_v63, %v3717_v55  ;;  %v3773_v35 = vmul.f32 %v5632_v59, %v3688_v30 }
 0x645   :  { %v3726_v36 = vsel %vm3723_vm10, %v3725_v47, %v3721_v62 }
 0x646   :  { %v5634_v18 = vpop.eup %5633  ;;  %v3771_v42 = vmul.f32 %v3726_v36, %v8379_v52 }
 0x647   :  { %v5636_v1 = vpop.eup %5635  ;;  %v3778_v3 = vmul.f32 %v5634_v18, %v3751_v19 }
 0x648   :  { %v3775_v57 = vadd.f32 %v3773_v35, %v3771_v42  ;;  %v3754_v29 = vmul.f32 %v5636_v1, %v3737_v33  ;;  %vm3759_vm12 = vweird.f32 %v5636_v1 }
 0x649   :  { %vm3760_vm14 = vmor %vm3758_vm13, %vm3759_vm12 }
 0x64a   :  { %5637 = vtanh.f32 %v3775_v57  ;;  %v3755_v41 = vsub.f32 1.0, %v3754_v29 }
 0x64c   :  { %v3756_v12 = vmul.f32 %v5636_v1, %v3755_v41 }
 0x64e   :  { %v3757_v25 = vadd.f32 %v5636_v1, %v3756_v12 }
 0x650   :  { %v5638_v14 = vpop.eup %5637  ;;  %v3761_v50 = vsel %vm3760_vm14, %v5636_v1, %v3757_v25 }
 0x651   :  { %v3766_v17 = vsel %vm3763_vm15, %v3765_v56, %v3761_v50 }
 0x652   :  { %v3779_v58 = vmul.f32 %v5638_v14, %v3766_v17 }
 0x654   :  { %v5373_v52 = vpack.c.bf16 %v3779_v58, %v3778_v3 }
 0x656   :  { %5381 = vst [vmem:[%s8453_s4 + $0x38] sm:$0xff] %v5373_v52  }

</bundles_post_ra>
